<compile_context>
chip_gen: v5e
topology: v5e:2x2
jax: 0.10.0
libtpu: 0.0.40
codegen_flags: <defaults>
</compile_context>

<pallas_src>
import functools

import jax
import jax.numpy as jnp
from jax.experimental import pallas as pl
from jax.experimental.pallas import tpu as pltpu

_MASK_VALUE = -1e30  # large finite negative (avoids exp(-inf - -inf) = NaN)


def _head_kernel(x_ref, wqkv_ref, o_ref, *, head_size, masked, mxu_dtype,
                 exp_dtype):
    # x_ref block: (bb, T, C); wqkv_ref block: (C, 3H); o_ref block: (bb, T, H)
    H = head_size
    bb, T, C = x_ref.shape
    ex_dt = jnp.float32 if exp_dtype is None else exp_dtype

    def mx(a):
        return a if mxu_dtype is None else a.astype(mxu_dtype)

    # Fused QKV projection over all bb*T rows in one MXU pass.
    # (bb*T = 256 at the demo shapes -> fills the 256-wide MXU on v6e/v7x.)
    x2d = mx(x_ref[...]).reshape(bb * T, C)
    qkv = jnp.dot(x2d, wqkv_ref[...],
                  preferred_element_type=jnp.float32)           # (bb*T, 3H) f32

    # One (bb*T, 3H) cast instead of three per-slice casts; slices below are
    # 128-lane aligned when H is a multiple of 128.
    qkv = mx(qkv).reshape(bb, T, 3 * H)
    q = qkv[..., :H]          # 1/sqrt(H) already folded into the Q weight cols
    k = qkv[..., H:2 * H]
    v = qkv[..., 2 * H:]

    # Scores: contract the last axes of q and k directly (no k.T transpose).
    wei = jnp.einsum("bqh,bkh->bqk", q, k,
                     preferred_element_type=jnp.float32)        # (bb, T, T) f32

    if masked:
        row = jax.lax.broadcasted_iota(jnp.int32, (T, T), 0)
        col = jax.lax.broadcasted_iota(jnp.int32, (T, T), 1)
        causal = (col <= row)[None]                             # (1, T, T)
        wei = jnp.where(causal, wei, _MASK_VALUE)

    # Numerically-stable softmax with deferred normalization (flash trick):
    # out = (exp(wei - m) @ v) * (1/sum), so the normalization costs T*H
    # multiplies instead of T*T. Row max/sum reductions stay in f32.
    m = jnp.max(wei, axis=-1, keepdims=True)
    e = jnp.exp((wei - m).astype(ex_dt))                        # bf16 EUP exp
    s = jnp.sum(e, axis=-1, keepdims=True, dtype=jnp.float32)   # (bb, T, 1)

    pv = jnp.einsum("bqk,bkh->bqh", mx(e), v,
                    preferred_element_type=jnp.float32)         # (bb, T, H) f32
    out = pv * pl.reciprocal(s, approx=True)                    # EUP vrcp slot
    o_ref[...] = out.astype(o_ref.dtype)


def fuse_qkv_weights(w_query, w_key, w_value, *, mxu_dtype=jnp.bfloat16):
    """One-time weight prep: fuse the three (C, H) projections into a single
    (C, 3H) matrix, fold the 1/sqrt(H) attention scale into the Q columns and
    pre-cast to the MXU feed dtype.  Do this at init, NOT per forward call
    (per-call it is a separate eager XLA op with HBM traffic comparable to the
    kernel's own)."""
    H = w_query.shape[1]
    wqkv = jnp.concatenate([w_query * (H ** -0.5), w_key, w_value], axis=1)
    if mxu_dtype is not None:
        wqkv = wqkv.astype(mxu_dtype)
    return wqkv


def head_attention(x, wqkv, *, masked=True, mxu_dtype=jnp.bfloat16,
                   exp_dtype=jnp.bfloat16, batch_block=None):
    """x: (B, T, C); wqkv: (C, 3H) from `fuse_qkv_weights`. Returns (B, T, H).

    mxu_dtype: dtype used to feed the MXU (accumulation stays f32); must match
               the dtype wqkv was prepared with. None keeps full precision.
    exp_dtype: dtype of the softmax exp (bf16 is faster on v6e/v7x; use
               jnp.float32 on v5e, which has no bf16 EUP/VPU path).
    batch_block: batches processed per grid step. Default targets ~256
               projection rows (bb*T) so the QKV matmul fills the 256-wide
               MXU without blowing VMEM for large B*T.
    """
    B, T, C = x.shape
    H = wqkv.shape[1] // 3

    if batch_block is None:
        target = max(1, 256 // T)
        batch_block = 1
        for d in range(min(B, target), 0, -1):
            if B % d == 0:
                batch_block = d
                break
    assert B % batch_block == 0, "batch_block must divide B"

    kernel = functools.partial(_head_kernel, head_size=H, masked=masked,
                               mxu_dtype=mxu_dtype, exp_dtype=exp_dtype)

    return pl.pallas_call(
        kernel,
        out_shape=jax.ShapeDtypeStruct((B, T, H), x.dtype),
        grid_spec=pltpu.PrefetchScalarGridSpec(
            num_scalar_prefetch=0,
            grid=(B // batch_block,),
            in_specs=[
                pl.BlockSpec((batch_block, T, C), lambda b: (b, 0, 0)),
                pl.BlockSpec((C, 3 * H), lambda b: (0, 0)),
            ],
            out_specs=pl.BlockSpec((batch_block, T, H), lambda b: (b, 0, 0)),
        ),
        compiler_params=pltpu.CompilerParams(
            dimension_semantics=("parallel",)),
    )(x, wqkv)


def head_attention_ref(x, w_query, w_key, w_value, *, masked=True,
                       mxu_dtype=None, exp_dtype=None):
    """Plain-JAX reference.

    With mxu_dtype=exp_dtype=None this is the exact f32 semantics of the
    PyTorch Head (eval-mode dropout).  With the kernel's dtypes it mirrors the
    kernel's rounding (remaining differences: approx reciprocal + accumulation
    order only)."""
    B, T, C = x.shape
    H = w_query.shape[1]
    mx = (lambda a: a) if mxu_dtype is None else (lambda a: a.astype(mxu_dtype))
    ex_dt = jnp.float32 if exp_dtype is None else exp_dtype
    f32 = jnp.float32

    wqkv = jnp.concatenate([w_query * (H ** -0.5), w_key, w_value], axis=1)
    qkv = jnp.einsum("btc,cd->btd", mx(x), mx(wqkv),
                     preferred_element_type=f32)
    qkv = mx(qkv)
    q = qkv[..., :H]
    k = qkv[..., H:2 * H]
    v = qkv[..., 2 * H:]

    wei = jnp.einsum("bqh,bkh->bqk", q, k, preferred_element_type=f32)
    if masked:
        row = jnp.arange(T)[:, None]
        col = jnp.arange(T)[None, :]
        wei = jnp.where(col <= row, wei, _MASK_VALUE)
    m = jnp.max(wei, axis=-1, keepdims=True)
    e = jnp.exp((wei - m).astype(ex_dt))
    s = jnp.sum(e, axis=-1, keepdims=True, dtype=f32)
    out = jnp.einsum("bqk,bkh->bqh", mx(e), v, preferred_element_type=f32) / s
    return out.astype(x.dtype)


if __name__ == "__main__":
    # Small shapes consistent with the module:
    #   batch=2, seq T=128 (<= block_size=256), embedding C=n_embd=384,
    #   head_size H=128 (lane-dense output; 128-aligned q/k/v slices).
    B, T, C, H = 2, 128, 384, 128

    key = jax.random.PRNGKey(0)
    kx, kk, kq, kv = jax.random.split(key, 4)

    x = jax.random.normal(kx, (B, T, C), dtype=jnp.float32)
    # Deterministic weight init (stand-in for nn.Linear weights, stored (C, H)).
    w_key = jax.random.normal(kk, (C, H), dtype=jnp.float32) * (C ** -0.5)
    w_query = jax.random.normal(kq, (C, H), dtype=jnp.float32) * (C ** -0.5)
    w_value = jax.random.normal(kv, (C, H), dtype=jnp.float32) * (C ** -0.5)

    # One-time weight prep outside the per-call path (fuse + fold scale + cast).
    wqkv = jax.block_until_ready(
        fuse_qkv_weights(w_query, w_key, w_value, mxu_dtype=jnp.bfloat16))

    fwd = jax.jit(head_attention)
    out = jax.block_until_ready(fwd(x, wqkv))
    assert out.shape == (B, T, H)

    # Tight check: reference mirroring the kernel's MXU/exp dtypes (residual
    # differences: approx reciprocal + accumulation order only).
    ref_mirror = head_attention_ref(x, w_query, w_key, w_value, masked=True,
                                    mxu_dtype=jnp.bfloat16,
                                    exp_dtype=jnp.bfloat16)
    assert jnp.allclose(out, ref_mirror, atol=1e-2, rtol=1e-2), \
        "mismatch vs bf16-mirrored reference"

    # Loose check: exact f32 softmax semantics of the PyTorch module
    # (differences here are only the bf16 MXU/exp feeds).
    ref_f32 = head_attention_ref(x, w_query, w_key, w_value, masked=True)
    assert jnp.allclose(out, ref_f32, atol=5e-2, rtol=5e-2), \
        "mismatch vs exact f32 reference"

    print("KERNEL_OK")
</pallas_src>

<mosaic_0001>
module attributes {stable_mosaic.version = 11 : i64} {
  func.func @_head_kernel(%arg0: i32, %arg1: memref<2x128x384xf32, #tpu.memory_space<vmem>>, %arg2: memref<384x384xbf16, #tpu.memory_space<vmem>>, %arg3: memref<2x128x128xf32, #tpu.memory_space<vmem>>) attributes {dimension_semantics = [#tpu.dimension_semantics<parallel>], iteration_bounds = array<i64: 1>, scalar_prefetch = 0 : i64, scratch_operands = 0 : i64, tpu.core_type = #tpu.core_type<tc>, window_params = [{transform_indices = @transform_0, window_bounds = array<i64: 2, 128, 384>}, {pipeline_mode = #tpu.pipeline_mode<synchronous>, transform_indices = @transform_1, window_bounds = array<i64: 384, 384>}, {transform_indices = @transform_2, window_bounds = array<i64: 2, 128, 128>}]} {
    %c0 = arith.constant 0 : index
    %c0_0 = arith.constant 0 : index
    %c0_1 = arith.constant 0 : index
    %0 = vector.load %arg1[%c0, %c0_0, %c0_1] : memref<2x128x384xf32, #tpu.memory_space<vmem>>, vector<2x128x384xf32>
    %1 = arith.truncf %0 : vector<2x128x384xf32> to vector<2x128x384xbf16>
    %2 = vector.shape_cast %1 : vector<2x128x384xbf16> to vector<256x384xbf16>
    %c0_2 = arith.constant 0 : index
    %c0_3 = arith.constant 0 : index
    %3 = vector.load %arg2[%c0_2, %c0_3] : memref<384x384xbf16, #tpu.memory_space<vmem>>, vector<384x384xbf16>
    %cst = arith.constant dense<0.000000e+00> : vector<256x384xf32>
    %4 = tpu.matmul %2, %3, %cst {dimension_numbers = #tpu.dot_dimension_numbers<[1], [0], [0], [1], [0, 0, 1, 1], [], []>} : vector<256x384xbf16>, vector<384x384xbf16>, vector<256x384xf32> -> vector<256x384xf32>
    %5 = arith.truncf %4 : vector<256x384xf32> to vector<256x384xbf16>
    %6 = vector.shape_cast %5 : vector<256x384xbf16> to vector<2x128x384xbf16>
    %7 = vector.extract_strided_slice %6 {offsets = [0, 0, 0], sizes = [2, 128, 128], strides = [1, 1, 1]} : vector<2x128x384xbf16> to vector<2x128x128xbf16>
    %8 = vector.extract_strided_slice %6 {offsets = [0, 0, 128], sizes = [2, 128, 128], strides = [1, 1, 1]} : vector<2x128x384xbf16> to vector<2x128x128xbf16>
    %9 = vector.extract_strided_slice %6 {offsets = [0, 0, 256], sizes = [2, 128, 128], strides = [1, 1, 1]} : vector<2x128x384xbf16> to vector<2x128x128xbf16>
    "tpu.trace_start"() <{level = 10 : i32, message = "bqh,bkh->bqk"}> : () -> ()
    %cst_4 = arith.constant dense<0.000000e+00> : vector<2x128x128xf32>
    %10 = tpu.matmul %7, %8, %cst_4 {dimension_numbers = #tpu.dot_dimension_numbers<[2], [2], [1], [1], [0, 0, 0, 1, 1, 1], [0], [0]>} : vector<2x128x128xbf16>, vector<2x128x128xbf16>, vector<2x128x128xf32> -> vector<2x128x128xf32>
    "tpu.trace_stop"() : () -> ()
    %11 = tpu.iota {dimensions = array<i32: 0>} : vector<128x128xi32>
    %12 = tpu.iota {dimensions = array<i32: 1>} : vector<128x128xi32>
    %13 = arith.cmpi sle, %12, %11 : vector<128x128xi32>
    %14 = vector.shape_cast %13 : vector<128x128xi1> to vector<1x128x128xi1>
    %cst_5 = arith.constant -1.000000e+30 : f32
    %15 = vector.shape_cast %14 : vector<1x128x128xi1> to vector<1x128x128xi1>
    %16 = vector.broadcast %15 : vector<1x128x128xi1> to vector<2x128x128xi1>
    %17 = vector.broadcast %cst_5 : f32 to vector<2x128x128xf32>
    %18 = arith.select %16, %10, %17 : vector<2x128x128xi1>, vector<2x128x128xf32>
    %cst_6 = arith.constant dense<0xFF800000> : vector<2x128xf32>
    %19 = vector.multi_reduction <maximumf>, %18, %cst_6 [2] : vector<2x128x128xf32> to vector<2x128xf32>
    %20 = vector.shape_cast %19 : vector<2x128xf32> to vector<2x128x1xf32>
    %21 = vector.broadcast %20 : vector<2x128x1xf32> to vector<2x128x128xf32>
    %22 = arith.subf %18, %21 : vector<2x128x128xf32>
    %23 = arith.truncf %22 : vector<2x128x128xf32> to vector<2x128x128xbf16>
    %24 = math.exp %23 : vector<2x128x128xbf16>
    %25 = arith.extf %24 : vector<2x128x128xbf16> to vector<2x128x128xf32>
    %cst_7 = arith.constant dense<0.000000e+00> : vector<2x128xf32>
    %26 = vector.multi_reduction <add>, %25, %cst_7 [2] : vector<2x128x128xf32> to vector<2x128xf32>
    %27 = vector.shape_cast %26 : vector<2x128xf32> to vector<2x128x1xf32>
    "tpu.trace_start"() <{level = 10 : i32, message = "bqk,bkh->bqh"}> : () -> ()
    %cst_8 = arith.constant dense<0.000000e+00> : vector<2x128x128xf32>
    %28 = tpu.matmul %24, %9, %cst_8 {dimension_numbers = #tpu.dot_dimension_numbers<[2], [1], [1], [2], [0, 0, 0, 1, 1, 2], [0], [0]>} : vector<2x128x128xbf16>, vector<2x128x128xbf16>, vector<2x128x128xf32> -> vector<2x128x128xf32>
    "tpu.trace_stop"() : () -> ()
    %29 = tpu.reciprocal %27 {approx = true} : vector<2x128x1xf32> -> vector<2x128x1xf32>
    %30 = vector.broadcast %29 : vector<2x128x1xf32> to vector<2x128x128xf32>
    %31 = arith.mulf %28, %30 : vector<2x128x128xf32>
    %c0_9 = arith.constant 0 : index
    %c0_10 = arith.constant 0 : index
    %c0_11 = arith.constant 0 : index
    %32 = vector.load %arg3[%c0_9, %c0_10, %c0_11] : memref<2x128x128xf32, #tpu.memory_space<vmem>>, vector<2x128x128xf32>
    tpu.vector_store %arg3[%c0_9, %c0_10, %c0_11], %31 {strides = array<i32>} : memref<2x128x128xf32, #tpu.memory_space<vmem>>, vector<2x128x128xf32>,
    return
  }
  func.func @transform_0(%arg0: i32) -> (i32, i32, i32) {
    %c0_i32 = arith.constant 0 : i32
    %c0_i32_0 = arith.constant 0 : i32
    %c0_i32_1 = arith.constant 0 : i32
    return %arg0, %c0_i32, %c0_i32_0 : i32, i32, i32
  }
  func.func @transform_1(%arg0: i32) -> (i32, i32) {
    %c0_i32 = arith.constant 0 : i32
    %c0_i32_0 = arith.constant 0 : i32
    %c0_i32_1 = arith.constant 0 : i32
    return %c0_i32, %c0_i32_0 : i32, i32
  }
  func.func @transform_2(%arg0: i32) -> (i32, i32, i32) {
    %c0_i32 = arith.constant 0 : i32
    %c0_i32_0 = arith.constant 0 : i32
    %c0_i32_1 = arith.constant 0 : i32
    return %arg0, %c0_i32, %c0_i32_0 : i32, i32, i32
  }
}

</mosaic_0001>

<bundles_post_ra>
// kernel: head_attention.1
= control target key start
LH: loop header
LB: loop body
LE: loop exit
PB: predicated region body
PF: predicated region fallthrough
CT: control target
= control target key end

     0   :  { %7 = vsyncpa [#allocation3], 0  ;;  %s4895_s0 = inlined_call_operand.hbm [shape: f32[2,128,384], index: 0, kind: input, shape index: {}]   ;;  %s4896_s1 = inlined_call_operand.hbm [shape: bf16[384,384], index: 1, kind: input, shape index: {}]   ;;  %s4897_s2 = inlined_call_operand.hbm [shape: f32[2,128,128], index: 2, kind: output, shape index: {}]  }
   0x1   :  { %8 = vsyncpa [#allocation6], 0 }
   0x2   :  { %9 = vsyncpa [#allocation4], 0  ;;  %s14_s11 = sshll.u32 %s4895_s0, 4  ;;  %s3543_s12 = smov [#allocation2]   ;;  %s15_s11 = int_to_ptr.hbm [resolvable:$true] %s14_s11 }
   0x3   :  { %s16_s13 = sshll.u32 %s3543_s12, 4  ;;  %s27_s16 = sshll.u32 %s4896_s1, 4  ;;  %s17_s13 = int_to_ptr.vmem [resolvable:$true] %s16_s13  ;;  %s28_s16 = int_to_ptr.hbm [resolvable:$true] %s27_s16 }
   0x4   :  { %s3544_s17 = smov 384   ;;  %s3545_s18 = smov 24  }
   0x5   :  { %22 = dma.hbm_to_vmem [thread:$0]  %s15_s11, 12288, %s17_s13, [#allocation3], %s3544_s17, %s3544_s17, %s3545_s18  }
   0x6   :  { %s3546_s19 = smov [#allocation5]   ;;  %s3547_s21 = smov 192  }
   0x7   :  { %s29_s20 = sshll.u32 %s3546_s19, 4  ;;  %s3548_s22 = smov 12   ;;  %s30_s20 = int_to_ptr.vmem [resolvable:$true] %s29_s20 }
   0x8   :  { %35 = dma.hbm_to_vmem [thread:$0]  %s28_s16, 9216, %s30_s20, [#allocation6], %s3547_s21, %s3547_s21, %s3548_s22  }
   0x9   :  { %3537 = dma.done.wait [#allocation3], 12288  }
   0xa   :  { %3538 = vsyncadd [#allocation3], 4294955008 }
   0xb   :  { %3539 = dma.done.wait [#allocation6], 9216  }
   0xc   :  { %3540 = vsyncadd [#allocation6], 4294958080  ;;  %v3038_v0 = vld [vmem:[#allocation5 + $0xa8] sm:$0xf]  ;;  %v3262_v1 = vld [vmem:[#allocation5 + $0xb0] sm:$0xf0] }
   0xd   :  { %v3134_v2 = vld [vmem:[#allocation5 + $0x168] sm:$0xf]  ;;  %v3039_v3 = vor.u32 %v3262_v1, %v3038_v0  ;;  %v3286_v4 = vld [vmem:[#allocation5 + $0x170] sm:$0xf0]  ;;  %v3026_v5 = vld [vmem:[#allocation5 + $0x90] sm:$0xf] }
   0xe   :  { %v3259_v6 = vld [vmem:[#allocation5 + $0x98] sm:$0xf0]  ;;  %v3135_v7 = vor.u32 %v3286_v4, %v3134_v2  ;;  %v3122_v8 = vld [vmem:[#allocation5 + $0x150] sm:$0xf]  ;;  %v3014_v12 = vld [vmem:[#allocation5 + $0x78] sm:$0xf] }
   0xf   :  { %v3283_v9 = vld [vmem:[#allocation5 + $0x158] sm:$0xf0]  ;;  %940 = vmatpush.bf16.msra.mxu0 %v3039_v3  ;;  %3312 = vmatpush.bf16.msra.mxu2 %v3039_v3  ;;  %v3027_v10 = vor.u32 %v3259_v6, %v3026_v5  ;;  %v3256_v13 = vld [vmem:[#allocation5 + $0x80] sm:$0xf0]  ;;  %v3110_v14 = vld [vmem:[#allocation5 + $0x138] sm:$0xf] }
  0x10   :  { %1029 = vmatpush.bf16.msra.mxu1 %v3135_v7  ;;  %v3123_v11 = vor.u32 %v3283_v9, %v3122_v8  ;;  %3320 = vmatpush.bf16.msra.mxu3 %v3135_v7  ;;  %v3280_v15 = vld [vmem:[#allocation5 + $0x140] sm:$0xf0]  ;;  %v3015_v16 = vor.u32 %v3256_v13, %v3014_v12  ;;  %v3002_v18 = vld [vmem:[#allocation5 + $0x60] sm:$0xf]  ;;  %v3253_v19 = vld [vmem:[#allocation5 + $0x68] sm:$0xf0] }
  0x11   :  { %v3111_v17 = vor.u32 %v3280_v15, %v3110_v14  ;;  %v3098_v20 = vld [vmem:[#allocation5 + $0x120] sm:$0xf]  ;;  %v3277_v21 = vld [vmem:[#allocation5 + $0x128] sm:$0xf0]  ;;  %v3003_v22 = vor.u32 %v3253_v19, %v3002_v18  ;;  %v2990_v24 = vld [vmem:[#allocation5 + $0x48] sm:$0xf] }
  0x12   :  { %v3099_v23 = vor.u32 %v3277_v21, %v3098_v20  ;;  %v3250_v25 = vld [vmem:[#allocation5 + $0x50] sm:$0xf0]  ;;  %v3086_v26 = vld [vmem:[#allocation5 + $0x108] sm:$0xf]  ;;  %v2978_v30 = vld [vmem:[#allocation5 + $0x30] sm:$0xf] }
  0x13   :  { %941 = vmatpush.bf16.msra.mxu0 %v3027_v10  ;;  %3313 = vmatpush.bf16.msra.mxu2 %v3027_v10  ;;  %v3274_v27 = vld [vmem:[#allocation5 + $0x110] sm:$0xf0]  ;;  %v2991_v28 = vor.u32 %v3250_v25, %v2990_v24  ;;  %v3247_v31 = vld [vmem:[#allocation5 + $0x38] sm:$0xf0]  ;;  %v3074_v32 = vld [vmem:[#allocation5 + $0xf0] sm:$0xf] }
  0x14   :  { %1030 = vmatpush.bf16.msra.mxu1 %v3123_v11  ;;  %3321 = vmatpush.bf16.msra.mxu3 %v3123_v11  ;;  %v3087_v29 = vor.u32 %v3274_v27, %v3086_v26  ;;  %v3271_v33 = vld [vmem:[#allocation5 + $0xf8] sm:$0xf0]  ;;  %v44_v34 = vld [vmem:[#allocation2] sm:$0xff]  ;;  %v45_v35 = vld [vmem:[#allocation2 + $0x8] sm:$0xff]  ;;  %v2979_v39 = vor.u32 %v3247_v31, %v2978_v30  ;;  %s3549_s0 = smov [#allocation7]   ;;  %s2938_s25 = sshll.u32 %s4897_s2, 4  ;;  %s2939_s25 = int_to_ptr.hbm [resolvable:$true] %s2938_s25 }
  0x15   :  { %v47_v36 = vld [vmem:[#allocation2 + $0x18] sm:$0xff]  ;;  %v48_v37 = vld [vmem:[#allocation2 + $0x20] sm:$0xff]  ;;  %v117_v40 = vld [vmem:[#allocation2 + $0x248] sm:$0xff]  ;;  %v3075_v43 = vor.u32 %v3271_v33, %v3074_v32  ;;  %v140_v48 = vpack.c.bf16 %v45_v35, %v44_v34  ;;  %s2936_s1 = sshll.u32 %s3549_s0, 4  ;;  %s3550_s26 = smov 128   ;;  %s2937_s1 = int_to_ptr.vmem [resolvable:$true] %s2936_s1 }
  0x16   :  { %v116_v38 = vld [vmem:[#allocation2 + $0x240] sm:$0xff]  ;;  %v119_v41 = vld [vmem:[#allocation2 + $0x258] sm:$0xff]  ;;  %v142_v49 = vpack.c.bf16 %v48_v37, %v47_v36  ;;  %v3241_v55 = vld [vmem:[#allocation5 + $0x8] sm:$0xf0]  ;;  %s3551_s27 = smov 8  }
  0x17   :  { %942 = vmatpush.bf16.msra.mxu0 %v3015_v16  ;;  %3314 = vmatpush.bf16.msra.mxu2 %v3015_v16  ;;  %v120_v42 = vld [vmem:[#allocation2 + $0x260] sm:$0xff]  ;;  %v2966_v44 = vld [vmem:[#allocation5 + $0x18] sm:$0xf]  ;;  %v3573_v50 = vpack.c.bf16 %v117_v40, %v116_v38  ;;  %v3265_v57 = vld [vmem:[#allocation5 + $0xc8] sm:$0xf0]  ;;  %v364_v58 = vunpack.c.l.b16 %v140_v48  ;;  %v365_v63 = vunpack.c.h.b16 %v140_v48 }
  0x18   :  { %1031 = vmatpush.bf16.msra.mxu1 %v3111_v17  ;;  %3322 = vmatpush.bf16.msra.mxu3 %v3111_v17  ;;  %v3244_v45 = vld [vmem:[#allocation5 + $0x20] sm:$0xf0]  ;;  %v3062_v46 = vld [vmem:[#allocation5 + $0xd8] sm:$0xf]  ;;  %v3575_v51 = vpack.c.bf16 %v120_v42, %v119_v41  ;;  %v2954_v54 = vld [vmem:[#allocation5] sm:$0xf]  ;;  %v367_v59 = vunpack.c.l.b16 %v142_v49  ;;  %v368_v0 = vunpack.c.h.b16 %v142_v49 }
  0x19   :  { %v3268_v47 = vld [vmem:[#allocation5 + $0xe0] sm:$0xf0]  ;;  %v2967_v52 = vor.u32 %v3244_v45, %v2966_v44  ;;  %v3050_v56 = vld [vmem:[#allocation5 + $0xc0] sm:$0xf]  ;;  %v436_v60 = vunpack.c.l.b16 %v3573_v50  ;;  %v2955_v62 = vor.u32 %v3241_v55, %v2954_v54  ;;  %v50_v5 = vld [vmem:[#allocation2 + $0x30] sm:$0xff] }
  0x1a   :  { %v3063_v53 = vor.u32 %v3268_v47, %v3062_v46  ;;  %v439_v61 = vunpack.c.l.b16 %v3575_v51  ;;  %v3051_v1 = vor.u32 %v3265_v57, %v3050_v56  ;;  %v3579_v2 = vpack.c.b16 %v367_v59, %v364_v58  ;;  %v51_v6 = vld [vmem:[#allocation2 + $0x38] sm:$0xff]  ;;  %v53_v7 = vld [vmem:[#allocation2 + $0x48] sm:$0xff]  ;;  %v54_v8 = vld [vmem:[#allocation2 + $0x50] sm:$0xff] }
  0x1b   :  { %943 = vmatpush.bf16.msra.mxu0 %v3003_v22  ;;  %3315 = vmatpush.bf16.msra.mxu2 %v3003_v22  ;;  %v3583_v4 = vpack.c.b16 %v368_v0, %v365_v63  ;;  %v3230_v9 = vld [vmem:[#allocation5 + $0x228] sm:$0xf]  ;;  %v3310_v10 = vld [vmem:[#allocation5 + $0x230] sm:$0xf0]  ;;  %v123_v12 = vld [vmem:[#allocation2 + $0x278] sm:$0xff]  ;;  %v144_v21 = vpack.c.bf16 %v51_v6, %v50_v5  ;;  %v146_v22 = vpack.c.bf16 %v54_v8, %v53_v7 }
  0x1c   :  { %1032 = vmatpush.bf16.msra.mxu1 %v3099_v23  ;;  %3323 = vmatpush.bf16.msra.mxu3 %v3099_v23  ;;  %v3581_v3 = vpack.c.b16 %v439_v61, %v436_v60  ;;  %v122_v11 = vld [vmem:[#allocation2 + $0x270] sm:$0xff]  ;;  %v125_v13 = vld [vmem:[#allocation2 + $0x288] sm:$0xff]  ;;  %v3231_v14 = vor.u32 %v3310_v10, %v3230_v9  ;;  %v3307_v17 = vld [vmem:[#allocation5 + $0x218] sm:$0xf0]  ;;  %v437_v61 = vunpack.c.h.b16 %v3573_v50 }
  0x1d   :  { %v126_v15 = vld [vmem:[#allocation2 + $0x290] sm:$0xff]  ;;  %v3206_v19 = vld [vmem:[#allocation5 + $0x1f8] sm:$0xf]  ;;  %v3304_v20 = vld [vmem:[#allocation5 + $0x200] sm:$0xf0]  ;;  %v3588_v23 = vpack.c.bf16 %v123_v12, %v122_v11  ;;  %v371_v32 = vunpack.c.h.b16 %v144_v21  ;;  %v374_v33 = vunpack.c.h.b16 %v146_v22 }
  0x1e   :  { %4944 = vst [vmem:[#allocation11_spill] sm:$0xff] %v3581_v3  ;;  %v3218_v16 = vld [vmem:[#allocation5 + $0x210] sm:$0xf]  ;;  %v3590_v24 = vpack.c.bf16 %v126_v15, %v125_v13  ;;  %v3207_v25 = vor.u32 %v3304_v20, %v3206_v19  ;;  %v3194_v26 = vld [vmem:[#allocation5 + $0x1e0] sm:$0xf]  ;;  %v59_v40 = vld [vmem:[#allocation2 + $0x78] sm:$0xff] }
  0x1f   :  { %944 = vmatpush.bf16.msra.mxu0 %v2991_v28  ;;  %3316 = vmatpush.bf16.msra.mxu2 %v2991_v28  ;;  %v3219_v18 = vor.u32 %v3307_v17, %v3218_v16  ;;  %v3301_v27 = vld [vmem:[#allocation5 + $0x1e8] sm:$0xf0]  ;;  %v370_v28 = vunpack.c.l.b16 %v144_v21  ;;  %v442_v30 = vunpack.c.l.b16 %v3588_v23  ;;  %v3598_v37 = vpack.c.b16 %v374_v33, %v371_v32  ;;  %v56_v38 = vld [vmem:[#allocation2 + $0x60] sm:$0xff]  ;;  %v3182_v42 = vld [vmem:[#allocation5 + $0x1c8] sm:$0xf] }
  0x20   :  { %1033 = vmatpush.bf16.msra.mxu1 %v3087_v29  ;;  %3324 = vmatpush.bf16.msra.mxu3 %v3087_v29  ;;  %v373_v29 = vunpack.c.l.b16 %v146_v22  ;;  %v445_v31 = vunpack.c.l.b16 %v3590_v24  ;;  %v3195_v34 = vor.u32 %v3301_v27, %v3194_v26  ;;  %v60_v41 = vld [vmem:[#allocation2 + $0x80] sm:$0xff]  ;;  %v129_v45 = vld [vmem:[#allocation2 + $0x2a8] sm:$0xff]  ;;  %v131_v46 = vld [vmem:[#allocation2 + $0x2b8] sm:$0xff]  ;;  %v443_v27 = vunpack.c.h.b16 %v3588_v23 }
  0x21   :  { %v128_v44 = vld [vmem:[#allocation2 + $0x2a0] sm:$0xff]  ;;  %v3170_v49 = vld [vmem:[#allocation5 + $0x1b0] sm:$0xf]  ;;  %v3158_v55 = vld [vmem:[#allocation5 + $0x198] sm:$0xf]  ;;  %v150_v57 = vpack.c.bf16 %v60_v41, %v59_v40 }
  0x22   :  { %v3594_v35 = vpack.c.b16 %v373_v29, %v370_v28  ;;  %v3596_v36 = vpack.c.b16 %v445_v31, %v442_v30  ;;  %v132_v48 = vld [vmem:[#allocation2 + $0x2c0] sm:$0xff]  ;;  %v3603_v58 = vpack.c.bf16 %v129_v45, %v128_v44  ;;  %v62_v13 = vld [vmem:[#allocation2 + $0x90] sm:$0xff]  ;;  %v65_v15 = vld [vmem:[#allocation2 + $0xa8] sm:$0xff]  ;;  %v446_v28 = vunpack.c.h.b16 %v3590_v24 }
  0x23   :  { %945 = vmatpush.bf16.msra.mxu0 %v2979_v39  ;;  %3317 = vmatpush.bf16.msra.mxu2 %v2979_v39  ;;  %v57_v39 = vld [vmem:[#allocation2 + $0x68] sm:$0xff]  ;;  %v3292_v56 = vld [vmem:[#allocation5 + $0x1a0] sm:$0xf0]  ;;  %v3605_v59 = vpack.c.bf16 %v132_v48, %v131_v46  ;;  %v3146_v0 = vld [vmem:[#allocation5 + $0x180] sm:$0xf]  ;;  %v379_v5 = vunpack.c.l.b16 %v150_v57  ;;  %v380_v10 = vunpack.c.h.b16 %v150_v57 }
  0x24   :  { %1034 = vmatpush.bf16.msra.mxu1 %v3075_v43  ;;  %3325 = vmatpush.bf16.msra.mxu3 %v3075_v43  ;;  %4945 = vst [vmem:[#allocation12_spill] sm:$0xff] %v3596_v36  ;;  %v3298_v43 = vld [vmem:[#allocation5 + $0x1d0] sm:$0xf0]  ;;  %v148_v54 = vpack.c.bf16 %v57_v39, %v56_v38  ;;  %v3159_v60 = vor.u32 %v3292_v56, %v3158_v55  ;;  %v448_v6 = vunpack.c.l.b16 %v3603_v58  ;;  %v137_v19 = vld [vmem:[#allocation2 + $0x2e8] sm:$0xff]  ;;  %v68_v23 = vld [vmem:[#allocation2 + $0xc0] sm:$0xff] }
  0x25   :  { %v3183_v47 = vor.u32 %v3298_v43, %v3182_v42  ;;  %v451_v7 = vunpack.c.l.b16 %v3605_v59  ;;  %v66_v16 = vld [vmem:[#allocation2 + $0xb0] sm:$0xff]  ;;  %v3631_v33 = vpack.c.b16 %v446_v28, %v443_v27  ;;  %v69_v24 = vld [vmem:[#allocation2 + $0xc8] sm:$0xff]  ;;  %v71_v42 = vld [vmem:[#allocation2 + $0xd8] sm:$0xff] }
  0x26   :  { %v376_v63 = vunpack.c.l.b16 %v148_v54  ;;  %v377_v9 = vunpack.c.h.b16 %v148_v54  ;;  %v134_v17 = vld [vmem:[#allocation2 + $0x2d0] sm:$0xff]  ;;  %v154_v22 = vpack.c.bf16 %v66_v16, %v65_v15  ;;  %v72_v43 = vld [vmem:[#allocation2 + $0xe0] sm:$0xff]  ;;  %v49_v45 = vld [vmem:[#allocation2 + $0x28] sm:$0xff]  ;;  %v156_v46 = vpack.c.bf16 %v69_v24, %v68_v23 }
  0x27   :  { %946 = vmatpush.bf16.msra.mxu0 %v2967_v52  ;;  %3318 = vmatpush.bf16.msra.mxu2 %v2967_v52  ;;  %v3295_v52 = vld [vmem:[#allocation5 + $0x1b8] sm:$0xf0]  ;;  %v3616_v50 = vpack.c.b16 %v451_v7, %v448_v6  ;;  %v138_v20 = vld [vmem:[#allocation2 + $0x2f0] sm:$0xff]  ;;  %4947 = vst [vmem:[#allocation14_spill] sm:$0xff] %v3631_v33  ;;  %v3016_v15 = vld [vmem:[#allocation5 + $0x84] sm:$0xf0] }
  0x28   :  { %1035 = vmatpush.bf16.msra.mxu1 %v3063_v53  ;;  %3326 = vmatpush.bf16.msra.mxu3 %v3063_v53  ;;  %v3171_v53 = vor.u32 %v3295_v52, %v3170_v49  ;;  %v3614_v12 = vpack.c.b16 %v379_v5, %v376_v63  ;;  %v3625_v26 = vpack.c.bf16 %v138_v20, %v137_v19  ;;  %v385_v30 = vunpack.c.l.b16 %v154_v22  ;;  %v46_v44 = vld [vmem:[#allocation2 + $0x10] sm:$0xff]  ;;  %v3252_v28 = vld [vmem:[#allocation5 + $0x64] sm:$0xf] }
  0x29   :  { %4946 = vst [vmem:[#allocation13_spill] sm:$0xff] %v3616_v50  ;;  %v386_v38 = vunpack.c.h.b16 %v154_v22  ;;  %v141_v48 = vpack.c.bf16 %v46_v44, %v46_v44  ;;  %v143_v49 = vpack.c.bf16 %v49_v45, %v49_v45  ;;  %v449_v52 = vunpack.c.h.b16 %v3603_v58  ;;  %v3258_v58 = vld [vmem:[#allocation5 + $0x94] sm:$0xf]  ;;  %v2992_v44 = vld [vmem:[#allocation5 + $0x54] sm:$0xf0] }
  0x2a   :  { %v457_v32 = vunpack.c.l.b16 %v3625_v26  ;;  %v388_v54 = vunpack.c.l.b16 %v156_v46  ;;  %v389_v63 = vunpack.c.h.b16 %v156_v46  ;;  %v78_v16 = vld [vmem:[#allocation2 + $0x110] sm:$0xff] }
  0x2b   :  { %947 = vmatpush.bf16.msra.mxu0 %v2955_v62  ;;  %3319 = vmatpush.bf16.msra.mxu2 %v2955_v62  ;;  %v440_v62 = vunpack.c.h.b16 %v3575_v51  ;;  %v3618_v51 = vpack.c.b16 %v380_v10, %v377_v9  ;;  %v366_v56 = vunpack.c.l.b16 %v141_v48  ;;  %v369_v57 = vunpack.c.l.b16 %v143_v49  ;;  %v74_v10 = vld [vmem:[#allocation2 + $0xf0] sm:$0xff] }
  0x2c   :  { %1036 = vmatpush.bf16.msra.mxu1 %v3051_v1  ;;  %3327 = vmatpush.bf16.msra.mxu3 %v3051_v1  ;;  %v3289_v1 = vld [vmem:[#allocation5 + $0x188] sm:$0xf0] }
  0x2d   :  { %v3611_v8 = vpack.c.b16 %v440_v62, %v437_v61  ;;  %v3147_v11 = vor.u32 %v3289_v1, %v3146_v0  ;;  %v3261_v61 = vld [vmem:[#allocation5 + $0xac] sm:$0xf]  ;;  %v3040_v62 = vld [vmem:[#allocation5 + $0xb4] sm:$0xf0]  ;;  %v3650_v6 = vpack.c.b16 %v369_v57, %v366_v56  ;;  %v3243_v57 = vld [vmem:[#allocation5 + $0x1c] sm:$0xf] }
  0x2e   :  { %948 = vmatmul.bf16.vlgmr.msra.gmra.mxu0 %v3579_v2  ;;  %1008 = vmatmul.bf16.vlgmr.msra.gmra.mxu2 %v3581_v3  ;;  %v3043_v1 = vor.u32 %v3261_v61, %v3040_v62  ;;  %v83_v56 = vld [vmem:[#allocation2 + $0x138] sm:$0xff]  ;;  %v2968_v61 = vld [vmem:[#allocation5 + $0x24] sm:$0xf0]  ;;  %v84_v62 = vld [vmem:[#allocation2 + $0x140] sm:$0xff] }
  0x2f   :  { %1037 = vmatmul.bf16.vlgmr.msra.gmra.mxu1 %v3583_v4  ;;  %1118 = vmatpush.bf16.msrb.mxu2 %v3231_v14  ;;  %v63_v14 = vld [vmem:[#allocation2 + $0x98] sm:$0xff]  ;;  %4952 = vst [vmem:[#allocation19_spill] sm:$0xff] %v3650_v6 }
  0x30   :  { %1097 = vmatmul.bf16.vlgmr.msra.gmra.mxu3 %v3611_v8  ;;  %v152_v21 = vpack.c.bf16 %v63_v14, %v62_v13  ;;  %v77_v13 = vld [vmem:[#allocation2 + $0x108] sm:$0xff]  ;;  %v3255_v14 = vld [vmem:[#allocation5 + $0x7c] sm:$0xf] }
  0x31   :  { %1207 = vmatpush.bf16.msrb.mxu3 %v3043_v1  ;;  %v3019_v19 = vor.u32 %v3255_v14, %v3016_v15  ;;  %v2971_v1 = vor.u32 %v3243_v57, %v2968_v61  ;;  %v93_v57 = vld [vmem:[#allocation2 + $0x188] sm:$0xff]  ;;  %v95_v61 = vld [vmem:[#allocation2 + $0x198] sm:$0xff] }
  0x32   :  { %v382_v29 = vunpack.c.l.b16 %v152_v21 }
  0x33   :  { %1119 = vmatpush.bf16.msrb.mxu2 %v3219_v18  ;;  %v135_v18 = vld [vmem:[#allocation2 + $0x2d8] sm:$0xff] }
  0x34   :  { %v3634_v39 = vpack.c.b16 %v385_v30, %v382_v29  ;;  %v3004_v29 = vld [vmem:[#allocation5 + $0x6c] sm:$0xf0] }
  0x35   :  { %v3007_v30 = vor.u32 %v3252_v28, %v3004_v29  ;;  %v86_v28 = vld [vmem:[#allocation2 + $0x150] sm:$0xff]  ;;  %v87_v29 = vld [vmem:[#allocation2 + $0x158] sm:$0xff] }
  0x36   :  { %4948 = vst [vmem:[#allocation15_spill] sm:$0xff] %v3634_v39 }
  0x37   :  { %1120 = vmatpush.bf16.msrb.mxu2 %v3207_v25  ;;  %v3623_v25 = vpack.c.bf16 %v135_v18, %v134_v17  ;;  %v52_v17 = vld [vmem:[#allocation2 + $0x40] sm:$0xff]  ;;  %v55_v18 = vld [vmem:[#allocation2 + $0x58] sm:$0xff] }
  0x38   :  { %v145_v22 = vpack.c.bf16 %v52_v17, %v52_v17  ;;  %v147_v27 = vpack.c.bf16 %v55_v18, %v55_v18 }
  0x39   :  { %v454_v31 = vunpack.c.l.b16 %v3623_v25 }
  0x3a   :  { %v372_v23 = vunpack.c.l.b16 %v145_v22  ;;  %v375_v24 = vunpack.c.l.b16 %v147_v27 }
  0x3b   :  { %1121 = vmatpush.bf16.msrb.mxu2 %v3195_v34  ;;  %v383_v34 = vunpack.c.h.b16 %v152_v21  ;;  %v3636_v40 = vpack.c.b16 %v457_v32, %v454_v31  ;;  %v162_v21 = vpack.c.bf16 %v78_v16, %v77_v13  ;;  %v455_v31 = vunpack.c.h.b16 %v3623_v25  ;;  %v3246_v25 = vld [vmem:[#allocation5 + $0x34] sm:$0xf]  ;;  %v2956_v13 = vld [vmem:[#allocation5 + $0xc] sm:$0xf0] }
  0x3c   :  { %v458_v32 = vunpack.c.h.b16 %v3625_v26  ;;  %v3664_v49 = vpack.c.b16 %v375_v24, %v372_v23  ;;  %v2980_v26 = vld [vmem:[#allocation5 + $0x3c] sm:$0xf0] }
  0x3d   :  { %4949 = vst [vmem:[#allocation16_spill] sm:$0xff] %v3636_v40  ;;  %v3638_v41 = vpack.c.b16 %v386_v38, %v383_v34  ;;  %v397_v38 = vunpack.c.l.b16 %v162_v21  ;;  %v398_v46 = vunpack.c.h.b16 %v162_v21 }
  0x3e   :  { %953 = vmatmul.bf16.gmra.mxu0 %v3594_v35  ;;  %1013 = vmatmul.bf16.gmra.mxu2 %v3596_v36  ;;  %4956 = vst [vmem:[#allocation23_spill] sm:$0xff] %v3664_v49 }
  0x3f   :  { %1042 = vmatmul.bf16.gmra.mxu1 %v3598_v37  ;;  %1122 = vmatpush.bf16.msrb.mxu2 %v3183_v47  ;;  %v158_v47 = vpack.c.bf16 %v72_v43, %v71_v42  ;;  %v3659_v42 = vpack.c.b16 %v458_v32, %v455_v31  ;;  %v3249_v43 = vld [vmem:[#allocation5 + $0x4c] sm:$0xf]  ;;  %v90_v31 = vld [vmem:[#allocation2 + $0x170] sm:$0xff]  ;;  %v64_v32 = vld [vmem:[#allocation2 + $0xa0] sm:$0xff] }
  0x40   :  { %1102 = vmatmul.bf16.gmra.mxu3 %v3631_v33  ;;  %v153_v24 = vpack.c.bf16 %v64_v32, %v64_v32  ;;  %v3136_v32 = vld [vmem:[#allocation5 + $0x174] sm:$0xf0] }
  0x41   :  { %v391_v55 = vunpack.c.l.b16 %v158_v47  ;;  %v392_v0 = vunpack.c.h.b16 %v158_v47  ;;  %4954 = vst [vmem:[#allocation21_spill] sm:$0xff] %v3659_v42  ;;  %v2995_v47 = vor.u32 %v3249_v43, %v2992_v44 }
  0x43   :  { %1123 = vmatpush.bf16.msrb.mxu2 %v3171_v53  ;;  %v452_v53 = vunpack.c.h.b16 %v3605_v59  ;;  %v3648_v5 = vpack.c.b16 %v391_v55, %v388_v54  ;;  %v3028_v59 = vld [vmem:[#allocation5 + $0x9c] sm:$0xf0]  ;;  %v3652_v7 = vpack.c.b16 %v392_v0, %v389_v63  ;;  %v81_v55 = vld [vmem:[#allocation2 + $0x128] sm:$0xff]  ;;  %v58_v63 = vld [vmem:[#allocation2 + $0x70] sm:$0xff] }
  0x44   :  { %v3031_v9 = vor.u32 %v3258_v58, %v3028_v59  ;;  %v80_v54 = vld [vmem:[#allocation2 + $0x120] sm:$0xff]  ;;  %v61_v0 = vld [vmem:[#allocation2 + $0x88] sm:$0xff]  ;;  %v166_v59 = vpack.c.bf16 %v84_v62, %v83_v56 }
  0x45   :  { %4951 = vst [vmem:[#allocation18_spill] sm:$0xff] %v3648_v5  ;;  %v164_v58 = vpack.c.bf16 %v81_v55, %v80_v54  ;;  %v92_v56 = vld [vmem:[#allocation2 + $0x180] sm:$0xff] }
  0x46   :  { %4953 = vst [vmem:[#allocation20_spill] sm:$0xff] %v3652_v7  ;;  %1208 = vmatpush.bf16.msrb.mxu3 %v3031_v9  ;;  %v149_v9 = vpack.c.bf16 %v58_v63, %v58_v63  ;;  %v403_v16 = vunpack.c.l.b16 %v166_v59  ;;  %v96_v62 = vld [vmem:[#allocation2 + $0x1a0] sm:$0xff]  ;;  %v70_v63 = vld [vmem:[#allocation2 + $0xd0] sm:$0xff] }
  0x47   :  { %1124 = vmatpush.bf16.msrb.mxu2 %v3159_v60  ;;  %v3645_v60 = vpack.c.b16 %v452_v53, %v449_v52  ;;  %v2983_v53 = vor.u32 %v3246_v25, %v2980_v26  ;;  %v400_v15 = vunpack.c.l.b16 %v164_v58 }
  0x48   :  { %v378_v17 = vunpack.c.l.b16 %v149_v9 }
  0x49   :  { %4950 = vst [vmem:[#allocation17_spill] sm:$0xff] %v3645_v60  ;;  %v3671_v21 = vpack.c.b16 %v403_v16, %v400_v15 }
  0x4a   :  { %1209 = vmatpush.bf16.msrb.mxu3 %v3019_v19  ;;  %v401_v19 = vunpack.c.h.b16 %v164_v58  ;;  %v174_v58 = vpack.c.bf16 %v96_v62, %v95_v61  ;;  %v3306_v61 = vld [vmem:[#allocation5 + $0x214] sm:$0xf] }
  0x4b   :  { %1125 = vmatpush.bf16.msrb.mxu2 %v3147_v11  ;;  %v75_v11 = vld [vmem:[#allocation2 + $0xf8] sm:$0xff]  ;;  %4958 = vst [vmem:[#allocation25_spill] sm:$0xff] %v3671_v21 }
  0x4c   :  { %v160_v20 = vpack.c.bf16 %v75_v11, %v74_v10  ;;  %v151_v10 = vpack.c.bf16 %v61_v0, %v61_v0  ;;  %v3240_v11 = vld [vmem:[#allocation5 + $0x4] sm:$0xf]  ;;  %v73_v0 = vld [vmem:[#allocation2 + $0xe8] sm:$0xff]  ;;  %v416_v16 = vunpack.c.h.b16 %v174_v58 }
  0x4d   :  { %v2959_v14 = vor.u32 %v3240_v11, %v2956_v13  ;;  %v159_v9 = vpack.c.bf16 %v73_v0, %v73_v0  ;;  %v415_v11 = vunpack.c.l.b16 %v174_v58  ;;  %v3220_v58 = vld [vmem:[#allocation5 + $0x21c] sm:$0xf0] }
  0x4e   :  { %958 = vmatmul.bf16.gmra.mxu0 %v3614_v12  ;;  %1018 = vmatmul.bf16.gmra.mxu2 %v3616_v50  ;;  %v394_v34 = vunpack.c.l.b16 %v160_v20  ;;  %v395_v45 = vunpack.c.h.b16 %v160_v20  ;;  %v381_v18 = vunpack.c.l.b16 %v151_v10  ;;  %v404_v20 = vunpack.c.h.b16 %v166_v59 }
  0x4f   :  { %1047 = vmatmul.bf16.gmra.mxu1 %v3618_v51  ;;  %1210 = vmatpush.bf16.msrb.mxu3 %v3007_v30  ;;  %v89_v30 = vld [vmem:[#allocation2 + $0x168] sm:$0xff]  ;;  %v157_v59 = vpack.c.bf16 %v70_v63, %v70_v63 }
  0x50   :  { %1107 = vmatmul.bf16.gmra.mxu3 %v3645_v60  ;;  %v3662_v48 = vpack.c.b16 %v397_v38, %v394_v34  ;;  %v3666_v52 = vpack.c.b16 %v398_v46, %v395_v45  ;;  %v3673_v22 = vpack.c.b16 %v381_v18, %v378_v17  ;;  %v3676_v27 = vpack.c.b16 %v404_v20, %v401_v19  ;;  %v67_v34 = vld [vmem:[#allocation2 + $0xb8] sm:$0xff] }
  0x51   :  { %v168_v38 = vpack.c.bf16 %v87_v29, %v86_v28  ;;  %v170_v23 = vpack.c.bf16 %v90_v31, %v89_v30  ;;  %v155_v43 = vpack.c.bf16 %v67_v34, %v67_v34  ;;  %v384_v46 = vunpack.c.l.b16 %v153_v24  ;;  %v98_v29 = vld [vmem:[#allocation2 + $0x1b0] sm:$0xff]  ;;  %v3285_v31 = vld [vmem:[#allocation5 + $0x16c] sm:$0xf]  ;;  %v3232_v24 = vld [vmem:[#allocation5 + $0x234] sm:$0xf0] }
  0x52   :  { %4955 = vst [vmem:[#allocation22_spill] sm:$0xff] %v3662_v48  ;;  %v390_v13 = vunpack.c.l.b16 %v157_v59  ;;  %v3309_v34 = vld [vmem:[#allocation5 + $0x22c] sm:$0xf] }
  0x53   :  { %4957 = vst [vmem:[#allocation24_spill] sm:$0xff] %v3666_v52  ;;  %1211 = vmatpush.bf16.msrb.mxu3 %v2995_v47  ;;  %v406_v44 = vunpack.c.l.b16 %v168_v38  ;;  %v409_v45 = vunpack.c.l.b16 %v170_v23  ;;  %v387_v47 = vunpack.c.l.b16 %v155_v43  ;;  %v407_v25 = vunpack.c.h.b16 %v168_v38  ;;  %v99_v38 = vld [vmem:[#allocation2 + $0x1b8] sm:$0xff]  ;;  %v102_v43 = vld [vmem:[#allocation2 + $0x1d0] sm:$0xff] }
  0x54   :  { %4959 = vst [vmem:[#allocation26_spill] sm:$0xff] %v3673_v22  ;;  %v410_v26 = vunpack.c.h.b16 %v170_v23  ;;  %v101_v23 = vld [vmem:[#allocation2 + $0x1c8] sm:$0xff] }
  0x55   :  { %4960 = vst [vmem:[#allocation27_spill] sm:$0xff] %v3676_v27  ;;  %v3683_v54 = vpack.c.b16 %v387_v47, %v384_v46  ;;  %v3139_v46 = vor.u32 %v3285_v31, %v3136_v32  ;;  %v3235_v47 = vor.u32 %v3309_v34, %v3232_v24  ;;  %v178_v62 = vpack.c.bf16 %v102_v43, %v101_v23  ;;  %v3208_v32 = vld [vmem:[#allocation5 + $0x204] sm:$0xf0]  ;;  %v3276_v43 = vld [vmem:[#allocation5 + $0x124] sm:$0xf] }
  0x56   :  { %v3686_v55 = vpack.c.b16 %v410_v26, %v407_v25  ;;  %v176_v26 = vpack.c.bf16 %v99_v38, %v98_v29 }
  0x57   :  { %1212 = vmatpush.bf16.msrb.mxu3 %v2983_v53  ;;  %v3681_v53 = vpack.c.b16 %v409_v45, %v406_v44  ;;  %4962 = vst [vmem:[#allocation29_spill] sm:$0xff] %v3683_v54  ;;  %v76_v44 = vld [vmem:[#allocation2 + $0x100] sm:$0xff]  ;;  %v79_v45 = vld [vmem:[#allocation2 + $0x118] sm:$0xff]  ;;  %1296 = vmatpush.bf16.msrb.mxu0 %v3139_v46  ;;  %v422_v38 = vunpack.c.h.b16 %v178_v62 }
  0x58   :  { %4963 = vst [vmem:[#allocation30_spill] sm:$0xff] %v3686_v55  ;;  %1385 = vmatpush.bf16.msrb.mxu1 %v3235_v47  ;;  %v161_v63 = vpack.c.bf16 %v76_v44, %v76_v44  ;;  %v163_v0 = vpack.c.bf16 %v79_v45, %v79_v45  ;;  %v419_v34 = vunpack.c.h.b16 %v176_v26  ;;  %v3100_v44 = vld [vmem:[#allocation5 + $0x12c] sm:$0xf0]  ;;  %v3300_v45 = vld [vmem:[#allocation5 + $0x1e4] sm:$0xf] }
  0x59   :  { %4961 = vst [vmem:[#allocation28_spill] sm:$0xff] %v3681_v53 }
  0x5a   :  { %v399_v29 = vunpack.c.l.b16 %v163_v0  ;;  %v104_v0 = vld [vmem:[#allocation2 + $0x1e0] sm:$0xff] }
  0x5b   :  { %1213 = vmatpush.bf16.msrb.mxu3 %v2971_v1  ;;  %v172_v1 = vpack.c.bf16 %v93_v57, %v92_v56  ;;  %v3282_v56 = vld [vmem:[#allocation5 + $0x154] sm:$0xf]  ;;  %v3124_v57 = vld [vmem:[#allocation5 + $0x15c] sm:$0xf0] }
  0x5d   :  { %v412_v10 = vunpack.c.l.b16 %v172_v1  ;;  %v413_v15 = vunpack.c.h.b16 %v172_v1  ;;  %v3127_v1 = vor.u32 %v3282_v56, %v3124_v57  ;;  %v3103_v56 = vor.u32 %v3276_v43, %v3100_v44  ;;  %v3196_v57 = vld [vmem:[#allocation5 + $0x1ec] sm:$0xf0] }
  0x5e   :  { %963 = vmatmul.bf16.gmra.mxu0 %v3634_v39  ;;  %1023 = vmatmul.bf16.gmra.mxu2 %v3636_v40 }
  0x5f   :  { %1052 = vmatmul.bf16.gmra.mxu1 %v3638_v41  ;;  %1214 = vmatpush.bf16.msrb.mxu3 %v2959_v14  ;;  %v393_v14 = vunpack.c.l.b16 %v159_v9  ;;  %v3691_v17 = vpack.c.b16 %v415_v11, %v412_v10  ;;  %v3696_v20 = vpack.c.b16 %v416_v16, %v413_v15  ;;  %v3223_v9 = vor.u32 %v3306_v61, %v3220_v58  ;;  %v3112_v15 = vld [vmem:[#allocation5 + $0x144] sm:$0xf0]  ;;  %v3303_v16 = vld [vmem:[#allocation5 + $0x1fc] sm:$0xf]  ;;  %v3273_v58 = vld [vmem:[#allocation5 + $0x10c] sm:$0xf] }
  0x60   :  { %1112 = vmatmul.bf16.gmra.mxu3 %v3659_v42  ;;  %1297 = vmatpush.bf16.msrb.mxu0 %v3127_v1  ;;  %v3211_v23 = vor.u32 %v3303_v16, %v3208_v32  ;;  %v108_v16 = vld [vmem:[#allocation2 + $0x200] sm:$0xff] }
  0x61   :  { %4964 = vst [vmem:[#allocation31_spill] sm:$0xff] %v3691_v17  ;;  %v3693_v18 = vpack.c.b16 %v393_v14, %v390_v13  ;;  %v418_v13 = vunpack.c.l.b16 %v176_v26  ;;  %1386 = vmatpush.bf16.msrb.mxu1 %v3223_v9  ;;  %v3279_v14 = vld [vmem:[#allocation5 + $0x13c] sm:$0xf]  ;;  %v3199_v26 = vor.u32 %v3300_v45, %v3196_v57  ;;  %v3297_v9 = vld [vmem:[#allocation5 + $0x1cc] sm:$0xf] }
  0x62   :  { %4966 = vst [vmem:[#allocation33_spill] sm:$0xff] %v3696_v20  ;;  %v3115_v31 = vor.u32 %v3279_v14, %v3112_v15  ;;  %v3184_v15 = vld [vmem:[#allocation5 + $0x1d4] sm:$0xf0]  ;;  %v3172_v57 = vld [vmem:[#allocation5 + $0x1bc] sm:$0xf0] }
  0x63   :  { %4965 = vst [vmem:[#allocation32_spill] sm:$0xff] %v3693_v18 }
  0x64   :  { %1298 = vmatpush.bf16.msrb.mxu0 %v3115_v31 }
  0x65   :  { %1387 = vmatpush.bf16.msrb.mxu1 %v3211_v23  ;;  %v3294_v23 = vld [vmem:[#allocation5 + $0x1b4] sm:$0xf] }
  0x68   :  { %1299 = vmatpush.bf16.msrb.mxu0 %v3103_v56 }
  0x69   :  { %1388 = vmatpush.bf16.msrb.mxu1 %v3199_v26  ;;  %v3175_v26 = vor.u32 %v3294_v23, %v3172_v57  ;;  %v3052_v23 = vld [vmem:[#allocation5 + $0xcc] sm:$0xf0]  ;;  %v3288_v57 = vld [vmem:[#allocation5 + $0x184] sm:$0xf] }
  0x6e   :  { %968 = vmatmul.bf16.gmra.mxu0 %v3648_v5  ;;  %1126 = vmatmul.bf16.vlgmr.msrb.gmra.mxu2 %v3650_v6 }
  0x6f   :  { %1057 = vmatmul.bf16.gmra.mxu1 %v3652_v7 }
  0x70   :  { %1215 = vmatmul.bf16.vlgmr.msrb.gmra.mxu3 %v3579_v2 }
  0x7e   :  { %973 = vmatmul.bf16.gmra.mxu0 %v3662_v48  ;;  %1131 = vmatmul.bf16.gmra.mxu2 %v3664_v49 }
  0x7f   :  { %1062 = vmatmul.bf16.gmra.mxu1 %v3666_v52 }
  0x80   :  { %1220 = vmatmul.bf16.gmra.mxu3 %v3594_v35 }
  0x8e   :  { %978 = vmatmul.bf16.gmra.mxu0 %v3671_v21  ;;  %1136 = vmatmul.bf16.gmra.mxu2 %v3673_v22 }
  0x8f   :  { %1067 = vmatmul.bf16.gmra.mxu1 %v3676_v27 }
  0x90   :  { %1225 = vmatmul.bf16.gmra.mxu3 %v3614_v12 }
  0x9e   :  { %983 = vmatmul.bf16.gmra.mxu0 %v3681_v53  ;;  %1141 = vmatmul.bf16.gmra.mxu2 %v3683_v54 }
  0x9f   :  { %1072 = vmatmul.bf16.gmra.mxu1 %v3686_v55 }
  0xa0   :  { %1230 = vmatmul.bf16.gmra.mxu3 %v3634_v39 }
  0xab   :  { %v949_v19 = vpop.f32.mrf.mxu0 }
  0xac   :  { %v1038_v28 = vpop.f32.mrf.mxu1 }
  0xad   :  { %v3698_v30 = vadd.f32 %v1038_v28, %v949_v19  ;;  %v421_v19 = vunpack.c.l.b16 %v178_v62  ;;  %v396_v28 = vunpack.c.l.b16 %v161_v63  ;;  %v3714_v63 = vpack.c.b16 %v422_v38, %v419_v34  ;;  %v3270_v34 = vld [vmem:[#allocation5 + $0xf4] sm:$0xf]  ;;  %v3076_v38 = vld [vmem:[#allocation5 + $0xfc] sm:$0xf0] }
  0xae   :  { %988 = vmatmul.bf16.gmra.mxu0 %v3691_v17  ;;  %1146 = vmatmul.bf16.gmra.mxu2 %v3693_v18  ;;  %v3079_v56 = vor.u32 %v3270_v34, %v3076_v38  ;;  %v3264_v38 = vld [vmem:[#allocation5 + $0xc4] sm:$0xf] }
  0xaf   :  { %1077 = vmatmul.bf16.gmra.mxu1 %v3696_v20  ;;  %v3709_v46 = vpack.c.b16 %v421_v19, %v418_v13  ;;  %v3711_v47 = vpack.c.b16 %v399_v29, %v396_v28  ;;  %v107_v13 = vld [vmem:[#allocation2 + $0x1f8] sm:$0xff]  ;;  %v82_v19 = vld [vmem:[#allocation2 + $0x130] sm:$0xff]  ;;  %v85_v28 = vld [vmem:[#allocation2 + $0x148] sm:$0xff]  ;;  %v3187_v29 = vor.u32 %v3297_v9, %v3184_v15 }
  0xb0   :  { %v182_v43 = vpack.c.bf16 %v108_v16, %v107_v13  ;;  %v165_v44 = vpack.c.bf16 %v82_v19, %v82_v19  ;;  %v167_v45 = vpack.c.bf16 %v85_v28, %v85_v28  ;;  %v3267_v9 = vld [vmem:[#allocation5 + $0xdc] sm:$0xf]  ;;  %v3160_v13 = vld [vmem:[#allocation5 + $0x1a4] sm:$0xf0]  ;;  %1235 = vmatmul.bf16.gmra.mxu3 %v3648_v5 }
  0xb1   :  { %v3703_v25 = vpop.f32.mrf.mxu2  ;;  %4967 = vst [vmem:[#allocation34_spill] sm:$0xff] %v3709_v46  ;;  %1389 = vmatpush.bf16.msrb.mxu1 %v3187_v29 }
  0xb2   :  { %4968 = vst [vmem:[#allocation35_spill] sm:$0xff] %v3711_v47  ;;  %v402_v15 = vunpack.c.l.b16 %v165_v44  ;;  %v405_v29 = vunpack.c.l.b16 %v167_v45  ;;  %v428_v19 = vunpack.c.h.b16 %v182_v43 }
  0xb3   :  { %v951_v59 = vpop.f32.mrf.mxu0 }
  0xb4   :  { %v1040_v10 = vpop.f32.mrf.mxu1 }
  0xb5   :  { %v3705_v11 = vadd.f32 %v1040_v10, %v951_v59  ;;  %v3088_v59 = vld [vmem:[#allocation5 + $0x114] sm:$0xf0]  ;;  %v105_v10 = vld [vmem:[#allocation2 + $0x1e8] sm:$0xff]  ;;  %1390 = vmatpush.bf16.msrb.mxu1 %v3175_v26  ;;  %v3055_v26 = vor.u32 %v3264_v38, %v3052_v23 }
  0xb6   :  { %v3091_v14 = vor.u32 %v3273_v58, %v3088_v59  ;;  %v180_v32 = vpack.c.bf16 %v105_v10, %v104_v0  ;;  %v3064_v0 = vld [vmem:[#allocation5 + $0xe4] sm:$0xf0]  ;;  %v3291_v10 = vld [vmem:[#allocation5 + $0x19c] sm:$0xf] }
  0xb7   :  { %v3067_v42 = vor.u32 %v3267_v9, %v3064_v0  ;;  %v3163_v28 = vor.u32 %v3291_v10, %v3160_v13  ;;  %v113_v10 = vld [vmem:[#allocation2 + $0x228] sm:$0xff] }
  0xb8   :  { %1300 = vmatpush.bf16.msrb.mxu0 %v3091_v14  ;;  %v424_v59 = vunpack.c.l.b16 %v180_v32  ;;  %v427_v14 = vunpack.c.l.b16 %v182_v43  ;;  %v425_v16 = vunpack.c.h.b16 %v180_v32  ;;  %v1098_v43 = vpop.f32.mrf.mxu3 }
  0xb9   :  { %v3707_v24 = vpop.f32.mrf.mxu2  ;;  %1391 = vmatpush.bf16.msrb.mxu1 %v3163_v28 }
  0xba   :  { %v3732_v45 = vpack.c.b16 %v428_v19, %v425_v16 }
  0xbb   :  { %v954_v61 = vpop.f32.mrf.mxu0 }
  0xbc   :  { %v1043_v62 = vpop.f32.mrf.mxu1  ;;  %1301 = vmatpush.bf16.msrb.mxu0 %v3079_v56  ;;  %v3727_v56 = vpack.c.b16 %v427_v14, %v424_v59  ;;  %v111_v59 = vld [vmem:[#allocation2 + $0x218] sm:$0xff]  ;;  %v114_v14 = vld [vmem:[#allocation2 + $0x230] sm:$0xff] }
  0xbd   :  { %v3716_v1 = vadd.f32 %v1043_v62, %v954_v61  ;;  %v186_v19 = vpack.c.bf16 %v114_v14, %v113_v10 }
  0xbe   :  { %993 = vmatmul.bf16.gmra.mxu0 %v3709_v46  ;;  %1151 = vmatmul.bf16.gmra.mxu2 %v3711_v47  ;;  %4969 = vst [vmem:[#allocation36_spill] sm:$0xff] %v3727_v56 }
  0xbf   :  { %1082 = vmatmul.bf16.gmra.mxu1 %v3714_v63  ;;  %v433_v60 = vunpack.c.l.b16 %v186_v19 }
  0xc0   :  { %1302 = vmatpush.bf16.msrb.mxu0 %v3067_v42  ;;  %v110_v42 = vld [vmem:[#allocation2 + $0x210] sm:$0xff]  ;;  %1240 = vmatmul.bf16.gmra.mxu3 %v3662_v48 }
  0xc1   :  { %v3721_v31 = vpop.f32.mrf.mxu2  ;;  %v184_v16 = vpack.c.bf16 %v111_v59, %v110_v42  ;;  %v434_v42 = vunpack.c.h.b16 %v186_v19 }
  0xc3   :  { %v956_v61 = vpop.f32.mrf.mxu0  ;;  %v431_v39 = vunpack.c.h.b16 %v184_v16 }
  0xc4   :  { %v1045_v62 = vpop.f32.mrf.mxu1  ;;  %1303 = vmatpush.bf16.msrb.mxu0 %v3055_v26 }
  0xc5   :  { %v3723_v58 = vadd.f32 %v1045_v62, %v956_v61  ;;  %v3729_v61 = vpack.c.b16 %v405_v29, %v402_v15  ;;  %v3148_v62 = vld [vmem:[#allocation5 + $0x18c] sm:$0xf0]  ;;  %v88_v15 = vld [vmem:[#allocation2 + $0x160] sm:$0xff]  ;;  %v91_v29 = vld [vmem:[#allocation2 + $0x178] sm:$0xff] }
  0xc6   :  { %v3151_v32 = vor.u32 %v3288_v57, %v3148_v62  ;;  %v169_v28 = vpack.c.bf16 %v88_v15, %v88_v15  ;;  %v171_v38 = vpack.c.bf16 %v91_v29, %v91_v29  ;;  %v1100_v57 = vpop.f32.mrf.mxu3  ;;  %v3740_v62 = vadd.f32 %v1098_v43, %v3703_v25 }
  0xc7   :  { %4970 = vst [vmem:[#allocation37_spill] sm:$0xff] %v3729_v61  ;;  %v3752_v43 = vpack.c.b16 %v434_v42, %v431_v39 }
  0xc8   :  { %1392 = vmatpush.bf16.msrb.mxu1 %v3151_v32  ;;  %4971 = vst [vmem:[#allocation38_spill] sm:$0xff] %v3740_v62  ;;  %v408_v5 = vunpack.c.l.b16 %v169_v28  ;;  %v411_v33 = vunpack.c.l.b16 %v171_v38 }
  0xc9   :  { %v3725_v34 = vpop.f32.mrf.mxu2 }
  0xca   :  { %v3749_v14 = vpack.c.b16 %v411_v33, %v408_v5 }
  0xcb   :  { %v959_v44 = vpop.f32.mrf.mxu0 }
  0xcc   :  { %v1048_v9 = vpop.f32.mrf.mxu1  ;;  %4974 = vst [vmem:[#allocation41_spill] sm:$0xff] %v3749_v14 }
  0xcd   :  { %v3734_v0 = vadd.f32 %v1048_v9, %v959_v44  ;;  %v3743_v44 = vadd.f32 %v1100_v57, %v3707_v24  ;;  %v430_v9 = vunpack.c.l.b16 %v184_v16  ;;  %v94_v16 = vld [vmem:[#allocation2 + $0x190] sm:$0xff] }
  0xce   :  { %998 = vmatmul.bf16.gmra.mxu0 %v3727_v56  ;;  %1156 = vmatmul.bf16.gmra.mxu2 %v3729_v61  ;;  %v1103_v24 = vpop.f32.mrf.mxu3  ;;  %v173_v33 = vpack.c.bf16 %v94_v16, %v94_v16 }
  0xcf   :  { %1087 = vmatmul.bf16.gmra.mxu1 %v3732_v45  ;;  %4972 = vst [vmem:[#allocation39_spill] sm:$0xff] %v3743_v44  ;;  %v3747_v10 = vpack.c.b16 %v433_v60, %v430_v9  ;;  %v97_v60 = vld [vmem:[#allocation2 + $0x1a8] sm:$0xff]  ;;  %v3760_v39 = vadd.f32 %v1103_v24, %v3721_v31  ;;  %v100_v31 = vld [vmem:[#allocation2 + $0x1c0] sm:$0xff] }
  0xd0   :  { %v175_v5 = vpack.c.bf16 %v97_v60, %v97_v60  ;;  %v414_v9 = vunpack.c.l.b16 %v173_v33  ;;  %1245 = vmatmul.bf16.gmra.mxu3 %v3671_v21 }
  0xd1   :  { %v1019_v13 = vpop.f32.mrf.mxu2  ;;  %4973 = vst [vmem:[#allocation40_spill] sm:$0xff] %v3747_v10 }
  0xd2   :  { %4975 = vst [vmem:[#allocation42_spill] sm:$0xff] %v3760_v39  ;;  %v417_v42 = vunpack.c.l.b16 %v175_v5  ;;  %v177_v5 = vpack.c.bf16 %v100_v31, %v100_v31 }
  0xd3   :  { %v961_v23 = vpop.f32.mrf.mxu0 }
  0xd4   :  { %v1050_v26 = vpop.f32.mrf.mxu1 }
  0xd5   :  { %v3745_v32 = vadd.f32 %v1050_v26, %v961_v23 }
  0xd6   :  { %v1105_v38 = vpop.f32.mrf.mxu3 }
  0xd7   :  { %v3763_v57 = vadd.f32 %v1105_v38, %v3725_v34  ;;  %v103_v34 = vld [vmem:[#allocation2 + $0x1d8] sm:$0xff] }
  0xd9   :  { %v1021_v59 = vpop.f32.mrf.mxu2  ;;  %4976 = vst [vmem:[#allocation43_spill] sm:$0xff] %v3763_v57  ;;  %v420_v57 = vunpack.c.l.b16 %v177_v5 }
  0xdb   :  { %v964_v25 = vpop.f32.mrf.mxu0 }
  0xdc   :  { %v1053_v15 = vpop.f32.mrf.mxu1 }
  0xdd   :  { %v3754_v29 = vadd.f32 %v1053_v15, %v964_v25  ;;  %v3767_v15 = vpack.c.b16 %v417_v42, %v414_v9 }
  0xde   :  { %1003 = vmatmul.bf16.gmra.mxu0 %v3747_v10  ;;  %1161 = vmatmul.bf16.gmra.mxu2 %v3749_v14  ;;  %v1108_v60 = vpop.f32.mrf.mxu3 }
  0xdf   :  { %1092 = vmatmul.bf16.gmra.mxu1 %v3752_v43  ;;  %4977 = vst [vmem:[#allocation44_spill] sm:$0xff] %v3767_v15  ;;  %v3778_v42 = vadd.f32 %v1108_v60, %v1019_v13  ;;  %v106_v13 = vld [vmem:[#allocation2 + $0x1f0] sm:$0xff] }
  0xe0   :  { %1250 = vmatmul.bf16.gmra.mxu3 %v3681_v53 }
  0xe1   :  { %v1024_v19 = vpop.f32.mrf.mxu2  ;;  %4978 = vst [vmem:[#allocation45_spill] sm:$0xff] %v3778_v42 }
  0xe3   :  { %v966_v28 = vpop.f32.mrf.mxu0 }
  0xe4   :  { %v1055_v23 = vpop.f32.mrf.mxu1 }
  0xe5   :  { %v3765_v26 = vadd.f32 %v1055_v23, %v966_v28  ;;  %v179_v28 = vpack.c.bf16 %v103_v34, %v103_v34 }
  0xe6   :  { %v1110_v23 = vpop.f32.mrf.mxu3 }
  0xe7   :  { %v423_v21 = vunpack.c.l.b16 %v179_v28 }
  0xe9   :  { %v1026_v25 = vpop.f32.mrf.mxu2  ;;  %v3787_v62 = vpack.c.b16 %v423_v21, %v420_v57  ;;  %v181_v21 = vpack.c.bf16 %v106_v13, %v106_v13 }
  0xeb   :  { %v969_v16 = vpop.f32.mrf.mxu0  ;;  %4980 = vst [vmem:[#allocation47_spill] sm:$0xff] %v3787_v62 }
  0xec   :  { %v1058_v44 = vpop.f32.mrf.mxu1 }
  0xed   :  { %v3770_v48 = vadd.f32 %v1058_v44, %v969_v16  ;;  %v3780_v44 = vadd.f32 %v1110_v23, %v1021_v59  ;;  %v109_v59 = vld [vmem:[#allocation2 + $0x208] sm:$0xff] }
  0xee   :  { %1166 = vmatmul.bf16.gmra.mxu2 %v3767_v15  ;;  %1304 = vmatmul.bf16.vlgmr.msrb.gmra.mxu0 %v3583_v4  ;;  %v1113_v31 = vpop.f32.mrf.mxu3 }
  0xef   :  { %1393 = vmatmul.bf16.vlgmr.msrb.gmra.mxu1 %v3650_v6  ;;  %4979 = vst [vmem:[#allocation46_spill] sm:$0xff] %v3780_v44 }
  0xf0   :  { %1255 = vmatmul.bf16.gmra.mxu3 %v3691_v17 }
  0xf1   :  { %v1127_v24 = vpop.f32.mrf.mxu2 }
  0xf2   :  { %v3776_v33 = vadd.f32 %v1127_v24, %v3698_v30 }
  0xf3   :  { %v971_v38 = vpop.f32.mrf.mxu0 }
  0xf4   :  { %v1060_v9 = vpop.f32.mrf.mxu1 }
  0xf5   :  { %v3782_v16 = vadd.f32 %v1060_v9, %v971_v38  ;;  %v3798_v38 = vadd.f32 %v1113_v31, %v1024_v19  ;;  %v115_v31 = vld [vmem:[#allocation2 + $0x238] sm:$0xff] }
  0xf6   :  { %v1115_v5 = vpop.f32.mrf.mxu3 }
  0xf7   :  { %4981 = vst [vmem:[#allocation48_spill] sm:$0xff] %v3798_v38  ;;  %v3800_v23 = vadd.f32 %v1115_v5, %v1026_v25  ;;  %v112_v25 = vld [vmem:[#allocation2 + $0x220] sm:$0xff] }
  0xf9   :  { %v1129_v6 = vpop.f32.mrf.mxu2  ;;  %4982 = vst [vmem:[#allocation49_spill] sm:$0xff] %v3800_v23 }
  0xfa   :  { %v3785_v39 = vadd.f32 %v1129_v6, %v3705_v11  ;;  %v183_v11 = vpack.c.bf16 %v109_v59, %v109_v59 }
  0xfb   :  { %v974_v30 = vpop.f32.mrf.mxu0 }
  0xfc   :  { %v1063_v34 = vpop.f32.mrf.mxu1 }
  0xfd   :  { %v3790_v24 = vadd.f32 %v1063_v34, %v974_v30  ;;  %v426_v30 = vunpack.c.l.b16 %v181_v21  ;;  %v429_v34 = vunpack.c.l.b16 %v183_v11  ;;  %v187_v21 = vpack.c.bf16 %v115_v31, %v115_v31 }
  0xfe   :  { %1171 = vmatmul.bf16.gmra.mxu2 %v3787_v62  ;;  %1309 = vmatmul.bf16.gmra.mxu0 %v3598_v37  ;;  %v3812_v19 = vpop.f32.mrf.mxu3 }
  0xff   :  { %1398 = vmatmul.bf16.gmra.mxu1 %v3664_v49  ;;  %v3807_v53 = vpack.c.b16 %v429_v34, %v426_v30  ;;  %v435_v34 = vunpack.c.l.b16 %v187_v21  ;;  %v121_v21 = vld [vmem:[#allocation2 + $0x268] sm:$0xff] }
 0x100   :  { %1260 = vmatmul.bf16.gmra.mxu3 %v3709_v46 }
 0x101   :  { %v1132_v60 = vpop.f32.mrf.mxu2  ;;  %4984 = vst [vmem:[#allocation51_spill] sm:$0xff] %v3807_v53 }
 0x102   :  { %v3796_v6 = vadd.f32 %v1132_v60, %v3716_v1  ;;  %v185_v60 = vpack.c.bf16 %v112_v25, %v112_v25 }
 0x103   :  { %v976_v57 = vpop.f32.mrf.mxu0 }
 0x104   :  { %v1065_v28 = vpop.f32.mrf.mxu1  ;;  %v432_v30 = vunpack.c.l.b16 %v185_v60  ;;  %v118_v60 = vld [vmem:[#allocation2 + $0x250] sm:$0xff] }
 0x105   :  { %v3802_v9 = vadd.f32 %v1065_v28, %v976_v57 }
 0x106   :  { %v3822_v28 = vpop.f32.mrf.mxu3  ;;  %v3827_v23 = vpack.c.b16 %v435_v34, %v432_v30  ;;  %v191_v30 = vpack.c.bf16 %v121_v21, %v121_v21 }
 0x107   :  { %4983 = vst [vmem:[#allocation50_spill] sm:$0xff] %v3802_v9 }
 0x108   :  { %4986 = vst [vmem:[#allocation53_spill] sm:$0xff] %v3827_v23 }
 0x109   :  { %v1134_v44 = vpop.f32.mrf.mxu2 }
 0x10a   :  { %v3805_v49 = vadd.f32 %v1134_v44, %v3723_v58 }
 0x10b   :  { %v979_v1 = vpop.f32.mrf.mxu0 }
 0x10c   :  { %v1068_v13 = vpop.f32.mrf.mxu1 }
 0x10d   :  { %v3810_v59 = vadd.f32 %v1068_v13, %v979_v1 }
 0x10e   :  { %1176 = vmatmul.bf16.gmra.mxu2 %v3807_v53  ;;  %1314 = vmatmul.bf16.gmra.mxu0 %v3618_v51  ;;  %v3832_v31 = vpop.f32.mrf.mxu3 }
 0x10f   :  { %1403 = vmatmul.bf16.gmra.mxu1 %v3673_v22  ;;  %v441_v22 = vunpack.c.l.b16 %v191_v30  ;;  %v127_v30 = vld [vmem:[#allocation2 + $0x298] sm:$0xff] }
 0x110   :  { %1265 = vmatmul.bf16.gmra.mxu3 %v3727_v56 }
 0x111   :  { %v1137_v58 = vpop.f32.mrf.mxu2 }
 0x112   :  { %v3818_v44 = vadd.f32 %v1137_v58, %v3734_v0 }
 0x113   :  { %v981_v11 = vpop.f32.mrf.mxu0 }
 0x114   :  { %v1070_v57 = vpop.f32.mrf.mxu1 }
 0x115   :  { %v3820_v5 = vadd.f32 %v1070_v57, %v981_v11  ;;  %v189_v57 = vpack.c.bf16 %v118_v60, %v118_v60 }
 0x117   :  { %4985 = vst [vmem:[#allocation52_spill] sm:$0xff] %v3820_v5  ;;  %v438_v46 = vunpack.c.l.b16 %v189_v57  ;;  %v124_v57 = vld [vmem:[#allocation2 + $0x280] sm:$0xff] }
 0x119   :  { %v1139_v1 = vpop.f32.mrf.mxu2 }
 0x11a   :  { %v3825_v13 = vadd.f32 %v1139_v1, %v3745_v32 }
 0x11b   :  { %v984_v0 = vpop.f32.mrf.mxu0 }
 0x11c   :  { %v1073_v58 = vpop.f32.mrf.mxu1 }
 0x11d   :  { %v3830_v25 = vadd.f32 %v1073_v58, %v984_v0  ;;  %v3842_v58 = vpop.f32.mrf.mxu3 }
 0x11e   :  { %1181 = vmatmul.bf16.gmra.mxu2 %v3827_v23  ;;  %1319 = vmatmul.bf16.gmra.mxu0 %v3638_v41 }
 0x11f   :  { %1408 = vmatmul.bf16.gmra.mxu1 %v3683_v54  ;;  %v3847_v54 = vpack.c.b16 %v441_v22, %v438_v46  ;;  %v193_v46 = vpack.c.bf16 %v124_v57, %v124_v57 }
 0x120   :  { %1270 = vmatmul.bf16.gmra.mxu3 %v3747_v10 }
 0x121   :  { %v1142_v32 = vpop.f32.mrf.mxu2  ;;  %4988 = vst [vmem:[#allocation55_spill] sm:$0xff] %v3847_v54  ;;  %v444_v56 = vunpack.c.l.b16 %v193_v46 }
 0x122   :  { %v3838_v11 = vadd.f32 %v1142_v32, %v3754_v29 }
 0x123   :  { %v986_v34 = vpop.f32.mrf.mxu0 }
 0x124   :  { %v1075_v1 = vpop.f32.mrf.mxu1 }
 0x125   :  { %v3840_v0 = vadd.f32 %v1075_v1, %v986_v34  ;;  %v3852_v21 = vpop.f32.mrf.mxu3 }
 0x127   :  { %4987 = vst [vmem:[#allocation54_spill] sm:$0xff] %v3840_v0 }
 0x129   :  { %v1144_v17 = vpop.f32.mrf.mxu2 }
 0x12a   :  { %v3845_v38 = vadd.f32 %v1144_v17, %v3765_v26  ;;  %v195_v26 = vpack.c.bf16 %v127_v30, %v127_v30  ;;  %v130_v30 = vld [vmem:[#allocation2 + $0x2b0] sm:$0xff] }
 0x12b   :  { %v989_v29 = vpop.f32.mrf.mxu0 }
 0x12c   :  { %v1078_v32 = vpop.f32.mrf.mxu1  ;;  %v447_v0 = vunpack.c.l.b16 %v195_v26 }
 0x12d   :  { %v3850_v60 = vadd.f32 %v1078_v32, %v989_v29  ;;  %v3862_v32 = vpop.f32.mrf.mxu3 }
 0x12e   :  { %1186 = vmatmul.bf16.gmra.mxu2 %v3847_v54  ;;  %1324 = vmatmul.bf16.gmra.mxu0 %v3652_v7  ;;  %v3866_v42 = vpack.c.b16 %v447_v0, %v444_v56  ;;  %v197_v0 = vpack.c.bf16 %v130_v30, %v130_v30 }
 0x12f   :  { %1413 = vmatmul.bf16.gmra.mxu1 %v3693_v18 }
 0x130   :  { %4990 = vst [vmem:[#allocation57_spill] sm:$0xff] %v3866_v42  ;;  %v450_v10 = vunpack.c.l.b16 %v197_v0  ;;  %1275 = vmatmul.bf16.gmra.mxu3 %v3581_v3 }
 0x131   :  { %v1147_v17 = vpop.f32.mrf.mxu2 }
 0x132   :  { %v3858_v22 = vadd.f32 %v1147_v17, %v3770_v48  ;;  %v133_v17 = vld [vmem:[#allocation2 + $0x2c8] sm:$0xff] }
 0x133   :  { %v991_v34 = vpop.f32.mrf.mxu0  ;;  %v199_v26 = vpack.c.bf16 %v133_v17, %v133_v17  ;;  %v136_v17 = vld [vmem:[#allocation2 + $0x2e0] sm:$0xff] }
 0x134   :  { %v1080_v1 = vpop.f32.mrf.mxu1 }
 0x135   :  { %v3860_v29 = vadd.f32 %v1080_v1, %v991_v34  ;;  %v3871_v57 = vpop.f32.mrf.mxu3 }
 0x137   :  { %4989 = vst [vmem:[#allocation56_spill] sm:$0xff] %v3860_v29  ;;  %v453_v29 = vunpack.c.l.b16 %v199_v26 }
 0x139   :  { %v3864_v5 = vpop.f32.mrf.mxu2 }
 0x13b   :  { %v994_v18 = vpop.f32.mrf.mxu0 }
 0x13c   :  { %v1083_v7 = vpop.f32.mrf.mxu1 }
 0x13d   :  { %v3869_v48 = vadd.f32 %v1083_v7, %v994_v18  ;;  %v3881_v18 = vpop.f32.mrf.mxu3 }
 0x13e   :  { %1191 = vmatmul.bf16.gmra.mxu2 %v3866_v42  ;;  %1329 = vmatmul.bf16.gmra.mxu0 %v3666_v52  ;;  %v3885_v52 = vpack.c.b16 %v453_v29, %v450_v10  ;;  %v201_v29 = vpack.c.bf16 %v136_v17, %v136_v17 }
 0x13f   :  { %1418 = vmatmul.bf16.gmra.mxu1 %v3711_v47 }
 0x140   :  { %4994 = vst [vmem:[#allocation61_spill] sm:$0xff] %v3885_v52  ;;  %1280 = vmatmul.bf16.gmra.mxu3 %v3596_v36  ;;  %v3260_v36 = vld [vmem:[#allocation5 + $0xa0] sm:$0xf0] }
 0x141   :  { %v1152_v46 = vpop.f32.mrf.mxu2 }
 0x142   :  { %v3877_v56 = vadd.f32 %v1152_v46, %v3790_v24  ;;  %v139_v46 = vld [vmem:[#allocation2 + $0x2f8] sm:$0xff] }
 0x143   :  { %v996_v34 = vpop.f32.mrf.mxu0  ;;  %v203_v26 = vpack.c.bf16 %v139_v46, %v139_v46 }
 0x144   :  { %4991 = vst [vmem:[#allocation58_spill] sm:$0xff] %v3877_v56  ;;  %v1085_v1 = vpop.f32.mrf.mxu1 }
 0x145   :  { %v3879_v7 = vadd.f32 %v1085_v1, %v996_v34  ;;  %v3890_v30 = vpop.f32.mrf.mxu3 }
 0x147   :  { %4992 = vst [vmem:[#allocation59_spill] sm:$0xff] %v3879_v7 }
 0x149   :  { %v3883_v9 = vpop.f32.mrf.mxu2 }
 0x14a   :  { %4993 = vst [vmem:[#allocation60_spill] sm:$0xff] %v3883_v9  ;;  %v459_v9 = vunpack.c.l.b16 %v203_v26 }
 0x14b   :  { %v999_v47 = vpop.f32.mrf.mxu0 }
 0x14c   :  { %v1088_v42 = vpop.f32.mrf.mxu1 }
 0x14d   :  { %v3888_v24 = vadd.f32 %v1088_v42, %v999_v47  ;;  %v3046_v47 = vld [vmem:[#allocation5 + $0xb0] sm:$0xf]  ;;  %v3263_v42 = vld [vmem:[#allocation5 + $0xb8] sm:$0xf0] }
 0x14e   :  { %1196 = vmatmul.bf16.gmra.mxu2 %v3885_v52  ;;  %1334 = vmatmul.bf16.gmra.mxu0 %v3676_v27  ;;  %v3047_v7 = vor.u32 %v3263_v42, %v3046_v47  ;;  %v3900_v52 = vpop.f32.mrf.mxu3  ;;  %v456_v27 = vunpack.c.l.b16 %v201_v29  ;;  %v3287_v47 = vld [vmem:[#allocation5 + $0x178] sm:$0xf0] }
 0x14f   :  { %1423 = vmatmul.bf16.gmra.mxu1 %v3729_v61 }
 0x150   :  { %1474 = vmatpush.bf16.msra.mxu2 %v3047_v7  ;;  %v3904_v56 = vpack.c.b16 %v459_v9, %v456_v27  ;;  %1285 = vmatmul.bf16.gmra.mxu3 %v3616_v50 }
 0x151   :  { %v1157_v0 = vpop.f32.mrf.mxu2 }
 0x152   :  { %v3896_v10 = vadd.f32 %v1157_v0, %v3810_v59  ;;  %4996 = vst [vmem:[#allocation63_spill] sm:$0xff] %v3904_v56 }
 0x153   :  { %v1001_v34 = vpop.f32.mrf.mxu0 }
 0x154   :  { %v1090_v1 = vpop.f32.mrf.mxu1 }
 0x155   :  { %v3898_v3 = vadd.f32 %v1090_v1, %v1001_v34  ;;  %v3142_v1 = vld [vmem:[#allocation5 + $0x170] sm:$0xf] }
 0x156   :  { %v3909_v0 = vpop.f32.mrf.mxu3  ;;  %v3143_v42 = vor.u32 %v3287_v47, %v3142_v1  ;;  %v3022_v1 = vld [vmem:[#allocation5 + $0x80] sm:$0xf]  ;;  %v3257_v47 = vld [vmem:[#allocation5 + $0x88] sm:$0xf0] }
 0x157   :  { %4995 = vst [vmem:[#allocation62_spill] sm:$0xff] %v3898_v3  ;;  %v3023_v50 = vor.u32 %v3257_v47, %v3022_v1 }
 0x158   :  { %1563 = vmatpush.bf16.msra.mxu3 %v3143_v42  ;;  %v3118_v42 = vld [vmem:[#allocation5 + $0x140] sm:$0xf] }
 0x159   :  { %v3902_v61 = vpop.f32.mrf.mxu2 }
 0x15b   :  { %v1004_v59 = vpop.f32.mrf.mxu0 }
 0x15c   :  { %v1093_v17 = vpop.f32.mrf.mxu1 }
 0x15d   :  { %v3907_v46 = vadd.f32 %v1093_v17, %v1004_v59  ;;  %v3034_v17 = vld [vmem:[#allocation5 + $0x98] sm:$0xf] }
 0x15e   :  { %1201 = vmatmul.bf16.gmra.mxu2 %v3904_v56  ;;  %1339 = vmatmul.bf16.gmra.mxu0 %v3686_v55  ;;  %v3919_v34 = vpop.f32.mrf.mxu3 }
 0x15f   :  { %1428 = vmatmul.bf16.gmra.mxu1 %v3749_v14  ;;  %v3130_v14 = vld [vmem:[#allocation5 + $0x158] sm:$0xf] }
 0x160   :  { %1290 = vmatmul.bf16.gmra.mxu3 %v3636_v40 }
 0x161   :  { %v1162_v29 = vpop.f32.mrf.mxu2 }
 0x162   :  { %v3915_v7 = vadd.f32 %v1162_v29, %v3830_v25  ;;  %v3035_v25 = vor.u32 %v3260_v36, %v3034_v17  ;;  %v3284_v29 = vld [vmem:[#allocation5 + $0x160] sm:$0xf0] }
 0x163   :  { %v1006_v27 = vpop.f32.mrf.mxu0 }
 0x164   :  { %4997 = vst [vmem:[#allocation64_spill] sm:$0xff] %v3915_v7  ;;  %v1095_v9 = vpop.f32.mrf.mxu1  ;;  %1475 = vmatpush.bf16.msra.mxu2 %v3035_v25 }
 0x165   :  { %v3917_v26 = vadd.f32 %v1095_v9, %v1006_v27  ;;  %v3131_v9 = vor.u32 %v3284_v29, %v3130_v14 }
 0x167   :  { %4998 = vst [vmem:[#allocation65_spill] sm:$0xff] %v3917_v26  ;;  %v3925_v26 = vpop.f32.mrf.mxu3  ;;  %1564 = vmatpush.bf16.msra.mxu3 %v3131_v9  ;;  %v3278_v9 = vld [vmem:[#allocation5 + $0x130] sm:$0xf0] }
 0x168   :  { %1476 = vmatpush.bf16.msra.mxu2 %v3023_v50  ;;  %v3251_v50 = vld [vmem:[#allocation5 + $0x58] sm:$0xf0] }
 0x169   :  { %v3921_v59 = vpop.f32.mrf.mxu2 }
 0x16a   :  { %4999 = vst [vmem:[#allocation66_spill] sm:$0xff] %v3921_v59  ;;  %v3281_v59 = vld [vmem:[#allocation5 + $0x148] sm:$0xf0] }
 0x16b   :  { %v1305_v3 = vpop.f32.mrf.mxu0  ;;  %v3119_v17 = vor.u32 %v3281_v59, %v3118_v42 }
 0x16c   :  { %v1306_v55 = vadd.f32 %v1305_v3, %v3812_v19  ;;  %v1394_v27 = vpop.f32.mrf.mxu1  ;;  %v3010_v19 = vld [vmem:[#allocation5 + $0x68] sm:$0xf] }
 0x16d   :  { %1565 = vmatpush.bf16.msra.mxu3 %v3119_v17 }
 0x16e   :  { %v1395_v7 = vadd.f32 %v1394_v27, %v1306_v55  ;;  %1344 = vmatmul.bf16.gmra.mxu0 %v3696_v20  ;;  %v3254_v55 = vld [vmem:[#allocation5 + $0x70] sm:$0xf0]  ;;  %v3106_v27 = vld [vmem:[#allocation5 + $0x128] sm:$0xf] }
 0x16f   :  { %1433 = vmatmul.bf16.gmra.mxu1 %v3767_v15  ;;  %v3011_v29 = vor.u32 %v3254_v55, %v3010_v19  ;;  %v3107_v1 = vor.u32 %v3278_v9, %v3106_v27  ;;  %v3934_v47 = vpop.f32.mrf.mxu3  ;;  %v3248_v9 = vld [vmem:[#allocation5 + $0x40] sm:$0xf0] }
 0x170   :  { %v1741_v36 = vpack.c.bf16 %v1395_v7, %v3776_v33  ;;  %v2998_v7 = vld [vmem:[#allocation5 + $0x50] sm:$0xf] }
 0x171   :  { %v1167_v3 = vpop.f32.mrf.mxu2  ;;  %1477 = vmatpush.bf16.msra.mxu2 %v3011_v29  ;;  %1566 = vmatpush.bf16.msra.mxu3 %v3107_v1  ;;  %v2999_v42 = vor.u32 %v3251_v50, %v2998_v7  ;;  %v2986_v29 = vld [vmem:[#allocation5 + $0x38] sm:$0xf]  ;;  %v3272_v50 = vld [vmem:[#allocation5 + $0x100] sm:$0xf0] }
 0x172   :  { %v3931_v14 = vadd.f32 %v1167_v3, %v3850_v60  ;;  %v3094_v60 = vld [vmem:[#allocation5 + $0x110] sm:$0xf]  ;;  %v1821_v59 = vrot.slane %v1741_v36, 4  ;;  %v3275_v3 = vld [vmem:[#allocation5 + $0x118] sm:$0xf0]  ;;  %v2987_v1 = vor.u32 %v3248_v9, %v2986_v29 }
 0x173   :  { %v1307_v25 = vpop.f32.mrf.mxu0  ;;  %v3095_v19 = vor.u32 %v3275_v3, %v3094_v60  ;;  %v3082_v7 = vld [vmem:[#allocation5 + $0xf8] sm:$0xf]  ;;  %v3070_v29 = vld [vmem:[#allocation5 + $0xe0] sm:$0xf] }
 0x174   :  { %5000 = vst [vmem:[#allocation67_spill] sm:$0xff] %v3931_v14  ;;  %v1308_v20 = vadd.f32 %v1307_v25, %v3822_v28  ;;  %v1396_v15 = vpop.f32.mrf.mxu1  ;;  %v1837_v28 = vunpack.c.l.b16 %v1741_v36  ;;  %v3083_v60 = vor.u32 %v3272_v50, %v3082_v7  ;;  %v3242_v7 = vld [vmem:[#allocation5 + $0x10] sm:$0xf0] }
 0x175   :  { %1478 = vmatpush.bf16.msra.mxu2 %v2999_v42  ;;  %1567 = vmatpush.bf16.msra.mxu3 %v3095_v19  ;;  %v3266_v19 = vld [vmem:[#allocation5 + $0xd0] sm:$0xf0] }
 0x176   :  { %v1397_v33 = vadd.f32 %v1396_v15, %v1308_v20  ;;  %v3940_v20 = vunpack.c.l.b16 %v1821_v59  ;;  %v2974_v59 = vld [vmem:[#allocation5 + $0x20] sm:$0xf] }
 0x177   :  { %v3947_v42 = vpop.f32.mrf.mxu3 }
 0x178   :  { %v1743_v17 = vpack.c.bf16 %v1397_v33, %v3785_v39 }
 0x179   :  { %v3937_v55 = vpop.f32.mrf.mxu2  ;;  %1479 = vmatpush.bf16.msra.mxu2 %v2987_v1  ;;  %1568 = vmatpush.bf16.msra.mxu3 %v3083_v60  ;;  %v2962_v1 = vld [vmem:[#allocation5 + $0x8] sm:$0xf] }
 0x17a   :  { %v1822_v25 = vrot.slane %v1743_v17, 4  ;;  %v1838_v27 = vunpack.c.l.b16 %v1743_v17  ;;  %v3245_v17 = vld [vmem:[#allocation5 + $0x28] sm:$0xf0] }
 0x17b   :  { %v1310_v15 = vpop.f32.mrf.mxu0 }
 0x17c   :  { %v3942_v14 = vpack.c.b16 %v1838_v27, %v1837_v28  ;;  %v1311_v39 = vadd.f32 %v1310_v15, %v3832_v31  ;;  %v1399_v33 = vpop.f32.mrf.mxu1  ;;  %v3945_v36 = vunpack.c.l.b16 %v1822_v25  ;;  %v2975_v28 = vor.u32 %v3245_v17, %v2974_v59  ;;  %v3269_v31 = vld [vmem:[#allocation5 + $0xe8] sm:$0xf0] }
 0x17d   :  { %v3071_v27 = vor.u32 %v3269_v31, %v3070_v29 }
 0x17e   :  { %v1400_v3 = vadd.f32 %v1399_v33, %v1311_v39  ;;  %1349 = vmatmul.bf16.gmra.mxu0 %v3714_v63  ;;  %1480 = vmatpush.bf16.msra.mxu2 %v2975_v28  ;;  %v2963_v39 = vor.u32 %v3242_v7, %v2962_v1  ;;  %v3058_v33 = vld [vmem:[#allocation5 + $0xc8] sm:$0xf] }
 0x17f   :  { %1438 = vmatmul.bf16.gmra.mxu1 %v3787_v62  ;;  %1569 = vmatpush.bf16.msra.mxu3 %v3071_v27  ;;  %v3059_v60 = vor.u32 %v3266_v19, %v3058_v33  ;;  %v3958_v17 = vpop.f32.mrf.mxu3 }
 0x180   :  { %v1745_v25 = vpack.c.bf16 %v1400_v3, %v3796_v6 }
 0x181   :  { %v1172_v9 = vpop.f32.mrf.mxu2 }
 0x182   :  { %v3955_v15 = vadd.f32 %v1172_v9, %v3869_v48  ;;  %1481 = vmatpush.bf16.msra.mxu2 %v2963_v39  ;;  %v1823_v3 = vrot.slane %v1745_v25, 4  ;;  %v1839_v28 = vunpack.c.l.b16 %v1745_v25 }
 0x183   :  { %v1312_v50 = vpop.f32.mrf.mxu0  ;;  %1570 = vmatpush.bf16.msra.mxu3 %v3059_v60 }
 0x184   :  { %v1313_v62 = vadd.f32 %v1312_v50, %v3842_v58  ;;  %v1401_v59 = vpop.f32.mrf.mxu1  ;;  %v3965_v9 = vunpack.c.l.b16 %v1823_v3 }
 0x185   :  { %1482 = vmatmul.bf16.vlgmr.msra.gmra.mxu2 %v3579_v2 }
 0x186   :  { %v1402_v6 = vadd.f32 %v1401_v59, %v1313_v62  ;;  %1571 = vmatmul.bf16.vlgmr.msra.gmra.mxu3 %v3583_v4 }
 0x188   :  { %v1747_v48 = vpack.c.bf16 %v1402_v6, %v3805_v49  ;;  %v3972_v49 = vpop.f32.mrf.mxu3 }
 0x189   :  { %v3962_v29 = vpop.f32.mrf.mxu2 }
 0x18a   :  { %v1824_v31 = vrot.slane %v1747_v48, 4  ;;  %v1840_v27 = vunpack.c.l.b16 %v1747_v48 }
 0x18b   :  { %v1315_v58 = vpop.f32.mrf.mxu0 }
 0x18c   :  { %v1316_v19 = vadd.f32 %v1315_v58, %v3852_v21  ;;  %v1404_v1 = vpop.f32.mrf.mxu1  ;;  %v3968_v62 = vunpack.c.l.b16 %v1824_v31  ;;  %v3970_v7 = vpack.c.b16 %v1840_v27, %v1839_v28 }
 0x18e   :  { %v1405_v2 = vadd.f32 %v1404_v1, %v1316_v19  ;;  %1354 = vmatmul.bf16.gmra.mxu0 %v3732_v45 }
 0x18f   :  { %1443 = vmatmul.bf16.gmra.mxu1 %v3807_v53 }
 0x190   :  { %v1749_v4 = vpack.c.bf16 %v1405_v2, %v3818_v44  ;;  %v3983_v60 = vpop.f32.mrf.mxu3 }
 0x191   :  { %v1177_v50 = vpop.f32.mrf.mxu2 }
 0x192   :  { %v3980_v21 = vadd.f32 %v1177_v50, %v3888_v24  ;;  %v1825_v3 = vrot.slane %v1749_v4, 4  ;;  %v1841_v31 = vunpack.c.l.b16 %v1749_v4 }
 0x193   :  { %v1317_v39 = vpop.f32.mrf.mxu0 }
 0x194   :  { %v1318_v33 = vadd.f32 %v1317_v39, %v3862_v32  ;;  %v1406_v59 = vpop.f32.mrf.mxu1  ;;  %v3990_v58 = vunpack.c.l.b16 %v1825_v3 }
 0x195   :  { %1487 = vmatmul.bf16.gmra.mxu2 %v3594_v35 }
 0x196   :  { %v1407_v6 = vadd.f32 %v1406_v59, %v1318_v33  ;;  %1576 = vmatmul.bf16.gmra.mxu3 %v3598_v37 }
 0x198   :  { %v1751_v48 = vpack.c.bf16 %v1407_v6, %v3825_v13  ;;  %v3997_v13 = vpop.f32.mrf.mxu3 }
 0x199   :  { %v3987_v28 = vpop.f32.mrf.mxu2 }
 0x19a   :  { %v1826_v44 = vrot.slane %v1751_v48, 4  ;;  %v1842_v27 = vunpack.c.l.b16 %v1751_v48 }
 0x19b   :  { %v1320_v24 = vpop.f32.mrf.mxu0 }
 0x19c   :  { %v1321_v32 = vadd.f32 %v1320_v24, %v3871_v57  ;;  %v1409_v19 = vpop.f32.mrf.mxu1  ;;  %v3993_v1 = vunpack.c.l.b16 %v1826_v44  ;;  %v3995_v2 = vpack.c.b16 %v1842_v27, %v1841_v31 }
 0x19e   :  { %5001 = vst [vmem:[#allocation68_spill] sm:$0xff] %v3995_v2  ;;  %v1410_v35 = vadd.f32 %v1409_v19, %v1321_v32  ;;  %1359 = vmatmul.bf16.gmra.mxu0 %v3752_v43 }
 0x19f   :  { %1448 = vmatmul.bf16.gmra.mxu1 %v3827_v23 }
 0x1a0   :  { %v1753_v37 = vpack.c.bf16 %v1410_v35, %v3838_v11  ;;  %v4008_v6 = vpop.f32.mrf.mxu3 }
 0x1a1   :  { %v1182_v50 = vpop.f32.mrf.mxu2 }
 0x1a2   :  { %v4005_v57 = vadd.f32 %v1182_v50, %v3907_v46  ;;  %v1827_v48 = vrot.slane %v1753_v37, 4  ;;  %v1843_v27 = vunpack.c.l.b16 %v1753_v37 }
 0x1a3   :  { %v1322_v39 = vpop.f32.mrf.mxu0 }
 0x1a4   :  { %v1323_v33 = vadd.f32 %v1322_v39, %v3881_v18  ;;  %v1411_v59 = vpop.f32.mrf.mxu1  ;;  %v4015_v32 = vunpack.c.l.b16 %v1827_v48  ;;  %v3311_v39 = vld [vmem:[#allocation5 + $0x238] sm:$0xf0]  ;;  %v3308_v48 = vld [vmem:[#allocation5 + $0x220] sm:$0xf0] }
 0x1a5   :  { %1492 = vmatmul.bf16.gmra.mxu2 %v3614_v12 }
 0x1a6   :  { %v1412_v3 = vadd.f32 %v1411_v59, %v1323_v33  ;;  %1581 = vmatmul.bf16.gmra.mxu3 %v3618_v51 }
 0x1a8   :  { %v1755_v31 = vpack.c.bf16 %v1412_v3, %v3845_v38  ;;  %v3238_v38 = vld [vmem:[#allocation5 + $0x230] sm:$0xf]  ;;  %v4022_v12 = vpop.f32.mrf.mxu3  ;;  %v3226_v3 = vld [vmem:[#allocation5 + $0x218] sm:$0xf] }
 0x1a9   :  { %v4012_v44 = vpop.f32.mrf.mxu2  ;;  %v3239_v37 = vor.u32 %v3311_v39, %v3238_v38  ;;  %v3305_v38 = vld [vmem:[#allocation5 + $0x208] sm:$0xf0] }
 0x1aa   :  { %v1828_v11 = vrot.slane %v1755_v31, 4  ;;  %v1844_v24 = vunpack.c.l.b16 %v1755_v31  ;;  %v5003_v31 = vld [vmem:[#allocation38_spill] sm:$0xff] }
 0x1ab   :  { %v1325_v46 = vpop.f32.mrf.mxu0  ;;  %1652 = vmatpush.bf16.msra.mxu0 %v3239_v37 }
 0x1ac   :  { %v1326_v18 = vadd.f32 %v1325_v46, %v3890_v30  ;;  %v1414_v19 = vpop.f32.mrf.mxu1  ;;  %v4018_v35 = vunpack.c.l.b16 %v1828_v11  ;;  %v4020_v50 = vpack.c.b16 %v1844_v24, %v1843_v27  ;;  %v3227_v11 = vor.u32 %v3308_v48, %v3226_v3  ;;  %v3202_v48 = vld [vmem:[#allocation5 + $0x1e8] sm:$0xf] }
 0x1ae   :  { %5002 = vst [vmem:[#allocation69_spill] sm:$0xff] %v4020_v50  ;;  %v1415_v33 = vadd.f32 %v1414_v19, %v1326_v18  ;;  %1364 = vmatmul.bf16.gmra.mxu0 %v3611_v8  ;;  %v3214_v19 = vld [vmem:[#allocation5 + $0x200] sm:$0xf]  ;;  %v5013_v50 = vld [vmem:[#allocation20_spill] sm:$0xff] }
 0x1af   :  { %1453 = vmatmul.bf16.gmra.mxu1 %v3847_v54  ;;  %1653 = vmatpush.bf16.msra.mxu0 %v3227_v11  ;;  %v3215_v37 = vor.u32 %v3305_v38, %v3214_v19  ;;  %v3190_v19 = vld [vmem:[#allocation5 + $0x1d0] sm:$0xf]  ;;  %v3299_v38 = vld [vmem:[#allocation5 + $0x1d8] sm:$0xf0] }
 0x1b0   :  { %v1757_v30 = vpack.c.bf16 %v1415_v33, %v3858_v22  ;;  %v4033_v39 = vpop.f32.mrf.mxu3  ;;  %v1150_v22 = vadd.f32 %v3864_v5, %v3782_v16 }
 0x1b1   :  { %v1187_v59 = vpop.f32.mrf.mxu2 }
 0x1b2   :  { %v4030_v27 = vadd.f32 %v1187_v59, %v5003_v31  ;;  %v1829_v25 = vrot.slane %v1757_v30, 4  ;;  %v5004_v59 = vld [vmem:[#allocation15_spill] sm:$0xff]  ;;  %v1845_v31 = vunpack.c.l.b16 %v1757_v30  ;;  %v5006_v30 = vld [vmem:[#allocation14_spill] sm:$0xff] }
 0x1b3   :  { %v1327_v24 = vpop.f32.mrf.mxu0  ;;  %1654 = vmatpush.bf16.msra.mxu0 %v3215_v37  ;;  %v5008_v37 = vld [vmem:[#allocation42_spill] sm:$0xff] }
 0x1b4   :  { %v1328_v46 = vadd.f32 %v1327_v24, %v3900_v52  ;;  %v1416_v18 = vpop.f32.mrf.mxu1  ;;  %v3302_v52 = vld [vmem:[#allocation5 + $0x1f0] sm:$0xf0]  ;;  %v4041_v23 = vunpack.c.l.b16 %v1829_v25 }
 0x1b5   :  { %1497 = vmatmul.bf16.gmra.mxu2 %v5004_v59  ;;  %v3203_v51 = vor.u32 %v3302_v52, %v3202_v48  ;;  %v5007_v25 = vld [vmem:[#allocation57_spill] sm:$0xff] }
 0x1b6   :  { %v1417_v33 = vadd.f32 %v1416_v18, %v1328_v46  ;;  %1586 = vmatmul.bf16.gmra.mxu3 %v3638_v41  ;;  %v3293_v41 = vld [vmem:[#allocation5 + $0x1a8] sm:$0xf0] }
 0x1b7   :  { %1655 = vmatpush.bf16.msra.mxu0 %v3203_v51  ;;  %v3296_v51 = vld [vmem:[#allocation5 + $0x1c0] sm:$0xf0] }
 0x1b8   :  { %v1759_v4 = vpack.c.bf16 %v1417_v33, %v1150_v22  ;;  %v4048_v22 = vpop.f32.mrf.mxu3 }
 0x1b9   :  { %v4038_v3 = vpop.f32.mrf.mxu2 }
 0x1ba   :  { %v1830_v11 = vrot.slane %v1759_v4, 4  ;;  %v1846_v24 = vunpack.c.l.b16 %v1759_v4  ;;  %v3191_v4 = vor.u32 %v3299_v38, %v3190_v19  ;;  %v3166_v38 = vld [vmem:[#allocation5 + $0x1a0] sm:$0xf] }
 0x1bb   :  { %v1330_v54 = vpop.f32.mrf.mxu0  ;;  %v3167_v40 = vor.u32 %v3293_v41, %v3166_v38  ;;  %v5015_v38 = vld [vmem:[#allocation17_spill] sm:$0xff] }
 0x1bc   :  { %v1331_v16 = vadd.f32 %v1330_v54, %v3909_v0  ;;  %v1419_v5 = vpop.f32.mrf.mxu1  ;;  %v4044_v46 = vunpack.c.l.b16 %v1830_v11  ;;  %v4046_v18 = vpack.c.b16 %v1846_v24, %v1845_v31  ;;  %1656 = vmatpush.bf16.msra.mxu0 %v3191_v4  ;;  %v3178_v0 = vld [vmem:[#allocation5 + $0x1b8] sm:$0xf] }
 0x1bd   :  { %v3179_v48 = vor.u32 %v3296_v51, %v3178_v0  ;;  %v5009_v31 = vld [vmem:[#allocation58_spill] sm:$0xff] }
 0x1be   :  { %5005 = vst [vmem:[#allocation38_spill] sm:$0xff] %v4046_v18  ;;  %1369 = vmatmul.bf16.gmra.mxu0 %v5006_v30  ;;  %v1420_v33 = vadd.f32 %v1419_v5, %v1331_v16  ;;  %v5010_v16 = vld [vmem:[#allocation50_spill] sm:$0xff]  ;;  %v5011_v5 = vld [vmem:[#allocation60_spill] sm:$0xff] }
 0x1bf   :  { %1458 = vmatmul.bf16.gmra.mxu1 %v5007_v25  ;;  %v1155_v4 = vadd.f32 %v5011_v5, %v5010_v16  ;;  %v5012_v0 = vld [vmem:[#allocation18_spill] sm:$0xff]  ;;  %v5016_v16 = vld [vmem:[#allocation61_spill] sm:$0xff] }
 0x1c0   :  { %v1761_v11 = vpack.c.bf16 %v1420_v33, %v5009_v31  ;;  %1657 = vmatpush.bf16.msra.mxu0 %v3179_v48  ;;  %v4059_v53 = vpop.f32.mrf.mxu3  ;;  %v3154_v33 = vld [vmem:[#allocation5 + $0x188] sm:$0xf]  ;;  %v5017_v5 = vld [vmem:[#allocation45_spill] sm:$0xff] }
 0x1c1   :  { %v1192_v54 = vpop.f32.mrf.mxu2 }
 0x1c2   :  { %v4055_v59 = vadd.f32 %v1192_v54, %v5008_v37  ;;  %v1831_v18 = vrot.slane %v1761_v11, 4  ;;  %v1847_v37 = vunpack.c.l.b16 %v1761_v11  ;;  %v5019_v11 = vld [vmem:[#allocation22_spill] sm:$0xff] }
 0x1c3   :  { %v1332_v52 = vpop.f32.mrf.mxu0 }
 0x1c4   :  { %v1333_v24 = vadd.f32 %v1332_v52, %v3919_v34  ;;  %v1421_v19 = vpop.f32.mrf.mxu1  ;;  %1658 = vmatpush.bf16.msra.mxu0 %v3167_v40  ;;  %v3290_v34 = vld [vmem:[#allocation5 + $0x190] sm:$0xf0]  ;;  %v4067_v2 = vunpack.c.l.b16 %v1831_v18 }
 0x1c5   :  { %1502 = vmatmul.bf16.gmra.mxu2 %v5012_v0  ;;  %v3155_v31 = vor.u32 %v3290_v34, %v3154_v33  ;;  %v5018_v34 = vld [vmem:[#allocation52_spill] sm:$0xff] }
 0x1c6   :  { %v1422_v25 = vadd.f32 %v1421_v19, %v1333_v24  ;;  %1591 = vmatmul.bf16.gmra.mxu3 %v5013_v50 }
 0x1c8   :  { %v1763_v54 = vpack.c.bf16 %v1422_v25, %v1155_v4  ;;  %1659 = vmatpush.bf16.msra.mxu0 %v3155_v31  ;;  %v4074_v19 = vpop.f32.mrf.mxu3 }
 0x1c9   :  { %v4064_v51 = vpop.f32.mrf.mxu2 }
 0x1ca   :  { %v1832_v48 = vrot.slane %v1763_v54, 4  ;;  %v1848_v52 = vunpack.c.l.b16 %v1763_v54 }
 0x1cb   :  { %v1335_v30 = vpop.f32.mrf.mxu0 }
 0x1cc   :  { %v1336_v41 = vadd.f32 %v1335_v30, %v3925_v26  ;;  %v1424_v24 = vpop.f32.mrf.mxu1  ;;  %v4070_v40 = vunpack.c.l.b16 %v1832_v48  ;;  %v4072_v25 = vpack.c.b16 %v1848_v52, %v1847_v37  ;;  %v1160_v37 = vadd.f32 %v3902_v61, %v5018_v34  ;;  %v5024_v34 = vld [vmem:[#allocation48_spill] sm:$0xff] }
 0x1ce   :  { %5014 = vst [vmem:[#allocation15_spill] sm:$0xff] %v4072_v25  ;;  %1374 = vmatmul.bf16.gmra.mxu0 %v5015_v38  ;;  %v1425_v50 = vadd.f32 %v1424_v24, %v1336_v41 }
 0x1cf   :  { %1463 = vmatmul.bf16.gmra.mxu1 %v5016_v16  ;;  %v5021_v16 = vld [vmem:[#allocation24_spill] sm:$0xff] }
 0x1d0   :  { %v1765_v30 = vpack.c.bf16 %v1425_v50, %v3896_v10  ;;  %v4085_v33 = vpop.f32.mrf.mxu3 }
 0x1d1   :  { %v1197_v18 = vpop.f32.mrf.mxu2 }
 0x1d2   :  { %v4081_v4 = vadd.f32 %v1197_v18, %v5017_v5  ;;  %v1833_v52 = vrot.slane %v1765_v30, 4  ;;  %v1849_v24 = vunpack.c.l.b16 %v1765_v30 }
 0x1d3   :  { %v1337_v26 = vpop.f32.mrf.mxu0 }
 0x1d4   :  { %v1338_v54 = vadd.f32 %v1337_v26, %v3934_v47  ;;  %v1426_v0 = vpop.f32.mrf.mxu1  ;;  %v1881_v47 = vunpack.c.l.b16 %v1833_v52 }
 0x1d5   :  { %1507 = vmatmul.bf16.gmra.mxu2 %v5019_v11 }
 0x1d6   :  { %v1427_v48 = vadd.f32 %v1426_v0, %v1338_v54  ;;  %1596 = vmatmul.bf16.gmra.mxu3 %v5021_v16  ;;  %v5023_v54 = vld [vmem:[#allocation21_spill] sm:$0xff] }
 0x1d8   :  { %v1767_v31 = vpack.c.bf16 %v1427_v48, %v1160_v37  ;;  %v4096_v61 = vpop.f32.mrf.mxu3  ;;  %v5026_v48 = vld [vmem:[#allocation64_spill] sm:$0xff] }
 0x1d9   :  { %v4090_v41 = vpop.f32.mrf.mxu2 }
 0x1da   :  { %5020 = vst [vmem:[#allocation42_spill] sm:$0xff] %v4090_v41  ;;  %v1834_v18 = vrot.slane %v1767_v31, 4  ;;  %v1850_v5 = vunpack.c.l.b16 %v1767_v31 }
 0x1db   :  { %v1340_v10 = vpop.f32.mrf.mxu0 }
 0x1dc   :  { %v1341_v50 = vadd.f32 %v1340_v10, %v3947_v42  ;;  %v1429_v26 = vpop.f32.mrf.mxu1  ;;  %v1882_v25 = vunpack.c.l.b16 %v1834_v18  ;;  %v4094_v38 = vpack.c.b16 %v1850_v5, %v1849_v24  ;;  %v5027_v18 = vld [vmem:[#allocation54_spill] sm:$0xff] }
 0x1dd   :  { %v5028_v5 = vld [vmem:[#allocation66_spill] sm:$0xff] }
 0x1de   :  { %5022 = vst [vmem:[#allocation58_spill] sm:$0xff] %v4094_v38  ;;  %1379 = vmatmul.bf16.gmra.mxu0 %v5023_v54  ;;  %v1891_v11 = vpack.c.b16 %v1882_v25, %v1881_v47  ;;  %v1430_v30 = vadd.f32 %v1429_v26, %v1341_v50  ;;  %v1165_v10 = vadd.f32 %v5028_v5, %v5027_v18 }
 0x1df   :  { %1468 = vmatmul.bf16.gmra.mxu1 %v3904_v56  ;;  %v5029_v56 = vld [vmem:[#allocation25_spill] sm:$0xff] }
 0x1e0   :  { %v1769_v52 = vpack.c.bf16 %v1430_v30, %v5026_v48  ;;  %v4105_v24 = vpop.f32.mrf.mxu3 }
 0x1e1   :  { %v1202_v0 = vpop.f32.mrf.mxu2 }
 0x1e2   :  { %v4101_v37 = vadd.f32 %v1202_v0, %v5024_v34  ;;  %v1835_v25 = vrot.slane %v1769_v52, 4  ;;  %v1851_v50 = vunpack.c.l.b16 %v1769_v52  ;;  %v5030_v34 = vld [vmem:[#allocation27_spill] sm:$0xff] }
 0x1e3   :  { %v1342_v16 = vpop.f32.mrf.mxu0 }
 0x1e4   :  { %5025 = vst [vmem:[#allocation50_spill] sm:$0xff] %v4101_v37  ;;  %v1343_v42 = vadd.f32 %v1342_v16, %v3958_v17  ;;  %v1431_v31 = vpop.f32.mrf.mxu1  ;;  %v1883_v30 = vunpack.c.l.b16 %v1835_v25 }
 0x1e5   :  { %1512 = vmatmul.bf16.gmra.mxu2 %v5029_v56  ;;  %v5032_v56 = vld [vmem:[#allocation67_spill] sm:$0xff] }
 0x1e6   :  { %v1432_v38 = vadd.f32 %v1431_v31, %v1343_v42  ;;  %1601 = vmatmul.bf16.gmra.mxu3 %v5030_v34  ;;  %v5031_v31 = vld [vmem:[#allocation19_spill] sm:$0xff] }
 0x1e8   :  { %v1771_v47 = vpack.c.bf16 %v1432_v38, %v1165_v10  ;;  %v4114_v41 = vpop.f32.mrf.mxu3 }
 0x1ea   :  { %v1836_v26 = vrot.slane %v1771_v47, 4  ;;  %v1852_v0 = vunpack.c.l.b16 %v1771_v47  ;;  %v5033_v47 = vld [vmem:[#allocation56_spill] sm:$0xff] }
 0x1eb   :  { %v1345_v54 = vpop.f32.mrf.mxu0 }
 0x1ec   :  { %v1884_v48 = vunpack.c.l.b16 %v1836_v26  ;;  %v1346_v17 = vadd.f32 %v1345_v54, %v3972_v49  ;;  %v1434_v16 = vpop.f32.mrf.mxu1  ;;  %v4112_v37 = vpack.c.b16 %v1852_v0, %v1851_v50  ;;  %v1170_v49 = vadd.f32 %v3937_v55, %v5033_v47  ;;  %v5034_v0 = vld [vmem:[#allocation28_spill] sm:$0xff]  ;;  %v4141_v47 = vpop.f32.mrf.mxu2 }
 0x1ee   :  { %v1435_v42 = vadd.f32 %v1434_v16, %v1346_v17  ;;  %1660 = vmatmul.bf16.vlgmr.msra.gmra.mxu0 %v5031_v31  ;;  %v1892_v38 = vpack.c.b16 %v1884_v48, %v1883_v30  ;;  %v5035_v17 = vld [vmem:[#allocation30_spill] sm:$0xff] }
 0x1f0   :  { %v1773_v52 = vpack.c.bf16 %v1435_v42, %v5032_v56  ;;  %1901 = vmatpush.bf16.xpose.msra.mxu1 %v1892_v38  ;;  %v4119_v25 = vpop.f32.mrf.mxu3 }
 0x1f2   :  { %v1966_v50 = vrot.slane %v1773_v52, 4  ;;  %v1982_v34 = vunpack.c.l.b16 %v1773_v52 }
 0x1f3   :  { %v1347_v18 = vpop.f32.mrf.mxu0 }
 0x1f4   :  { %v1348_v5 = vadd.f32 %v1347_v18, %v3983_v60  ;;  %v1436_v10 = vpop.f32.mrf.mxu1  ;;  %v4125_v42 = vunpack.c.l.b16 %v1966_v50  ;;  %v5036_v18 = vld [vmem:[#allocation23_spill] sm:$0xff] }
 0x1f5   :  { %1517 = vmatmul.bf16.gmra.mxu2 %v5034_v0 }
 0x1f6   :  { %v1437_v54 = vadd.f32 %v1436_v10, %v1348_v5  ;;  %1606 = vmatmul.bf16.gmra.mxu3 %v5035_v17  ;;  %v5037_v10 = vpack.c.b16 %v4070_v40, %v4067_v2  ;;  %v5040_v2 = vld [vmem:[#allocation31_spill] sm:$0xff] }
 0x1f8   :  { %v1775_v26 = vpack.c.bf16 %v1437_v54, %v1170_v49  ;;  %1902 = vmatpush.bf16.xpose.msra.mxu1 %v1891_v11  ;;  %v4132_v56 = vpop.f32.mrf.mxu3 }
 0x1fa   :  { %v1967_v30 = vrot.slane %v1775_v26, 4  ;;  %v1983_v48 = vunpack.c.l.b16 %v1775_v26  ;;  %v5038_v26 = vld [vmem:[#allocation59_spill] sm:$0xff] }
 0x1fb   :  { %v1350_v16 = vpop.f32.mrf.mxu0  ;;  %v1175_v0 = vadd.f32 %v3962_v29, %v5038_v26  ;;  %v5043_v26 = vpack.c.b16 %v4018_v35, %v4015_v32  ;;  %v5045_v32 = vpack.c.b16 %v3993_v1, %v3990_v58  ;;  %v5046_v35 = vld [vmem:[#allocation34_spill] sm:$0xff] }
 0x1fc   :  { %v4127_v60 = vpack.c.b16 %v1983_v48, %v1982_v34  ;;  %v1351_v31 = vadd.f32 %v1350_v16, %v3997_v13  ;;  %v1439_v38 = vpop.f32.mrf.mxu1  ;;  %v4130_v55 = vunpack.c.l.b16 %v1967_v30 }
 0x1fe   :  { %v1440_v11 = vadd.f32 %v1439_v38, %v1351_v31  ;;  %1665 = vmatmul.bf16.gmra.mxu0 %v5036_v18  ;;  %v2030_v52 = vpack.c.b16 %v4130_v55, %v4125_v42  ;;  %v5041_v31 = vld [vmem:[#allocation33_spill] sm:$0xff]  ;;  %v5079_v42 = vld [vmem:[#allocation55_spill] sm:$0xff] }
 0x200   :  { %v1777_v5 = vpack.c.bf16 %v1440_v11, %v3955_v15  ;;  %1903 = vmatpush.bf16.xpose.msra.mxu1 %v5037_v10  ;;  %v4144_v50 = vpop.f32.mrf.mxu3  ;;  %v5039_v15 = vpack.c.b16 %v4044_v46, %v4041_v23 }
 0x202   :  { %v1968_v30 = vrot.slane %v1777_v5, 4  ;;  %v1984_v40 = vunpack.c.l.b16 %v1777_v5 }
 0x203   :  { %v1352_v13 = vpop.f32.mrf.mxu0 }
 0x204   :  { %v1353_v49 = vadd.f32 %v1352_v13, %v4008_v6  ;;  %v1441_v54 = vpop.f32.mrf.mxu1  ;;  %v4153_v11 = vunpack.c.l.b16 %v1968_v30 }
 0x205   :  { %1522 = vmatmul.bf16.gmra.mxu2 %v5040_v2  ;;  %v5044_v2 = vld [vmem:[#allocation62_spill] sm:$0xff] }
 0x206   :  { %v1442_v34 = vadd.f32 %v1441_v54, %v1353_v49  ;;  %1611 = vmatmul.bf16.gmra.mxu3 %v5041_v31  ;;  %v5042_v49 = vld [vmem:[#allocation26_spill] sm:$0xff] }
 0x208   :  { %v1779_v48 = vpack.c.bf16 %v1442_v34, %v1175_v0  ;;  %1904 = vmatpush.bf16.xpose.msra.mxu1 %v5039_v15  ;;  %v1483_v38 = vpop.f32.mrf.mxu2 }
 0x209   :  { %v1572_v23 = vpop.f32.mrf.mxu3 }
 0x20a   :  { %v1969_v17 = vrot.slane %v1779_v48, 4  ;;  %v1985_v16 = vunpack.c.l.b16 %v1779_v48  ;;  %v4168_v48 = vadd.f32 %v1572_v23, %v1483_v38 }
 0x20b   :  { %v1355_v6 = vpop.f32.mrf.mxu0 }
 0x20c   :  { %v1356_v29 = vadd.f32 %v1355_v6, %v4022_v12  ;;  %v1444_v18 = vpop.f32.mrf.mxu1  ;;  %v4156_v10 = vunpack.c.l.b16 %v1969_v17  ;;  %v4158_v13 = vpack.c.b16 %v1985_v16, %v1984_v40  ;;  %v1180_v40 = vadd.f32 %v3987_v28, %v5044_v2 }
 0x20e   :  { %v1445_v46 = vadd.f32 %v1444_v18, %v1356_v29  ;;  %1670 = vmatmul.bf16.gmra.mxu0 %v5042_v49  ;;  %v2031_v5 = vpack.c.b16 %v4156_v10, %v4153_v11 }
 0x210   :  { %v1781_v54 = vpack.c.bf16 %v1445_v46, %v3980_v21  ;;  %1905 = vmatpush.bf16.xpose.msra.mxu1 %v5043_v26  ;;  %v1485_v12 = vpop.f32.mrf.mxu2 }
 0x211   :  { %v1574_v15 = vpop.f32.mrf.mxu3 }
 0x212   :  { %v4172_v16 = vadd.f32 %v1574_v15, %v1485_v12  ;;  %v1970_v31 = vrot.slane %v1781_v54, 4  ;;  %v1986_v6 = vunpack.c.l.b16 %v1781_v54  ;;  %v5048_v12 = vpack.c.b16 %v3968_v62, %v3965_v9  ;;  %v5051_v62 = vld [vmem:[#allocation36_spill] sm:$0xff] }
 0x213   :  { %v1357_v0 = vpop.f32.mrf.mxu0  ;;  %v5050_v9 = vpack.c.b16 %v3945_v36, %v3940_v20 }
 0x214   :  { %v1358_v34 = vadd.f32 %v1357_v0, %v4033_v39  ;;  %v1446_v30 = vpop.f32.mrf.mxu1  ;;  %v4179_v23 = vunpack.c.l.b16 %v1970_v31  ;;  %v5047_v0 = vld [vmem:[#allocation29_spill] sm:$0xff] }
 0x215   :  { %1527 = vmatmul.bf16.gmra.mxu2 %v5046_v35 }
 0x216   :  { %v1447_v17 = vadd.f32 %v1446_v30, %v1358_v34  ;;  %1616 = vmatmul.bf16.gmra.mxu3 %v3714_v63 }
 0x218   :  { %v1783_v21 = vpack.c.bf16 %v1447_v17, %v1180_v40  ;;  %1906 = vmatpush.bf16.xpose.msra.mxu1 %v5045_v32  ;;  %v1488_v18 = vpop.f32.mrf.mxu2  ;;  %v5049_v17 = vld [vmem:[#allocation65_spill] sm:$0xff] }
 0x219   :  { %v1577_v58 = vpop.f32.mrf.mxu3  ;;  %v1185_v31 = vadd.f32 %v4012_v44, %v5049_v17 }
 0x21a   :  { %v1971_v39 = vrot.slane %v1783_v21, 4  ;;  %v1987_v29 = vunpack.c.l.b16 %v1783_v21  ;;  %v4194_v2 = vadd.f32 %v1577_v58, %v1488_v18 }
 0x21b   :  { %v1360_v38 = vpop.f32.mrf.mxu0 }
 0x21c   :  { %v1361_v28 = vadd.f32 %v1360_v38, %v4048_v22  ;;  %v1449_v46 = vpop.f32.mrf.mxu1  ;;  %v4182_v49 = vunpack.c.l.b16 %v1971_v39  ;;  %v4184_v26 = vpack.c.b16 %v1987_v29, %v1986_v6 }
 0x21e   :  { %v1450_v1 = vadd.f32 %v1449_v46, %v1361_v28  ;;  %1675 = vmatmul.bf16.gmra.mxu0 %v5047_v0  ;;  %v2032_v54 = vpack.c.b16 %v4182_v49, %v4179_v23 }
 0x220   :  { %v1785_v63 = vpack.c.bf16 %v1450_v1, %v4005_v57  ;;  %1907 = vmatpush.bf16.xpose.msra.mxu1 %v5048_v12  ;;  %v1490_v22 = vpop.f32.mrf.mxu2  ;;  %v5052_v1 = vld [vmem:[#allocation32_spill] sm:$0xff] }
 0x221   :  { %v1579_v40 = vpop.f32.mrf.mxu3 }
 0x222   :  { %v4198_v32 = vadd.f32 %v1579_v40, %v1490_v22  ;;  %v1972_v35 = vrot.slane %v1785_v63, 4  ;;  %v1988_v6 = vunpack.c.l.b16 %v1785_v63 }
 0x223   :  { %v1362_v34 = vpop.f32.mrf.mxu0 }
 0x224   :  { %v1363_v30 = vadd.f32 %v1362_v34, %v4059_v53  ;;  %v1451_v15 = vpop.f32.mrf.mxu1  ;;  %v4205_v18 = vunpack.c.l.b16 %v1972_v35 }
 0x225   :  { %1532 = vmatmul.bf16.gmra.mxu2 %v5051_v62 }
 0x226   :  { %v1452_v21 = vadd.f32 %v1451_v15, %v1363_v30  ;;  %1621 = vmatmul.bf16.gmra.mxu3 %v3732_v45  ;;  %v5053_v15 = vld [vmem:[#allocation39_spill] sm:$0xff] }
 0x227   :  { %v1190_v40 = vadd.f32 %v4038_v3, %v5053_v15 }
 0x228   :  { %v1787_v57 = vpack.c.bf16 %v1452_v21, %v1185_v31  ;;  %1908 = vmatpush.bf16.xpose.msra.mxu1 %v5050_v9  ;;  %v1493_v38 = vpop.f32.mrf.mxu2 }
 0x229   :  { %v1582_v20 = vpop.f32.mrf.mxu3 }
 0x22a   :  { %v1973_v53 = vrot.slane %v1787_v57, 4  ;;  %v1989_v39 = vunpack.c.l.b16 %v1787_v57  ;;  %v4218_v22 = vadd.f32 %v1582_v20, %v1493_v38  ;;  %v5054_v57 = vld [vmem:[#allocation40_spill] sm:$0xff] }
 0x22b   :  { %v1365_v29 = vpop.f32.mrf.mxu0 }
 0x22c   :  { %v1366_v44 = vadd.f32 %v1365_v29, %v4074_v19  ;;  %v1454_v28 = vpop.f32.mrf.mxu1  ;;  %v4208_v46 = vunpack.c.l.b16 %v1973_v53  ;;  %v4210_v58 = vpack.c.b16 %v1989_v39, %v1988_v6 }
 0x22e   :  { %v1455_v36 = vadd.f32 %v1454_v28, %v1366_v44  ;;  %1680 = vmatmul.bf16.gmra.mxu0 %v5052_v1  ;;  %v2033_v0 = vpack.c.b16 %v4208_v46, %v4205_v18  ;;  %v5055_v44 = vld [vmem:[#allocation35_spill] sm:$0xff] }
 0x22f   :  { %1909 = vmatmul.bf16.vlgmr.msra.gmra.mxu1 %v3942_v14 }
 0x230   :  { %v1789_v45 = vpack.c.bf16 %v1455_v36, %v4030_v27  ;;  %v1495_v12 = vpop.f32.mrf.mxu2 }
 0x231   :  { %v1584_v30 = vpop.f32.mrf.mxu3 }
 0x232   :  { %v4222_v31 = vadd.f32 %v1584_v30, %v1495_v12  ;;  %v1974_v21 = vrot.slane %v1789_v45, 4  ;;  %v1990_v14 = vunpack.c.l.b16 %v1789_v45 }
 0x233   :  { %v1367_v63 = vpop.f32.mrf.mxu0 }
 0x234   :  { %v1368_v19 = vadd.f32 %v1367_v63, %v4085_v33  ;;  %v1456_v34 = vpop.f32.mrf.mxu1  ;;  %v4226_v6 = vunpack.c.l.b16 %v1974_v21 }
 0x235   :  { %1537 = vmatmul.bf16.gmra.mxu2 %v5054_v57 }
 0x236   :  { %v1457_v17 = vadd.f32 %v1456_v34, %v1368_v19  ;;  %1626 = vmatmul.bf16.gmra.mxu3 %v3752_v43  ;;  %v5056_v19 = vld [vmem:[#allocation43_spill] sm:$0xff] }
 0x237   :  { %v1195_v34 = vadd.f32 %v4064_v51, %v5056_v19 }
 0x238   :  { %v1791_v35 = vpack.c.bf16 %v1457_v17, %v1190_v40  ;;  %v1498_v62 = vpop.f32.mrf.mxu2 }
 0x239   :  { %v1587_v38 = vpop.f32.mrf.mxu3 }
 0x23a   :  { %v1975_v27 = vrot.slane %v1791_v35, 4  ;;  %v1991_v9 = vunpack.c.l.b16 %v1791_v35  ;;  %v4239_v63 = vadd.f32 %v1587_v38, %v1498_v62  ;;  %v5059_v38 = vld [vmem:[#allocation68_spill] sm:$0xff] }
 0x23b   :  { %v1370_v33 = vpop.f32.mrf.mxu0 }
 0x23c   :  { %v1371_v53 = vadd.f32 %v1370_v33, %v4096_v61  ;;  %v1459_v39 = vpop.f32.mrf.mxu1  ;;  %v4229_v3 = vunpack.c.l.b16 %v1975_v27  ;;  %v4231_v29 = vpack.c.b16 %v1991_v9, %v1990_v14 }
 0x23e   :  { %1685 = vmatmul.bf16.gmra.mxu0 %v5055_v44  ;;  %v2034_v28 = vpack.c.b16 %v4229_v3, %v4226_v6  ;;  %v1460_v43 = vadd.f32 %v1459_v39, %v1371_v53  ;;  %v5058_v53 = vld [vmem:[#allocation37_spill] sm:$0xff] }
 0x23f   :  { %1914 = vmatmul.bf16.gmra.mxu1 %v3970_v7  ;;  %v5057_v7 = vld [vmem:[#allocation11_spill] sm:$0xff] }
 0x240   :  { %v1500_v36 = vpop.f32.mrf.mxu2  ;;  %v1793_v1 = vpack.c.bf16 %v1460_v43, %v4055_v59 }
 0x241   :  { %v1589_v12 = vpop.f32.mrf.mxu3 }
 0x242   :  { %v4243_v15 = vadd.f32 %v1589_v12, %v1500_v36  ;;  %v1976_v40 = vrot.slane %v1793_v1, 4  ;;  %v1992_v21 = vunpack.c.l.b16 %v1793_v1  ;;  %v5061_v12 = vld [vmem:[#allocation42_spill] sm:$0xff] }
 0x243   :  { %v1372_v20 = vpop.f32.mrf.mxu0 }
 0x244   :  { %v1373_v61 = vadd.f32 %v1372_v20, %v4105_v24  ;;  %v1461_v45 = vpop.f32.mrf.mxu1  ;;  %v4247_v14 = vunpack.c.l.b16 %v1976_v40 }
 0x245   :  { %1542 = vmatmul.bf16.gmra.mxu2 %v5057_v7 }
 0x246   :  { %v1462_v30 = vadd.f32 %v1461_v45, %v1373_v61  ;;  %1631 = vmatmul.bf16.gmra.mxu3 %v3611_v8  ;;  %v5060_v45 = vld [vmem:[#allocation46_spill] sm:$0xff] }
 0x247   :  { %v1200_v19 = vadd.f32 %v5061_v12, %v5060_v45  ;;  %v5066_v45 = vld [vmem:[#allocation50_spill] sm:$0xff] }
 0x248   :  { %v1795_v17 = vpack.c.bf16 %v1462_v30, %v1195_v34  ;;  %v1503_v24 = vpop.f32.mrf.mxu2 }
 0x249   :  { %v1592_v62 = vpop.f32.mrf.mxu3 }
 0x24a   :  { %v1977_v35 = vrot.slane %v1795_v17, 4  ;;  %v1993_v57 = vunpack.c.l.b16 %v1795_v17  ;;  %v4262_v1 = vadd.f32 %v1592_v62, %v1503_v24  ;;  %v5062_v17 = vld [vmem:[#allocation12_spill] sm:$0xff] }
 0x24b   :  { %v1375_v59 = vpop.f32.mrf.mxu0 }
 0x24c   :  { %v1376_v27 = vadd.f32 %v1375_v59, %v4114_v41  ;;  %v1464_v9 = vpop.f32.mrf.mxu1  ;;  %v4250_v51 = vunpack.c.l.b16 %v1977_v35  ;;  %v4252_v33 = vpack.c.b16 %v1993_v57, %v1992_v21  ;;  %v5063_v57 = vld [vmem:[#allocation14_spill] sm:$0xff] }
 0x24e   :  { %1690 = vmatmul.bf16.gmra.mxu0 %v5058_v53  ;;  %v2035_v39 = vpack.c.b16 %v4250_v51, %v4247_v14  ;;  %v1465_v8 = vadd.f32 %v1464_v9, %v1376_v27 }
 0x24f   :  { %1919 = vmatmul.bf16.gmra.mxu1 %v5059_v38  ;;  %v5064_v38 = vld [vmem:[#allocation41_spill] sm:$0xff] }
 0x250   :  { %v4258_v43 = vpop.f32.mrf.mxu2  ;;  %v1797_v20 = vpack.c.bf16 %v1465_v8, %v4081_v4 }
 0x251   :  { %v4264_v61 = vpop.f32.mrf.mxu3 }
 0x252   :  { %v1978_v30 = vrot.slane %v1797_v20, 4  ;;  %v1994_v7 = vunpack.c.l.b16 %v1797_v20 }
 0x253   :  { %v1377_v44 = vpop.f32.mrf.mxu0 }
 0x254   :  { %v1378_v41 = vadd.f32 %v1377_v44, %v4119_v25  ;;  %v1466_v36 = vpop.f32.mrf.mxu1  ;;  %v2026_v59 = vunpack.c.l.b16 %v1978_v30  ;;  %v5065_v44 = vld [vmem:[#allocation69_spill] sm:$0xff] }
 0x255   :  { %1547 = vmatmul.bf16.gmra.mxu2 %v5062_v17  ;;  %v5067_v30 = vld [vmem:[#allocation49_spill] sm:$0xff] }
 0x256   :  { %v1467_v34 = vadd.f32 %v1466_v36, %v1378_v41  ;;  %1636 = vmatmul.bf16.gmra.mxu3 %v5063_v57 }
 0x258   :  { %v1799_v40 = vpack.c.bf16 %v1467_v34, %v1200_v19  ;;  %v4270_v25 = vpop.f32.mrf.mxu2 }
 0x259   :  { %v4275_v53 = vpop.f32.mrf.mxu3 }
 0x25a   :  { %v1979_v21 = vrot.slane %v1799_v40, 4  ;;  %v1995_v35 = vunpack.c.l.b16 %v1799_v40  ;;  %v1205_v40 = vadd.f32 %v4141_v47, %v5067_v30 }
 0x25b   :  { %v1380_v4 = vpop.f32.mrf.mxu0 }
 0x25c   :  { %v1381_v24 = vadd.f32 %v1380_v4, %v4132_v56  ;;  %v1469_v27 = vpop.f32.mrf.mxu1  ;;  %v2027_v9 = vunpack.c.l.b16 %v1979_v21  ;;  %v4273_v62 = vpack.c.b16 %v1995_v35, %v1994_v7  ;;  %v5068_v35 = vld [vmem:[#allocation13_spill] sm:$0xff] }
 0x25e   :  { %1695 = vmatmul.bf16.gmra.mxu0 %v5064_v38  ;;  %v2036_v8 = vpack.c.b16 %v2027_v9, %v2026_v59  ;;  %v1470_v20 = vadd.f32 %v1469_v27, %v1381_v24  ;;  %v5069_v24 = vld [vmem:[#allocation17_spill] sm:$0xff] }
 0x25f   :  { %1924 = vmatmul.bf16.gmra.mxu1 %v5065_v44 }
 0x260   :  { %v4279_v36 = vpop.f32.mrf.mxu2  ;;  %v1801_v12 = vpack.c.bf16 %v1470_v20, %v5066_v45 }
 0x261   :  { %v4283_v34 = vpop.f32.mrf.mxu3 }
 0x262   :  { %v1980_v7 = vrot.slane %v1801_v12, 4  ;;  %v1996_v57 = vunpack.c.l.b16 %v1801_v12 }
 0x263   :  { %v1382_v41 = vpop.f32.mrf.mxu0 }
 0x264   :  { %v1383_v19 = vadd.f32 %v1382_v41, %v4144_v50  ;;  %v1471_v56 = vpop.f32.mrf.mxu1  ;;  %v2028_v50 = vunpack.c.l.b16 %v1980_v7  ;;  %v5070_v41 = vld [vmem:[#allocation44_spill] sm:$0xff] }
 0x265   :  { %1552 = vmatmul.bf16.gmra.mxu2 %v5068_v35  ;;  %v5072_v35 = vld [vmem:[#allocation16_spill] sm:$0xff] }
 0x266   :  { %v1472_v17 = vadd.f32 %v1471_v56, %v1383_v19  ;;  %1641 = vmatmul.bf16.gmra.mxu3 %v5069_v24  ;;  %v5071_v19 = vld [vmem:[#allocation38_spill] sm:$0xff] }
 0x268   :  { %v1803_v21 = vpack.c.bf16 %v1472_v17, %v1205_v40  ;;  %v4289_v9 = vpop.f32.mrf.mxu2 }
 0x269   :  { %v4294_v47 = vpop.f32.mrf.mxu3 }
 0x26a   :  { %v1981_v4 = vrot.slane %v1803_v21, 4  ;;  %v1997_v59 = vunpack.c.l.b16 %v1803_v21 }
 0x26b   :  { %v1661_v27 = vpop.f32.mrf.mxu0 }
 0x26c   :  { %v2029_v38 = vunpack.c.l.b16 %v1981_v4  ;;  %v1662_v44 = vadd.f32 %v1661_v27, %v4168_v48  ;;  %v4292_v20 = vpack.c.b16 %v1997_v59, %v1996_v57  ;;  %v5073_v57 = vld [vmem:[#allocation21_spill] sm:$0xff] }
 0x26e   :  { %1700 = vmatmul.bf16.gmra.mxu0 %v5070_v41  ;;  %v2037_v45 = vpack.c.b16 %v2029_v38, %v2028_v50  ;;  %v1742_v30 = vpack.c.bf16 %v1662_v44, %v1662_v44  ;;  %v5074_v50 = vld [vmem:[#allocation47_spill] sm:$0xff] }
 0x26f   :  { %1929 = vmatmul.bf16.gmra.mxu1 %v5071_v19  ;;  %v5075_v38 = vld [vmem:[#allocation15_spill] sm:$0xff] }
 0x270   :  { %2046 = vmatpush.bf16.xpose.msrb.mxu2 %v2037_v45  ;;  %v4298_v56 = vpop.f32.mrf.mxu2  ;;  %v4303_v48 = vunpack.c.l.b16 %v1742_v30 }
 0x271   :  { %v4301_v17 = vpop.f32.mrf.mxu3 }
 0x273   :  { %v1663_v12 = vpop.f32.mrf.mxu0 }
 0x274   :  { %v1664_v40 = vadd.f32 %v1663_v12, %v4172_v16 }
 0x275   :  { %1557 = vmatmul.bf16.gmra.mxu2 %v5072_v35  ;;  %v5077_v35 = vld [vmem:[#allocation58_spill] sm:$0xff] }
 0x276   :  { %v1744_v7 = vpack.c.bf16 %v1664_v40, %v1664_v40  ;;  %1646 = vmatmul.bf16.gmra.mxu3 %v5073_v57 }
 0x278   :  { %v4305_v21 = vunpack.c.l.b16 %v1744_v7  ;;  %2047 = vmatpush.bf16.xpose.msrb.mxu2 %v2036_v8  ;;  %v4311_v24 = vpop.f32.mrf.mxu2 }
 0x279   :  { %v4314_v27 = vpop.f32.mrf.mxu3 }
 0x27a   :  { %v1608_v10 = vadd.f32 %v4314_v27, %v4311_v24 }
 0x27b   :  { %v1666_v59 = vpop.f32.mrf.mxu0 }
 0x27c   :  { %v1667_v16 = vadd.f32 %v1666_v59, %v4194_v2 }
 0x27e   :  { %1705 = vmatmul.bf16.gmra.mxu0 %v5074_v50  ;;  %v1746_v41 = vpack.c.bf16 %v1667_v16, %v1667_v16 }
 0x27f   :  { %1934 = vmatmul.bf16.gmra.mxu1 %v5075_v38 }
 0x280   :  { %2048 = vmatpush.bf16.xpose.msrb.mxu2 %v2035_v39  ;;  %v4321_v44 = vpop.f32.mrf.mxu2  ;;  %v4326_v2 = vunpack.c.l.b16 %v1746_v41  ;;  %v5078_v41 = vld [vmem:[#allocation53_spill] sm:$0xff] }
 0x281   :  { %v4324_v19 = vpop.f32.mrf.mxu3 }
 0x283   :  { %v1668_v8 = vpop.f32.mrf.mxu0 }
 0x284   :  { %v1669_v45 = vadd.f32 %v1668_v8, %v4198_v32  ;;  %v5076_v32 = vld [vmem:[#allocation51_spill] sm:$0xff] }
 0x286   :  { %v1748_v12 = vpack.c.bf16 %v1669_v45, %v1669_v45  ;;  %v2095_v45 = vlaneseq }
 0x288   :  { %v4328_v30 = vunpack.c.l.b16 %v1748_v12  ;;  %2049 = vmatpush.bf16.xpose.msrb.mxu2 %v2034_v28  ;;  %v1523_v39 = vpop.f32.mrf.mxu2 }
 0x289   :  { %v1612_v7 = vpop.f32.mrf.mxu3 }
 0x28a   :  { %v4344_v28 = vadd.f32 %v1612_v7, %v1523_v39  ;;  %v4372_v7 = vand.u32 127, %v2095_v45 }
 0x28b   :  { %v1671_v51 = vpop.f32.mrf.mxu0 }
 0x28c   :  { %v1672_v40 = vadd.f32 %v1671_v51, %v4218_v22 }
 0x28e   :  { %1710 = vmatmul.bf16.gmra.mxu0 %v5076_v32  ;;  %v1750_v6 = vpack.c.bf16 %v1672_v40, %v1672_v40  ;;  %v4370_v40 = vshrl.u32 %v2095_v45, 7  ;;  %v5081_v45 = vld [vmem:[#allocation57_spill] sm:$0xff] }
 0x28f   :  { %1939 = vmatmul.bf16.gmra.mxu1 %v5077_v35 }
 0x290   :  { %2050 = vmatpush.bf16.xpose.msrb.mxu2 %v2033_v0  ;;  %v4341_v59 = vpop.f32.mrf.mxu2  ;;  %v4348_v50 = vunpack.c.l.b16 %v1750_v6  ;;  %vm2114_vm0 = vcmp.le.s32.totalorder %v4372_v7, %v4370_v40  ;;  %v4396_v55 = vadd.s32 8, %v4370_v40 }
 0x291   :  { %v4346_v16 = vpop.f32.mrf.mxu3 }
 0x292   :  { %vm2115_vm1 = vcmp.le.s32.totalorder %v4372_v7, %v4396_v55 }
 0x293   :  { %v1673_v57 = vpop.f32.mrf.mxu0 }
 0x294   :  { %v1674_v3 = vadd.f32 %v1673_v57, %v4222_v31 }
 0x296   :  { %v1752_v22 = vpack.c.bf16 %v1674_v3, %v1674_v3 }
 0x298   :  { %v4350_v38 = vunpack.c.l.b16 %v1752_v22  ;;  %2051 = vmatpush.bf16.xpose.msrb.mxu2 %v2032_v54  ;;  %v1528_v0 = vpop.f32.mrf.mxu2 }
 0x299   :  { %v1617_v8 = vpop.f32.mrf.mxu3 }
 0x29a   :  { %v4366_v51 = vadd.f32 %v1617_v8, %v1528_v0 }
 0x29b   :  { %v1676_v46 = vpop.f32.mrf.mxu0 }
 0x29c   :  { %v1677_v31 = vadd.f32 %v1676_v46, %v4239_v63 }
 0x29e   :  { %1715 = vmatmul.bf16.gmra.mxu0 %v5078_v41  ;;  %v1754_v49 = vpack.c.bf16 %v1677_v31, %v1677_v31 }
 0x29f   :  { %1944 = vmatmul.bf16.gmra.mxu1 %v4112_v37 }
 0x2a0   :  { %2052 = vmatpush.bf16.xpose.msrb.mxu2 %v2031_v5  ;;  %v4363_v23 = vpop.f32.mrf.mxu2  ;;  %v4374_v37 = vunpack.c.l.b16 %v1754_v49 }
 0x2a1   :  { %v4368_v39 = vpop.f32.mrf.mxu3 }
 0x2a3   :  { %v1678_v12 = vpop.f32.mrf.mxu0 }
 0x2a4   :  { %v1679_v54 = vadd.f32 %v1678_v12, %v4243_v15  ;;  %v4426_v12 = vadd.s32 24, %v4370_v40 }
 0x2a6   :  { %v1756_v63 = vpack.c.bf16 %v1679_v54, %v1679_v54  ;;  %5082 = vst [vmem:[#allocation18_spill] sm:$0xff] %v4426_v12  ;;  %vm2117_vm3 = vcmp.le.s32.totalorder %v4372_v7, %v4426_v12  ;;  %v5086_v12 = vld [vmem:[#allocation63_spill] sm:$0xff] }
 0x2a8   :  { %v4376_v11 = vunpack.c.l.b16 %v1756_v63  ;;  %2053 = vmatpush.bf16.xpose.msrb.mxu2 %v2030_v52  ;;  %v1533_v15 = vpop.f32.mrf.mxu2 }
 0x2a9   :  { %v1622_v6 = vpop.f32.mrf.mxu3 }
 0x2aa   :  { %v4403_v22 = vadd.f32 %v1622_v6, %v1533_v15  ;;  %v4440_v6 = vadd.s32 32, %v4370_v40 }
 0x2ab   :  { %v1681_v5 = vpop.f32.mrf.mxu0 }
 0x2ac   :  { %v4386_v32 = vadd.f32 %v1681_v5, %v4262_v1  ;;  %v1910_v35 = vpop.f32.mrf.mxu1  ;;  %5083 = vst [vmem:[#allocation20_spill] sm:$0xff] %v4440_v6  ;;  %vm2118_vm4 = vcmp.le.s32.totalorder %v4372_v7, %v4440_v6  ;;  %v1600_v6 = vadd.f32 %v4283_v34, %v4279_v36 }
 0x2ad   :  { %v4391_v57 = vsel %vm2114_vm0, %v1910_v35, -1e+30 }
 0x2ae   :  { %1720 = vmatmul.bf16.gmra.mxu0 %v5079_v42  ;;  %2194 = vmax.xlane.f32.xlu0 %v4391_v57 }
 0x2af   :  { %2054 = vmatmul.bf16.vlgmr.msrb.gmra.mxu2 %v4127_v60  ;;  %v4414_v60 = vadd.s32 16, %v4370_v40 }
 0x2b0   :  { %v4401_v3 = vpop.f32.mrf.mxu2 }
 0x2b1   :  { %v4410_v0 = vpop.f32.mrf.mxu3  ;;  %5080 = vst [vmem:[#allocation60_spill] sm:$0xff] %v4414_v60  ;;  %vm2116_vm2 = vcmp.le.s32.totalorder %v4372_v7, %v4414_v60 }
 0x2b3   :  { %v1683_v52 = vpop.f32.mrf.mxu0 }
 0x2b4   :  { %v1912_v1 = vpop.f32.mrf.mxu1 }
 0x2b5   :  { %v4408_v46 = vsel %vm2115_vm1, %v1912_v1, -1e+30 }
 0x2b6   :  { %2196 = vmax.xlane.f32.xlu0 %v4408_v46 }
 0x2b8   :  { %v1538_v49 = vpop.f32.mrf.mxu2 }
 0x2b9   :  { %v1627_v54 = vpop.f32.mrf.mxu3 }
 0x2ba   :  { %v4431_v15 = vadd.f32 %v1627_v54, %v1538_v49  ;;  %v5085_v49 = vld [vmem:[#allocation61_spill] sm:$0xff] }
 0x2bb   :  { %v1686_v31 = vpop.f32.mrf.mxu0 }
 0x2bc   :  { %v1915_v8 = vpop.f32.mrf.mxu1 }
 0x2bd   :  { %v4421_v41 = vsel %vm2116_vm2, %v1915_v8, -1e+30 }
 0x2be   :  { %1725 = vmatmul.bf16.gmra.mxu0 %v5081_v45  ;;  %2198 = vmax.xlane.f32.xlu2 %v4421_v41 }
 0x2bf   :  { %2059 = vmatmul.bf16.gmra.mxu2 %v4158_v13 }
 0x2c0   :  { %v4442_v42 = vpop.f32.mrf.mxu2 }
 0x2c1   :  { %v4444_v13 = vpop.f32.mrf.mxu3 }
 0x2c3   :  { %v1688_v63 = vpop.f32.mrf.mxu0 }
 0x2c4   :  { %v1917_v5 = vpop.f32.mrf.mxu1  ;;  %v1689_v60 = vadd.f32 %v1688_v63, %v1600_v6 }
 0x2c5   :  { %v4436_v35 = vsel %vm2117_vm3, %v1917_v5, -1e+30 }
 0x2c6   :  { %2200 = vmax.xlane.f32.xlu2 %v4436_v35 }
 0x2c8   :  { %v1543_v54 = vpop.f32.mrf.mxu2 }
 0x2c9   :  { %v1632_v4 = vpop.f32.mrf.mxu3 }
 0x2ca   :  { %v4456_v14 = vadd.f32 %v1632_v4, %v1543_v54  ;;  %v1610_v4 = vadd.f32 %v4324_v19, %v4321_v44 }
 0x2cb   :  { %v1691_v1 = vpop.f32.mrf.mxu0 }
 0x2cc   :  { %v1920_v8 = vpop.f32.mrf.mxu1 }
 0x2cd   :  { %v4451_v45 = vsel %vm2118_vm4, %v1920_v8, -1e+30  ;;  %v1605_v8 = vadd.f32 %v4301_v17, %v4298_v56 }
 0x2ce   :  { %5084 = vst [vmem:[#allocation45_spill] sm:$0xff] %v4451_v45  ;;  %1730 = vmatmul.bf16.gmra.mxu0 %v5085_v49  ;;  %2202 = vmax.xlane.f32.xlu2 %v4451_v45 }
 0x2cf   :  { %2064 = vmatmul.bf16.gmra.mxu2 %v4184_v26  ;;  %v1603_v26 = vadd.f32 %v4294_v47, %v4289_v9  ;;  %v1595_v9 = vadd.f32 %v4264_v61, %v4258_v43  ;;  %v1758_v43 = vpack.c.bf16 %v4386_v32, %v4386_v32 }
 0x2d0   :  { %v4475_v6 = vpop.f32.mrf.mxu2 }
 0x2d1   :  { %v1692_v24 = vadd.f32 %v1691_v1, %v1603_v26  ;;  %v1684_v19 = vadd.f32 %v1683_v52, %v1595_v9  ;;  %v1620_v9 = vadd.f32 %v4368_v39, %v4363_v23 }
 0x2d3   :  { %v1693_v5 = vpop.f32.mrf.mxu0 }
 0x2d4   :  { %v1694_v45 = vadd.f32 %v1693_v5, %v1605_v8  ;;  %v1764_v5 = vpack.c.bf16 %v1689_v60, %v1689_v60 }
 0x2d6   :  { %v1768_v56 = vpack.c.bf16 %v1694_v45, %v1694_v45 }
 0x2d8   :  { %v2623_v8 = vunpack.c.l.b16 %v1768_v56  ;;  %v4486_v32 = vpop.f32.mrf.mxu2 }
 0x2db   :  { %v1696_v18 = vpop.f32.mrf.mxu0 }
 0x2dc   :  { %v1697_v49 = vadd.f32 %v1696_v18, %v1608_v10  ;;  %v1766_v18 = vpack.c.bf16 %v1692_v24, %v1692_v24 }
 0x2de   :  { %1735 = vmatmul.bf16.gmra.mxu0 %v5086_v12  ;;  %v1770_v27 = vpack.c.bf16 %v1697_v49, %v1697_v49  ;;  %v2622_v49 = vunpack.c.l.b16 %v1766_v18 }
 0x2df   :  { %2069 = vmatmul.bf16.gmra.mxu2 %v4210_v58  ;;  %v1598_v58 = vadd.f32 %v4275_v53, %v4270_v25  ;;  %v1760_v25 = vpack.c.bf16 %v1684_v19, %v1684_v19  ;;  %v2621_v53 = vunpack.c.l.b16 %v1764_v5 }
 0x2e0   :  { %v2624_v10 = vunpack.c.l.b16 %v1770_v27  ;;  %v2632_v63 = vpack.c.b16 %v2623_v8, %v2622_v49 }
 0x2e1   :  { %v1687_v47 = vadd.f32 %v1686_v31, %v1598_v58  ;;  %v2619_v52 = vunpack.c.l.b16 %v1760_v25  ;;  %v1615_v31 = vadd.f32 %v4346_v16, %v4341_v59  ;;  %v5087_v16 = vpack.c.b16 %v4376_v11, %v4374_v37 }
 0x2e3   :  { %v1698_v54 = vpop.f32.mrf.mxu0  ;;  %v1762_v1 = vpack.c.bf16 %v1687_v47, %v1687_v47  ;;  %v4500_v47 = vpop.f32.mrf.mxu2 }
 0x2e4   :  { %v1699_v12 = vadd.f32 %v1698_v54, %v1610_v4 }
 0x2e5   :  { %v2620_v61 = vunpack.c.l.b16 %v1762_v1 }
 0x2e6   :  { %v1772_v17 = vpack.c.bf16 %v1699_v12, %v1699_v12 }
 0x2e7   :  { %v2631_v60 = vpack.c.b16 %v2621_v53, %v2620_v61  ;;  %v1634_v53 = vpop.f32.mrf.mxu3 }
 0x2e8   :  { %v2625_v44 = vunpack.c.l.b16 %v1772_v17  ;;  %v5088_v17 = vpack.c.b16 %v4350_v38, %v4348_v50  ;;  %v5090_v50 = vpack.c.b16 %v4305_v21, %v4303_v48 }
 0x2ea   :  { %v2633_v36 = vpack.c.b16 %v2625_v44, %v2624_v10 }
 0x2eb   :  { %v1701_v34 = vpop.f32.mrf.mxu0  ;;  %v4515_v19 = vpop.f32.mrf.mxu2 }
 0x2ec   :  { %v1702_v26 = vadd.f32 %v1701_v34, %v4344_v28  ;;  %2642 = vmatpush.bf16.msrb.mxu3 %v2633_v36  ;;  %v2618_v28 = vunpack.c.l.b16 %v1758_v43 }
 0x2ee   :  { %v1774_v4 = vpack.c.bf16 %v1702_v26, %v1702_v26  ;;  %v2630_v24 = vpack.c.b16 %v2619_v52, %v2618_v28 }
 0x2ef   :  { %2074 = vmatmul.bf16.gmra.mxu2 %v4231_v29 }
 0x2f0   :  { %2643 = vmatpush.bf16.msrb.mxu3 %v2632_v63  ;;  %v4482_v12 = vunpack.c.l.b16 %v1774_v4 }
 0x2f3   :  { %v1703_v45 = vpop.f32.mrf.mxu0  ;;  %v4520_v34 = vpop.f32.mrf.mxu2 }
 0x2f4   :  { %v1704_v54 = vadd.f32 %v1703_v45, %v1615_v31  ;;  %2644 = vmatpush.bf16.msrb.mxu3 %v2631_v60 }
 0x2f6   :  { %v1776_v27 = vpack.c.bf16 %v1704_v54, %v1704_v54 }
 0x2f8   :  { %v4484_v29 = vunpack.c.l.b16 %v1776_v27  ;;  %2645 = vmatpush.bf16.msrb.mxu3 %v2630_v24  ;;  %v1637_v24 = vpop.f32.mrf.mxu3 }
 0x2fa   :  { %v2771_v58 = vpack.c.b16 %v4484_v29, %v4482_v12 }
 0x2fb   :  { %v1706_v56 = vpop.f32.mrf.mxu0 }
 0x2fc   :  { %v1707_v59 = vadd.f32 %v1706_v56, %v4366_v51  ;;  %2646 = vmatpush.bf16.msrb.mxu3 %v5087_v16  ;;  %v5089_v51 = vpack.c.b16 %v4328_v30, %v4326_v2  ;;  %v1625_v2 = vadd.f32 %v4410_v0, %v4401_v3  ;;  %v1630_v0 = vadd.f32 %v4444_v13, %v4442_v42 }
 0x2fd   :  { %v1635_v16 = vadd.f32 %v1634_v53, %v4475_v6 }
 0x2fe   :  { %v1778_v10 = vpack.c.bf16 %v1707_v59, %v1707_v59 }
 0x2ff   :  { %2079 = vmatmul.bf16.gmra.mxu2 %v4252_v33 }
 0x300   :  { %2647 = vmatpush.bf16.msrb.mxu3 %v5088_v17  ;;  %v4505_v11 = vunpack.c.l.b16 %v1778_v10  ;;  %v1639_v6 = vpop.f32.mrf.mxu3 }
 0x303   :  { %v1708_v18 = vpop.f32.mrf.mxu0 }
 0x304   :  { %v1709_v44 = vadd.f32 %v1708_v18, %v1620_v9  ;;  %2648 = vmatpush.bf16.msrb.mxu3 %v5089_v51 }
 0x306   :  { %v1780_v37 = vpack.c.bf16 %v1709_v44, %v1709_v44  ;;  %v1922_v44 = vpop.f32.mrf.mxu1 }
 0x308   :  { %v4507_v33 = vunpack.c.l.b16 %v1780_v37  ;;  %2649 = vmatpush.bf16.msrb.mxu3 %v5090_v50 }
 0x30a   :  { %v2772_v38 = vpack.c.b16 %v4507_v33, %v4505_v11 }
 0x30b   :  { %v1711_v23 = vpop.f32.mrf.mxu0 }
 0x30c   :  { %v1712_v39 = vadd.f32 %v1711_v23, %v4403_v22 }
 0x30e   :  { %v1782_v5 = vpack.c.bf16 %v1712_v39, %v1712_v39 }
 0x30f   :  { %2084 = vmatmul.bf16.gmra.mxu2 %v4273_v62  ;;  %v4530_v62 = vpop.f32.mrf.mxu2 }
 0x310   :  { %v4522_v48 = vunpack.c.l.b16 %v1782_v5 }
 0x313   :  { %v1713_v30 = vpop.f32.mrf.mxu0 }
 0x314   :  { %v1714_v8 = vadd.f32 %v1713_v30, %v1625_v2 }
 0x316   :  { %v1784_v36 = vpack.c.bf16 %v1714_v8, %v1714_v8 }
 0x317   :  { %v4542_v13 = vpop.f32.mrf.mxu2 }
 0x318   :  { %v4524_v21 = vunpack.c.l.b16 %v1784_v36 }
 0x31a   :  { %v2773_v22 = vpack.c.b16 %v4524_v21, %v4522_v48  ;;  %v2109_v48 = vadd.s32 104, %v4370_v40 }
 0x31b   :  { %v1716_v1 = vpop.f32.mrf.mxu0 }
 0x31c   :  { %v1717_v49 = vadd.f32 %v1716_v1, %v4431_v15  ;;  %vm2127_vm13 = vcmp.le.s32.totalorder %v4372_v7, %v2109_v48 }
 0x31e   :  { %v1786_v63 = vpack.c.bf16 %v1717_v49, %v1717_v49 }
 0x31f   :  { %2089 = vmatmul.bf16.gmra.mxu2 %v4292_v20 }
 0x320   :  { %v4535_v31 = vunpack.c.l.b16 %v1786_v63 }
 0x321   :  { %v2195_v3 = vpop.xlane.xlu0 %2194 }
 0x322   :  { %v2258_v26 = vsub.f32 %v4391_v57, %v2195_v3 }
 0x323   :  { %v1718_v25 = vpop.f32.mrf.mxu0 }
 0x324   :  { %v2290_v43 = vpack.c.bf16 %v2258_v26, %v2258_v26  ;;  %v1719_v61 = vadd.f32 %v1718_v25, %v1630_v0 }
 0x326   :  { %v2322_v52 = vunpack.c.l.bf16 %v2290_v43  ;;  %v1788_v60 = vpack.c.bf16 %v1719_v61, %v1719_v61  ;;  %v1925_v61 = vpop.f32.mrf.mxu1 }
 0x328   :  { %v4537_v15 = vunpack.c.l.b16 %v1788_v60  ;;  %v2354_v45 = vmul.f32 1.442695, %v2322_v52  ;;  %v1638_v52 = vadd.f32 %v1637_v24, %v4486_v32  ;;  %v2101_v32 = vadd.s32 40, %v4370_v40 }
 0x329   :  { %v2197_v20 = vpop.xlane.xlu0 %2196 }
 0x32a   :  { %v2774_v28 = vpack.c.b16 %v4537_v15, %v4535_v31  ;;  %v2259_v42 = vsub.f32 %v4408_v46, %v2197_v20  ;;  %3337 = vpow2.f32 %v2354_v45  ;;  %v1642_v45 = vpop.f32.mrf.mxu3  ;;  %vm2119_vm5 = vcmp.le.s32.totalorder %v4372_v7, %v2101_v32 }
 0x32b   :  { %v1721_v57 = vpop.f32.mrf.mxu0 }
 0x32c   :  { %v2291_v4 = vpack.c.bf16 %v2259_v42, %v2259_v42  ;;  %v1722_v54 = vadd.f32 %v1721_v57, %v4456_v14  ;;  %v1640_v42 = vadd.f32 %v1639_v6, %v4500_v47 }
 0x32e   :  { %v2323_v27 = vunpack.c.l.bf16 %v2291_v4  ;;  %v1790_v14 = vpack.c.bf16 %v1722_v54, %v1722_v54 }
 0x330   :  { %v2356_v56 = vmul.f32 1.442695, %v2323_v27  ;;  %v3338_v10 = vpop.eup %3337  ;;  %v4555_v2 = vunpack.c.l.b16 %v1790_v14 }
 0x331   :  { %v2199_v59 = vpop.xlane.xlu2 %2198  ;;  %v4553_v39 = vpack.c.bf16 %v3338_v10, %v3338_v10 }
 0x332   :  { %3339 = vpow2.f32 %v2356_v56  ;;  %v2260_v17 = vsub.f32 %v4421_v41, %v2199_v59  ;;  %v2055_v9 = vpop.f32.mrf.mxu2 }
 0x333   :  { %v1723_v18 = vpop.f32.mrf.mxu0  ;;  %v4550_v46 = vsel %vm2114_vm0, %v2055_v9, -1e+30  ;;  %v2562_v0 = vunpack.c.l.b16 %v4553_v39  ;;  %v1927_v9 = vpop.f32.mrf.mxu1 }
 0x334   :  { %v2292_v51 = vpack.c.bf16 %v2260_v17, %v2260_v17  ;;  %v1724_v37 = vadd.f32 %v1723_v18, %v1635_v16  ;;  %2226 = vmax.xlane.f32.xlu1 %v4550_v46 }
 0x336   :  { %v2324_v50 = vunpack.c.l.bf16 %v2292_v51  ;;  %v1792_v23 = vpack.c.bf16 %v1724_v37, %v1724_v37 }
 0x338   :  { %v3340_v41 = vpop.eup %3339  ;;  %v4557_v30 = vunpack.c.l.b16 %v1792_v23  ;;  %v2358_v36 = vmul.f32 1.442695, %v2324_v50  ;;  %v4594_v50 = vsel %vm2119_vm5, %v1922_v44, -1e+30  ;;  %v1643_v44 = vadd.f32 %v1642_v45, %v4515_v19 }
 0x339   :  { %v4559_v5 = vpack.c.bf16 %v3340_v41, %v3340_v41  ;;  %v2201_v8 = vpop.xlane.xlu2 %2200  ;;  %v2103_v45 = vadd.s32 56, %v4370_v40 }
 0x33a   :  { %v2775_v1 = vpack.c.b16 %v4557_v30, %v4555_v2  ;;  %v2261_v49 = vsub.f32 %v4436_v35, %v2201_v8  ;;  %v2057_v3 = vpop.f32.mrf.mxu2  ;;  %3341 = vpow2.f32 %v2358_v36  ;;  %v1644_v36 = vpop.f32.mrf.mxu3  ;;  %v2108_v2 = vadd.s32 96, %v4370_v40 }
 0x33b   :  { %v2563_v26 = vunpack.c.l.b16 %v4559_v5  ;;  %v1726_v25 = vpop.f32.mrf.mxu0  ;;  %v4569_v53 = vsel %vm2115_vm1, %v2057_v3, -1e+30  ;;  %vm2121_vm7 = vcmp.le.s32.totalorder %v4372_v7, %v2103_v45 }
 0x33c   :  { %v2293_v63 = vpack.c.bf16 %v2261_v49, %v2261_v49  ;;  %2228 = vmax.xlane.f32.xlu1 %v4569_v53  ;;  %v1727_v20 = vadd.f32 %v1726_v25, %v1638_v52  ;;  %v2102_v49 = vadd.s32 48, %v4370_v40  ;;  %v1645_v25 = vadd.f32 %v1644_v36, %v4520_v34 }
 0x33d   :  { %v2578_v43 = vpack.c.b16 %v2563_v26, %v2562_v0  ;;  %v1930_v26 = vpop.f32.mrf.mxu1  ;;  %vm2126_vm12 = vcmp.le.s32.totalorder %v4372_v7, %v2108_v2 }
 0x33e   :  { %v2325_v35 = vunpack.c.l.bf16 %v2293_v63  ;;  %v1794_v56 = vpack.c.bf16 %v1727_v20, %v1727_v20  ;;  %vm2120_vm6 = vcmp.le.s32.totalorder %v4372_v7, %v2102_v49 }
 0x33f   :  { %2650 = vmatmul.bf16.vlgmr.msrb.gmra.mxu3 %v2578_v43  ;;  %v4611_v52 = vsel %vm2120_vm6, %v1925_v61, -1e+30 }
 0x340   :  { %v2360_v60 = vmul.f32 1.442695, %v2325_v35  ;;  %v3342_v27 = vpop.eup %3341  ;;  %v4583_v47 = vunpack.c.l.b16 %v1794_v56  ;;  %v4624_v56 = vsel %vm2121_vm7, %v1927_v9, -1e+30 }
 0x341   :  { %v4581_v16 = vpack.c.bf16 %v3342_v27, %v3342_v27  ;;  %v2203_v12 = vpop.xlane.xlu2 %2202 }
 0x342   :  { %3343 = vpow2.f32 %v2360_v60  ;;  %v2060_v57 = vpop.f32.mrf.mxu2  ;;  %v1647_v34 = vpop.f32.mrf.mxu3 }
 0x343   :  { %v1728_v55 = vpop.f32.mrf.mxu0  ;;  %v4577_v54 = vsel %vm2116_vm2, %v2060_v57, -1e+30  ;;  %v2564_v41 = vunpack.c.l.b16 %v4581_v16 }
 0x344   :  { %v1729_v59 = vadd.f32 %v1728_v55, %v1640_v42  ;;  %2230 = vmax.xlane.f32.xlu0 %v4577_v54 }
 0x346   :  { %v1796_v24 = vpack.c.bf16 %v1729_v59, %v1729_v59 }
 0x348   :  { %v3344_v17 = vpop.eup %3343  ;;  %v4585_v18 = vunpack.c.l.b16 %v1796_v24  ;;  %v1932_v24 = vpop.f32.mrf.mxu1 }
 0x349   :  { %v4588_v10 = vpack.c.bf16 %v3344_v17, %v3344_v17  ;;  %v2104_v17 = vadd.s32 64, %v4370_v40 }
 0x34a   :  { %v2776_v14 = vpack.c.b16 %v4585_v18, %v4583_v47  ;;  %v2062_v51 = vpop.f32.mrf.mxu2  ;;  %v2111_v18 = vadd.s32 120, %v4370_v40 }
 0x34b   :  { %v1731_v37 = vpop.f32.mrf.mxu0  ;;  %v4599_v6 = vsel %vm2117_vm3, %v2062_v51, -1e+30  ;;  %v2565_v8 = vunpack.c.l.b16 %v4588_v10  ;;  %v1648_v51 = vadd.f32 %v1647_v34, %v4530_v62  ;;  %vm2122_vm8 = vcmp.le.s32.totalorder %v4372_v7, %v2104_v17 }
 0x34c   :  { %2204 = vmax.xlane.f32.xlu0 %v4594_v50  ;;  %2232 = vmax.xlane.f32.xlu1 %v4599_v6  ;;  %v1732_v0 = vadd.f32 %v1731_v37, %v1643_v44  ;;  %v1649_v37 = vpop.f32.mrf.mxu3  ;;  %v4638_v32 = vsel %vm2122_vm8, %v1930_v26, -1e+30  ;;  %v2105_v62 = vadd.s32 72, %v4370_v40  ;;  %vm2129_vm15 = vcmp.le.s32.totalorder %v4372_v7, %v2111_v18 }
 0x34d   :  { %v2579_v3 = vpack.c.b16 %v2565_v8, %v2564_v41  ;;  %v1650_v9 = vadd.f32 %v1649_v37, %v4542_v13 }
 0x34e   :  { %v1798_v20 = vpack.c.bf16 %v1732_v0, %v1732_v0  ;;  %vm2123_vm9 = vcmp.le.s32.totalorder %v4372_v7, %v2105_v62 }
 0x34f   :  { %2655 = vmatmul.bf16.gmra.mxu3 %v2579_v3  ;;  %v4650_v49 = vsel %vm2123_vm9, %v1932_v24, -1e+30 }
 0x350   :  { %v2767_v57 = vunpack.c.l.b16 %v1798_v20  ;;  %v1935_v0 = vpop.f32.mrf.mxu1  ;;  %v2106_v20 = vadd.s32 80, %v4370_v40 }
 0x352   :  { %v2065_v63 = vpop.f32.mrf.mxu2  ;;  %vm2124_vm10 = vcmp.le.s32.totalorder %v4372_v7, %v2106_v20 }
 0x353   :  { %v1733_v43 = vpop.f32.mrf.mxu0  ;;  %v4616_v60 = vsel %vm2118_vm4, %v2065_v63, -1e+30 }
 0x354   :  { %v1734_v19 = vadd.f32 %v1733_v43, %v1645_v25  ;;  %2206 = vmax.xlane.f32.xlu0 %v4611_v52  ;;  %2234 = vmax.xlane.f32.xlu1 %v4616_v60 }
 0x356   :  { %v1800_v42 = vpack.c.bf16 %v1734_v19, %v1734_v19 }
 0x358   :  { %v2768_v55 = vunpack.c.l.b16 %v1800_v42  ;;  %v1937_v19 = vpop.f32.mrf.mxu1  ;;  %v4662_v42 = vsel %vm2124_vm10, %v1935_v0, -1e+30 }
 0x35a   :  { %v2777_v61 = vpack.c.b16 %v2768_v55, %v2767_v57  ;;  %v2067_v4 = vpop.f32.mrf.mxu2  ;;  %v2107_v57 = vadd.s32 88, %v4370_v40 }
 0x35b   :  { %v1736_v27 = vpop.f32.mrf.mxu0  ;;  %v4628_v59 = vsel %vm2119_vm5, %v2067_v4, -1e+30 }
 0x35c   :  { %2208 = vmax.xlane.f32.xlu1 %v4624_v56  ;;  %2236 = vmax.xlane.f32.xlu2 %v4628_v59  ;;  %v1737_v23 = vadd.f32 %v1736_v27, %v1648_v51  ;;  %vm2125_vm11 = vcmp.le.s32.totalorder %v4372_v7, %v2107_v57 }
 0x35d   :  { %v4687_v47 = vsel %vm2125_vm11, %v1937_v19, -1e+30 }
 0x35e   :  { %v1802_v3 = vpack.c.bf16 %v1737_v23, %v1737_v23 }
 0x360   :  { %v2769_v25 = vunpack.c.l.b16 %v1802_v3  ;;  %v1940_v55 = vpop.f32.mrf.mxu1 }
 0x362   :  { %v2070_v41 = vpop.f32.mrf.mxu2 }
 0x363   :  { %v1738_v8 = vpop.f32.mrf.mxu0  ;;  %v4642_v36 = vsel %vm2120_vm6, %v2070_v41, -1e+30 }
 0x364   :  { %v1739_v44 = vadd.f32 %v1738_v8, %v1650_v9  ;;  %2210 = vmax.xlane.f32.xlu1 %v4638_v32  ;;  %2238 = vmax.xlane.f32.xlu2 %v4642_v36  ;;  %v2450_v8 = vunpack.c.l.bf16 %v4553_v39 }
 0x366   :  { %v1804_v13 = vpack.c.bf16 %v1739_v44, %v1739_v44 }
 0x368   :  { %v2770_v63 = vunpack.c.l.b16 %v1804_v13  ;;  %v1942_v15 = vpop.f32.mrf.mxu1 }
 0x369   :  { %v4716_v11 = vsel %vm2127_vm13, %v1942_v15, -1e+30 }
 0x36a   :  { %v2778_v26 = vpack.c.b16 %v2770_v63, %v2769_v25  ;;  %v2072_v43 = vpop.f32.mrf.mxu2  ;;  %v2453_v25 = vunpack.c.l.bf16 %v4588_v10  ;;  %v2451_v63 = vunpack.c.l.bf16 %v4559_v5  ;;  %v2452_v5 = vunpack.c.l.bf16 %v4581_v16 }
 0x36b   :  { %v4654_v35 = vsel %vm2121_vm7, %v2072_v43, -1e+30 }
 0x36c   :  { %2787 = vmatpush.bf16.msrb.mxu1 %v2778_v26  ;;  %2212 = vmax.xlane.f32.xlu2 %v4650_v49 }
 0x36d   :  { %2240 = vmax.xlane.f32.xlu0 %v4654_v35 }
 0x370   :  { %2788 = vmatpush.bf16.msrb.mxu1 %v2777_v61 }
 0x372   :  { %v2075_v34 = vpop.f32.mrf.mxu2 }
 0x373   :  { %v4666_v45 = vsel %vm2122_vm8, %v2075_v34, -1e+30 }
 0x374   :  { %2789 = vmatpush.bf16.msrb.mxu1 %v2776_v14  ;;  %2214 = vmax.xlane.f32.xlu2 %v4662_v42  ;;  %v5094_v14 = vld [vmem:[#allocation45_spill] sm:$0xff] }
 0x375   :  { %2242 = vmax.xlane.f32.xlu0 %v4666_v45  ;;  %v2262_v27 = vsub.f32 %v5094_v14, %v2203_v12 }
 0x377   :  { %v2294_v17 = vpack.c.bf16 %v2262_v27, %v2262_v27 }
 0x378   :  { %2790 = vmatpush.bf16.msrb.mxu1 %v2775_v1 }
 0x37a   :  { %v2077_v61 = vpop.f32.mrf.mxu2 }
 0x37b   :  { %v4680_v4 = vsel %vm2123_vm9, %v2077_v61, -1e+30 }
 0x37c   :  { %2791 = vmatpush.bf16.msrb.mxu1 %v2774_v28  ;;  %2244 = vmax.xlane.f32.xlu1 %v4680_v4  ;;  %v4705_v28 = vsel %vm2126_vm12, %v1940_v55, -1e+30 }
 0x37d   :  { %2216 = vmax.xlane.f32.xlu0 %v4687_v47 }
 0x380   :  { %2792 = vmatpush.bf16.msrb.mxu1 %v2773_v22  ;;  %v1945_v22 = vpop.f32.mrf.mxu1 }
 0x382   :  { %v2080_v30 = vpop.f32.mrf.mxu2 }
 0x383   :  { %v4698_v31 = vsel %vm2124_vm10, %v2080_v30, -1e+30 }
 0x384   :  { %2793 = vmatpush.bf16.msrb.mxu1 %v2772_v38  ;;  %2246 = vmax.xlane.f32.xlu1 %v4698_v31  ;;  %v2110_v38 = vadd.s32 112, %v4370_v40  ;;  %v2326_v40 = vunpack.c.l.bf16 %v2294_v17 }
 0x385   :  { %2218 = vmax.xlane.f32.xlu0 %v4705_v28 }
 0x386   :  { %vm2128_vm14 = vcmp.le.s32.totalorder %v4372_v7, %v2110_v38  ;;  %v2362_v9 = vmul.f32 1.442695, %v2326_v40 }
 0x388   :  { %2794 = vmatpush.bf16.msrb.mxu1 %v2771_v58  ;;  %v4728_v58 = vsel %vm2128_vm14, %v1945_v22, -1e+30  ;;  %v1947_v24 = vpop.f32.mrf.mxu1  ;;  %3345 = vpow2.f32 %v2362_v9 }
 0x389   :  { %v4741_v37 = vsel %vm2129_vm15, %v1947_v24, -1e+30 }
 0x38a   :  { %v2082_v21 = vpop.f32.mrf.mxu2 }
 0x38b   :  { %v4720_v33 = vsel %vm2125_vm11, %v2082_v21, -1e+30 }
 0x38c   :  { %2220 = vmax.xlane.f32.xlu1 %v4716_v11  ;;  %2248 = vmax.xlane.f32.xlu2 %v4720_v33 }
 0x38e   :  { %v3346_v26 = vpop.eup %3345 }
 0x38f   :  { %v4763_v20 = vpack.c.bf16 %v3346_v26, %v3346_v26 }
 0x391   :  { %v2454_v10 = vunpack.c.l.bf16 %v4763_v20 }
 0x392   :  { %v2085_v29 = vpop.f32.mrf.mxu2 }
 0x393   :  { %v4732_v1 = vsel %vm2126_vm12, %v2085_v29, -1e+30 }
 0x394   :  { %2222 = vmax.xlane.f32.xlu1 %v4728_v58  ;;  %2250 = vmax.xlane.f32.xlu2 %v4732_v1 }
 0x39a   :  { %v2087_v51 = vpop.f32.mrf.mxu2 }
 0x39b   :  { %v4745_v23 = vsel %vm2127_vm13, %v2087_v51, -1e+30 }
 0x39c   :  { %2224 = vmax.xlane.f32.xlu2 %v4741_v37  ;;  %2252 = vmax.xlane.f32.xlu0 %v4745_v23 }
 0x3a2   :  { %v2090_v41 = vpop.f32.mrf.mxu2 }
 0x3a3   :  { %v4752_v3 = vsel %vm2128_vm14, %v2090_v41, -1e+30 }
 0x3a4   :  { %2482 = vadd.xlane.f32.xlu2 %v2450_v8  ;;  %2254 = vmax.xlane.f32.xlu0 %v4752_v3 }
 0x3a7   :  { %v2227_v44 = vpop.xlane.xlu1 %2226 }
 0x3a8   :  { %v2274_v62 = vsub.f32 %v4550_v46, %v2227_v44 }
 0x3aa   :  { %v2306_v0 = vpack.c.bf16 %v2274_v62, %v2274_v62  ;;  %v2092_v13 = vpop.f32.mrf.mxu2 }
 0x3ab   :  { %v4760_v39 = vsel %vm2129_vm15, %v2092_v13, -1e+30 }
 0x3ac   :  { %v2338_v43 = vunpack.c.l.bf16 %v2306_v0  ;;  %2488 = vadd.xlane.f32.xlu2 %v2453_v25  ;;  %2484 = vadd.xlane.f32.xlu0 %v2451_v63 }
 0x3ad   :  { %2256 = vmax.xlane.f32.xlu1 %v4760_v39 }
 0x3ae   :  { %v2386_v46 = vmul.f32 1.442695, %v2338_v43 }
 0x3af   :  { %v2229_v19 = vpop.xlane.xlu1 %2228 }
 0x3b0   :  { %v2275_v34 = vsub.f32 %v4569_v53, %v2229_v19  ;;  %3347 = vpow2.f32 %v2386_v46 }
 0x3b2   :  { %v2307_v57 = vpack.c.bf16 %v2275_v34, %v2275_v34 }
 0x3b4   :  { %v2339_v7 = vunpack.c.l.bf16 %v2307_v57  ;;  %2490 = vadd.xlane.f32.xlu0 %v2454_v10 }
 0x3b5   :  { %2486 = vadd.xlane.f32.xlu1 %v2452_v5 }
 0x3b6   :  { %v2388_v55 = vmul.f32 1.442695, %v2339_v7  ;;  %v3348_v30 = vpop.eup %3347  ;;  %v2566_v7 = vunpack.c.l.b16 %v4763_v20 }
 0x3b7   :  { %v2231_v61 = vpop.xlane.xlu0 %2230  ;;  %v4769_v48 = vpack.c.bf16 %v3348_v30, %v3348_v30 }
 0x3b8   :  { %3349 = vpow2.f32 %v2388_v55  ;;  %v2276_v2 = vsub.f32 %v4577_v54, %v2231_v61 }
 0x3b9   :  { %v2707_v18 = vunpack.c.l.b16 %v4769_v48 }
 0x3ba   :  { %v2308_v15 = vpack.c.bf16 %v2276_v2, %v2276_v2 }
 0x3bc   :  { %v2340_v21 = vunpack.c.l.bf16 %v2308_v15 }
 0x3be   :  { %v3350_v53 = vpop.eup %3349  ;;  %v2390_v27 = vmul.f32 1.442695, %v2340_v21 }
 0x3bf   :  { %v4771_v38 = vpack.c.bf16 %v3350_v53, %v3350_v53  ;;  %v2205_v22 = vpop.xlane.xlu0 %2204  ;;  %v2233_v12 = vpop.xlane.xlu1 %2232 }
 0x3c0   :  { %v2263_v16 = vsub.f32 %v4594_v50, %v2205_v22  ;;  %v2277_v29 = vsub.f32 %v4599_v6, %v2233_v12  ;;  %3351 = vpow2.f32 %v2390_v27 }
 0x3c1   :  { %v2708_v14 = vunpack.c.l.b16 %v4771_v38 }
 0x3c2   :  { %v2295_v54 = vpack.c.bf16 %v2263_v16, %v2263_v16  ;;  %v2309_v24 = vpack.c.bf16 %v2277_v29, %v2277_v29 }
 0x3c3   :  { %v2723_v17 = vpack.c.b16 %v2708_v14, %v2707_v18 }
 0x3c4   :  { %v2327_v51 = vunpack.c.l.bf16 %v2295_v54  ;;  %v2341_v40 = vunpack.c.l.bf16 %v2309_v24 }
 0x3c5   :  { %2795 = vmatmul.bf16.vlgmr.msrb.gmra.mxu1 %v2723_v17 }
 0x3c6   :  { %v2364_v9 = vmul.f32 1.442695, %v2327_v51  ;;  %v2392_v41 = vmul.f32 1.442695, %v2341_v40  ;;  %v3352_v13 = vpop.eup %3351 }
 0x3c7   :  { %v2207_v8 = vpop.xlane.xlu0 %2206  ;;  %v2235_v44 = vpop.xlane.xlu1 %2234  ;;  %v4779_v43 = vpack.c.bf16 %v3352_v13, %v3352_v13 }
 0x3c8   :  { %3353 = vpow2.f32 %v2364_v9  ;;  %v2264_v50 = vsub.f32 %v4611_v52, %v2207_v8  ;;  %v2278_v6 = vsub.f32 %v4616_v60, %v2235_v44 }
 0x3c9   :  { %3355 = vpow2.f32 %v2392_v41  ;;  %v2709_v21 = vunpack.c.l.b16 %v4779_v43 }
 0x3ca   :  { %v2296_v62 = vpack.c.bf16 %v2264_v50, %v2264_v50  ;;  %v2310_v0 = vpack.c.bf16 %v2278_v6, %v2278_v6 }
 0x3cc   :  { %v2328_v25 = vunpack.c.l.bf16 %v2296_v62  ;;  %v2342_v63 = vunpack.c.l.bf16 %v2310_v0 }
 0x3ce   :  { %v3354_v26 = vpop.eup %3353  ;;  %v2366_v19 = vmul.f32 1.442695, %v2328_v25  ;;  %v2394_v55 = vmul.f32 1.442695, %v2342_v63 }
 0x3cf   :  { %v3356_v46 = vpop.eup %3355  ;;  %v2209_v34 = vpop.xlane.xlu1 %2208  ;;  %v2423_v10 = vpack.c.bf16 %v3354_v26, %v3354_v26 }
 0x3d0   :  { %v2237_v57 = vpop.xlane.xlu2 %2236  ;;  %v4781_v5 = vpack.c.bf16 %v3356_v46, %v3356_v46  ;;  %3357 = vpow2.f32 %v2366_v19  ;;  %v2265_v52 = vsub.f32 %v4624_v56, %v2209_v34 }
 0x3d1   :  { %v2279_v60 = vsub.f32 %v4628_v59, %v2237_v57  ;;  %v2455_v61 = vunpack.c.l.bf16 %v2423_v10  ;;  %v2567_v2 = vunpack.c.l.b16 %v2423_v10  ;;  %3359 = vpow2.f32 %v2394_v55 }
 0x3d2   :  { %v2297_v30 = vpack.c.bf16 %v2265_v52, %v2265_v52  ;;  %v2710_v53 = vunpack.c.l.b16 %v4781_v5 }
 0x3d3   :  { %v2311_v15 = vpack.c.bf16 %v2279_v60, %v2279_v60  ;;  %2492 = vadd.xlane.f32.xlu1 %v2455_v61  ;;  %v2580_v22 = vpack.c.b16 %v2567_v2, %v2566_v7 }
 0x3d4   :  { %v2329_v12 = vunpack.c.l.bf16 %v2297_v30  ;;  %v2724_v29 = vpack.c.b16 %v2710_v53, %v2709_v21 }
 0x3d5   :  { %v2343_v16 = vunpack.c.l.bf16 %v2311_v15  ;;  %2660 = vmatmul.bf16.gmra.mxu3 %v2580_v22 }
 0x3d6   :  { %v3358_v56 = vpop.eup %3357  ;;  %v2368_v59 = vmul.f32 1.442695, %v2329_v12  ;;  %2800 = vmatmul.bf16.gmra.mxu1 %v2724_v29 }
 0x3d7   :  { %v2396_v18 = vmul.f32 1.442695, %v2343_v16  ;;  %v2211_v20 = vpop.xlane.xlu1 %2210  ;;  %v2424_v27 = vpack.c.bf16 %v3358_v56, %v3358_v56  ;;  %v3360_v9 = vpop.eup %3359 }
 0x3d8   :  { %v2239_v14 = vpop.xlane.xlu2 %2238  ;;  %3361 = vpow2.f32 %v2368_v59  ;;  %v2266_v54 = vsub.f32 %v4638_v32, %v2211_v20  ;;  %v4790_v50 = vpack.c.bf16 %v3360_v9, %v3360_v9 }
 0x3d9   :  { %v2280_v24 = vsub.f32 %v4642_v36, %v2239_v14  ;;  %3363 = vpow2.f32 %v2396_v18  ;;  %v2456_v17 = vunpack.c.l.bf16 %v2424_v27  ;;  %v2568_v32 = vunpack.c.l.b16 %v2424_v27 }
 0x3da   :  { %v2298_v51 = vpack.c.bf16 %v2266_v54, %v2266_v54  ;;  %v2711_v10 = vunpack.c.l.b16 %v4790_v50 }
 0x3db   :  { %v2312_v40 = vpack.c.bf16 %v2280_v24, %v2280_v24  ;;  %2494 = vadd.xlane.f32.xlu2 %v2456_v17 }
 0x3dc   :  { %v2330_v41 = vunpack.c.l.bf16 %v2298_v51 }
 0x3dd   :  { %v2344_v8 = vunpack.c.l.bf16 %v2312_v40 }
 0x3de   :  { %v3362_v44 = vpop.eup %3361  ;;  %v2370_v6 = vmul.f32 1.442695, %v2330_v41 }
 0x3df   :  { %v3364_v62 = vpop.eup %3363  ;;  %v2425_v13 = vpack.c.bf16 %v3362_v44, %v3362_v44  ;;  %v2398_v26 = vmul.f32 1.442695, %v2344_v8 }
 0x3e0   :  { %v2213_v0 = vpop.xlane.xlu2 %2212  ;;  %v4792_v25 = vpack.c.bf16 %v3364_v62, %v3364_v62  ;;  %3365 = vpow2.f32 %v2370_v6  ;;  %v2241_v63 = vpop.xlane.xlu0 %2240 }
 0x3e1   :  { %v2267_v36 = vsub.f32 %v4650_v49, %v2213_v0  ;;  %v2281_v19 = vsub.f32 %v4654_v35, %v2241_v63  ;;  %v2457_v46 = vunpack.c.l.bf16 %v2425_v13  ;;  %v2569_v34 = vunpack.c.l.b16 %v2425_v13 }
 0x3e2   :  { %v2712_v52 = vunpack.c.l.b16 %v4792_v25  ;;  %3367 = vpow2.f32 %v2398_v26 }
 0x3e3   :  { %v2299_v57 = vpack.c.bf16 %v2267_v36, %v2267_v36  ;;  %v2313_v60 = vpack.c.bf16 %v2281_v19, %v2281_v19  ;;  %2496 = vadd.xlane.f32.xlu0 %v2457_v46  ;;  %v2581_v7 = vpack.c.b16 %v2569_v34, %v2568_v32 }
 0x3e4   :  { %v2725_v61 = vpack.c.b16 %v2712_v52, %v2711_v10 }
 0x3e5   :  { %v2331_v55 = vunpack.c.l.bf16 %v2299_v57  ;;  %v2345_v2 = vunpack.c.l.bf16 %v2313_v60  ;;  %2665 = vmatmul.bf16.gmra.mxu3 %v2581_v7 }
 0x3e6   :  { %v3366_v49 = vpop.eup %3365  ;;  %2805 = vmatmul.bf16.gmra.mxu1 %v2725_v61 }
 0x3e7   :  { %v2372_v30 = vmul.f32 1.442695, %v2331_v55  ;;  %v2400_v15 = vmul.f32 1.442695, %v2345_v2  ;;  %v2426_v21 = vpack.c.bf16 %v3366_v49, %v3366_v49 }
 0x3e8   :  { %v2215_v35 = vpop.xlane.xlu2 %2214  ;;  %v2243_v22 = vpop.xlane.xlu0 %2242 }
 0x3e9   :  { %3369 = vpow2.f32 %v2372_v30  ;;  %v2268_v53 = vsub.f32 %v4662_v42, %v2215_v35  ;;  %v2282_v12 = vsub.f32 %v4666_v45, %v2243_v22  ;;  %v2458_v16 = vunpack.c.l.bf16 %v2426_v21  ;;  %v3368_v56 = vpop.eup %3367 }
 0x3ea   :  { %3371 = vpow2.f32 %v2400_v15  ;;  %v4800_v27 = vpack.c.bf16 %v3368_v56, %v3368_v56  ;;  %v2570_v41 = vunpack.c.l.b16 %v2426_v21 }
 0x3eb   :  { %v2300_v29 = vpack.c.bf16 %v2268_v53, %v2268_v53  ;;  %v2314_v59 = vpack.c.bf16 %v2282_v12, %v2282_v12  ;;  %2498 = vadd.xlane.f32.xlu1 %v2458_v16 }
 0x3ec   :  { %v2713_v0 = vunpack.c.l.b16 %v4800_v27 }
 0x3ed   :  { %v2332_v18 = vunpack.c.l.bf16 %v2300_v29  ;;  %v2346_v20 = vunpack.c.l.bf16 %v2314_v59 }
 0x3ef   :  { %v3370_v14 = vpop.eup %3369  ;;  %v2374_v54 = vmul.f32 1.442695, %v2332_v18  ;;  %v2245_v17 = vpop.xlane.xlu1 %2244  ;;  %v2402_v42 = vmul.f32 1.442695, %v2346_v20 }
 0x3f0   :  { %v3372_v24 = vpop.eup %3371  ;;  %v2427_v51 = vpack.c.bf16 %v3370_v14, %v3370_v14  ;;  %v2217_v9 = vpop.xlane.xlu0 %2216  ;;  %v2283_v45 = vsub.f32 %v4680_v4, %v2245_v17 }
 0x3f1   :  { %v4802_v40 = vpack.c.bf16 %v3372_v24, %v3372_v24  ;;  %3373 = vpow2.f32 %v2374_v54  ;;  %v2269_v8 = vsub.f32 %v4687_v47, %v2217_v9 }
 0x3f2   :  { %v2459_v44 = vunpack.c.l.bf16 %v2427_v51  ;;  %v2571_v6 = vunpack.c.l.b16 %v2427_v51  ;;  %v2315_v62 = vpack.c.bf16 %v2283_v45, %v2283_v45  ;;  %3375 = vpow2.f32 %v2402_v42 }
 0x3f3   :  { %v2714_v13 = vunpack.c.l.b16 %v4802_v40  ;;  %v2301_v32 = vpack.c.bf16 %v2269_v8, %v2269_v8 }
 0x3f4   :  { %2500 = vadd.xlane.f32.xlu2 %v2459_v44  ;;  %v2582_v36 = vpack.c.b16 %v2571_v6, %v2570_v41  ;;  %v2347_v63 = vunpack.c.l.bf16 %v2315_v62 }
 0x3f5   :  { %v2726_v26 = vpack.c.b16 %v2714_v13, %v2713_v0  ;;  %v2333_v19 = vunpack.c.l.bf16 %v2301_v32  ;;  %v4820_v13 = vpop.f32.mrf.mxu3 }
 0x3f6   :  { %2670 = vmatmul.bf16.gmra.mxu3 %v2582_v36  ;;  %v2404_v4 = vmul.f32 1.442695, %v2347_v63 }
 0x3f7   :  { %v3374_v46 = vpop.eup %3373  ;;  %2810 = vmatmul.bf16.gmra.mxu1 %v2726_v26  ;;  %v2376_v34 = vmul.f32 1.442695, %v2333_v19  ;;  %v2247_v47 = vpop.xlane.xlu1 %2246 }
 0x3f8   :  { %v2428_v57 = vpack.c.bf16 %v3374_v46, %v3374_v46  ;;  %3377 = vpow2.f32 %v2404_v4  ;;  %v2219_v10 = vpop.xlane.xlu0 %2218  ;;  %v2284_v52 = vsub.f32 %v4698_v31, %v2247_v47  ;;  %v3376_v55 = vpop.eup %3375 }
 0x3f9   :  { %3379 = vpow2.f32 %v2376_v34  ;;  %v2270_v60 = vsub.f32 %v4705_v28, %v2219_v10  ;;  %v4810_v49 = vpack.c.bf16 %v3376_v55, %v3376_v55 }
 0x3fa   :  { %v2460_v7 = vunpack.c.l.bf16 %v2428_v57  ;;  %v2316_v61 = vpack.c.bf16 %v2284_v52, %v2284_v52  ;;  %v2572_v31 = vunpack.c.l.b16 %v2428_v57 }
 0x3fb   :  { %v2302_v2 = vpack.c.bf16 %v2270_v60, %v2270_v60  ;;  %v2715_v18 = vunpack.c.l.b16 %v4810_v49 }
 0x3fc   :  { %2502 = vadd.xlane.f32.xlu0 %v2460_v7  ;;  %v2348_v15 = vunpack.c.l.bf16 %v2316_v61 }
 0x3fd   :  { %v2334_v30 = vunpack.c.l.bf16 %v2302_v2 }
 0x3fe   :  { %v3378_v35 = vpop.eup %3377  ;;  %v2406_v59 = vmul.f32 1.442695, %v2348_v15 }
 0x3ff   :  { %v3380_v21 = vpop.eup %3379  ;;  %v4812_v53 = vpack.c.bf16 %v3378_v35, %v3378_v35  ;;  %v2378_v22 = vmul.f32 1.442695, %v2334_v30  ;;  %v2221_v12 = vpop.xlane.xlu1 %2220 }
 0x400   :  { %v2249_v16 = vpop.xlane.xlu2 %2248  ;;  %v2271_v29 = vsub.f32 %v4716_v11, %v2221_v12  ;;  %v2429_v56 = vpack.c.bf16 %v3380_v21, %v3380_v21  ;;  %v4830_v12 = vpop.f32.mrf.mxu3 }
 0x401   :  { %v2285_v28 = vsub.f32 %v4720_v33, %v2249_v16  ;;  %3381 = vpow2.f32 %v2378_v22  ;;  %v2716_v20 = vunpack.c.l.b16 %v4812_v53 }
 0x402   :  { %v2303_v14 = vpack.c.bf16 %v2271_v29, %v2271_v29  ;;  %v2461_v24 = vunpack.c.l.bf16 %v2429_v56  ;;  %v2573_v17 = vunpack.c.l.b16 %v2429_v56  ;;  %3383 = vpow2.f32 %v2406_v59 }
 0x403   :  { %v2317_v54 = vpack.c.bf16 %v2285_v28, %v2285_v28  ;;  %v2727_v51 = vpack.c.b16 %v2716_v20, %v2715_v18 }
 0x404   :  { %v2335_v42 = vunpack.c.l.bf16 %v2303_v14  ;;  %2504 = vadd.xlane.f32.xlu1 %v2461_v24  ;;  %v2583_v45 = vpack.c.b16 %v2573_v17, %v2572_v31 }
 0x405   :  { %v2349_v9 = vunpack.c.l.bf16 %v2317_v54  ;;  %v2466_v54 = vunpack.c.l.bf16 %v4769_v48 }
 0x406   :  { %v2380_v11 = vmul.f32 1.442695, %v2335_v42  ;;  %2675 = vmatmul.bf16.gmra.mxu3 %v2583_v45 }
 0x407   :  { %v2408_v41 = vmul.f32 1.442695, %v2349_v9  ;;  %2815 = vmatmul.bf16.gmra.mxu1 %v2727_v51  ;;  %v3382_v33 = vpop.eup %3381  ;;  %v2223_v8 = vpop.xlane.xlu1 %2222 }
 0x408   :  { %v2251_v44 = vpop.xlane.xlu2 %2250  ;;  %3385 = vpow2.f32 %v2380_v11  ;;  %v2272_v6 = vsub.f32 %v4728_v58, %v2223_v8  ;;  %v2430_v0 = vpack.c.bf16 %v3382_v33, %v3382_v33  ;;  %v3384_v26 = vpop.eup %3383 }
 0x409   :  { %v2286_v62 = vsub.f32 %v4732_v1, %v2251_v44  ;;  %3387 = vpow2.f32 %v2408_v41  ;;  %v4822_v34 = vpack.c.bf16 %v3384_v26, %v3384_v26  ;;  %v2656_v9 = vpop.f32.mrf.mxu3 }
 0x40a   :  { %v2304_v32 = vpack.c.bf16 %v2272_v6, %v2272_v6  ;;  %v2462_v63 = vunpack.c.l.bf16 %v2430_v0  ;;  %v2574_v61 = vunpack.c.l.b16 %v2430_v0 }
 0x40b   :  { %v2318_v36 = vpack.c.bf16 %v2286_v62, %v2286_v62  ;;  %v2717_v21 = vunpack.c.l.b16 %v4822_v34 }
 0x40c   :  { %v2336_v19 = vunpack.c.l.bf16 %v2304_v32  ;;  %2506 = vadd.xlane.f32.xlu2 %v2462_v63 }
 0x40d   :  { %v2350_v46 = vunpack.c.l.bf16 %v2318_v36  ;;  %v2469_v36 = vunpack.c.l.bf16 %v4781_v5 }
 0x40e   :  { %v3386_v4 = vpop.eup %3385  ;;  %v2382_v47 = vmul.f32 1.442695, %v2336_v19 }
 0x40f   :  { %v3388_v57 = vpop.eup %3387  ;;  %v2253_v58 = vpop.xlane.xlu0 %2252  ;;  %v2431_v52 = vpack.c.bf16 %v3386_v4, %v3386_v4  ;;  %v2410_v55 = vmul.f32 1.442695, %v2350_v46 }
 0x410   :  { %v2225_v10 = vpop.xlane.xlu2 %2224  ;;  %v4824_v1 = vpack.c.bf16 %v3388_v57, %v3388_v57  ;;  %3389 = vpow2.f32 %v2382_v47  ;;  %v2287_v7 = vsub.f32 %v4745_v23, %v2253_v58 }
 0x411   :  { %v2273_v60 = vsub.f32 %v4741_v37, %v2225_v10  ;;  %v2463_v2 = vunpack.c.l.bf16 %v2431_v52  ;;  %v2575_v30 = vunpack.c.l.b16 %v2431_v52  ;;  %3391 = vpow2.f32 %v2410_v55 }
 0x412   :  { %v2319_v35 = vpack.c.bf16 %v2287_v7, %v2287_v7  ;;  %v2718_v22 = vunpack.c.l.b16 %v4824_v1 }
 0x413   :  { %v2305_v15 = vpack.c.bf16 %v2273_v60, %v2273_v60  ;;  %2508 = vadd.xlane.f32.xlu0 %v2463_v2  ;;  %v2584_v16 = vpack.c.b16 %v2575_v30, %v2574_v61  ;;  %v2468_v61 = vunpack.c.l.bf16 %v4779_v43  ;;  %v2472_v2 = vunpack.c.l.bf16 %v4800_v27 }
 0x414   :  { %v2351_v29 = vunpack.c.l.bf16 %v2319_v35  ;;  %v2728_v28 = vpack.c.b16 %v2718_v22, %v2717_v21  ;;  %v2470_v30 = vunpack.c.l.bf16 %v4790_v50  ;;  %v2475_v43 = vunpack.c.l.bf16 %v4812_v53 }
 0x415   :  { %v2337_v31 = vunpack.c.l.bf16 %v2305_v15  ;;  %v2473_v27 = vunpack.c.l.bf16 %v4802_v40 }
 0x416   :  { %v3390_v37 = vpop.eup %3389  ;;  %v2412_v56 = vmul.f32 1.442695, %v2351_v29  ;;  %2680 = vmatmul.bf16.gmra.mxu3 %v2584_v16 }
 0x417   :  { %v2384_v23 = vmul.f32 1.442695, %v2337_v31  ;;  %2820 = vmatmul.bf16.gmra.mxu1 %v2728_v28  ;;  %v2255_v18 = vpop.xlane.xlu0 %2254  ;;  %v2432_v20 = vpack.c.bf16 %v3390_v37, %v3390_v37  ;;  %v3392_v51 = vpop.eup %3391  ;;  %v2474_v37 = vunpack.c.l.bf16 %v4810_v49 }
 0x418   :  { %v2483_v59 = vpop.xlane.xlu2 %2482  ;;  %v2288_v14 = vsub.f32 %v4752_v3, %v2255_v18  ;;  %v4834_v11 = vpack.c.bf16 %v3392_v51, %v3392_v51  ;;  %v2467_v3 = vunpack.c.l.bf16 %v4771_v38 }
 0x419   :  { %3393 = vpow2.f32 %v2384_v23  ;;  %v2464_v24 = vunpack.c.l.bf16 %v2432_v20  ;;  %v2576_v0 = vunpack.c.l.b16 %v2432_v20 }
 0x41a   :  { %3395 = vpow2.f32 %v2412_v56  ;;  %v2320_v17 = vpack.c.bf16 %v2288_v14, %v2288_v14  ;;  %v2719_v4 = vunpack.c.l.b16 %v4834_v11  ;;  %v2478_v23 = vunpack.c.l.bf16 %v4834_v11 }
 0x41b   :  { %3397 = vrcp.f32 %v2483_v59  ;;  %2514 = vadd.xlane.f32.xlu0 %v2466_v54  ;;  %2510 = vadd.xlane.f32.xlu1 %v2464_v24  ;;  %v2476_v56 = vunpack.c.l.bf16 %v4822_v34 }
 0x41c   :  { %v2352_v42 = vunpack.c.l.bf16 %v2320_v17 }
 0x41e   :  { %v2414_v48 = vmul.f32 1.442695, %v2352_v42 }
 0x41f   :  { %v3394_v45 = vpop.eup %3393  ;;  %v2485_v8 = vpop.xlane.xlu0 %2484 }
 0x420   :  { %v3396_v41 = vpop.eup %3395  ;;  %v2489_v33 = vpop.xlane.xlu2 %2488  ;;  %v2433_v44 = vpack.c.bf16 %v3394_v45, %v3394_v45 }
 0x421   :  { %v3398_v6 = vpop.eup %3397  ;;  %v4837_v62 = vpack.c.bf16 %v3396_v41, %v3396_v41  ;;  %v2257_v32 = vpop.xlane.xlu1 %2256  ;;  %3399 = vrcp.f32 %v2489_v33 }
 0x422   :  { %v2868_v63 = vmul.f32 %v3398_v6, %v4820_v13  ;;  %v2289_v26 = vsub.f32 %v4760_v39, %v2257_v32  ;;  %v2465_v19 = vunpack.c.l.bf16 %v2433_v44  ;;  %3401 = vrcp.f32 %v2485_v8  ;;  %v2658_v39 = vpop.f32.mrf.mxu3 }
 0x423   :  { %v2577_v46 = vunpack.c.l.b16 %v2433_v44  ;;  %v2720_v38 = vunpack.c.l.b16 %v4837_v62  ;;  %2520 = vadd.xlane.f32.xlu0 %v2469_v36  ;;  %2516 = vadd.xlane.f32.xlu1 %v2467_v3  ;;  %3403 = vpow2.f32 %v2414_v48  ;;  %v2479_v59 = vunpack.c.l.bf16 %v4837_v62 }
 0x424   :  { %2900 = vst [vmem:[#allocation7] sm:$0xff] %v2868_v63  ;;  %v2321_v47 = vpack.c.bf16 %v2289_v26, %v2289_v26  ;;  %2512 = vadd.xlane.f32.xlu2 %v2465_v19 }
 0x425   :  { %v2585_v57 = vpack.c.b16 %v2577_v46, %v2576_v0  ;;  %v2729_v10 = vpack.c.b16 %v2720_v38, %v2719_v4 }
 0x426   :  { %v2353_v5 = vunpack.c.l.bf16 %v2321_v47 }
 0x427   :  { %2685 = vmatmul.bf16.gmra.mxu3 %v2585_v57  ;;  %2825 = vmatmul.bf16.gmra.mxu1 %v2729_v10  ;;  %v3400_v13 = vpop.eup %3399  ;;  %v2491_v49 = vpop.xlane.xlu0 %2490 }
 0x428   :  { %v2416_v58 = vmul.f32 1.442695, %v2353_v5  ;;  %v3402_v52 = vpop.eup %3401  ;;  %v2871_v60 = vmul.f32 %v3400_v13, %v2658_v39 }
 0x429   :  { %v2487_v7 = vpop.xlane.xlu1 %2486  ;;  %v2869_v55 = vmul.f32 %v3402_v52, %v4830_v12  ;;  %v3404_v15 = vpop.eup %3403  ;;  %v2471_v12 = vunpack.c.l.bf16 %v4792_v25  ;;  %v2477_v25 = vunpack.c.l.bf16 %v4824_v1 }
 0x42a   :  { %3405 = vpow2.f32 %v2416_v58  ;;  %2903 = vst [vmem:[#allocation7 + $0x18] sm:$0xff] %v2871_v60  ;;  %v2448_v35 = vpack.c.bf16 %v3404_v15, %v3404_v15 }
 0x42b   :  { %3407 = vrcp.f32 %v2487_v7  ;;  %2901 = vst [vmem:[#allocation7 + $0x8] sm:$0xff] %v2869_v55  ;;  %2526 = vadd.xlane.f32.xlu0 %v2472_v2  ;;  %2522 = vadd.xlane.f32.xlu1 %v2470_v30 }
 0x42c   :  { %2518 = vadd.xlane.f32.xlu2 %v2468_v61  ;;  %v2721_v29 = vunpack.c.l.b16 %v2448_v35  ;;  %v2480_v18 = vunpack.c.l.bf16 %v2448_v35  ;;  %3409 = vrcp.f32 %v2491_v49 }
 0x430   :  { %v3406_v21 = vpop.eup %3405 }
 0x431   :  { %v3408_v22 = vpop.eup %3407  ;;  %v2449_v16 = vpack.c.bf16 %v3406_v21, %v3406_v21 }
 0x432   :  { %v2870_v31 = vmul.f32 %v3408_v22, %v2656_v9  ;;  %v3410_v54 = vpop.eup %3409 }
 0x433   :  { %v2722_v28 = vunpack.c.l.b16 %v2449_v16  ;;  %2532 = vadd.xlane.f32.xlu0 %v2475_v43  ;;  %2528 = vadd.xlane.f32.xlu1 %v2473_v27  ;;  %v2481_v40 = vunpack.c.l.bf16 %v2449_v16 }
 0x434   :  { %2902 = vst [vmem:[#allocation7 + $0x10] sm:$0xff] %v2870_v31  ;;  %2524 = vadd.xlane.f32.xlu2 %v2471_v12 }
 0x435   :  { %v2730_v50 = vpack.c.b16 %v2722_v28, %v2721_v29 }
 0x437   :  { %2830 = vmatmul.bf16.gmra.mxu1 %v2730_v50 }
 0x43b   :  { %2538 = vadd.xlane.f32.xlu0 %v2478_v23  ;;  %2534 = vadd.xlane.f32.xlu1 %v2476_v56 }
 0x43c   :  { %2530 = vadd.xlane.f32.xlu2 %v2474_v37 }
 0x442   :  { %v4855_v53 = vpop.f32.mrf.mxu1 }
 0x443   :  { %2544 = vadd.xlane.f32.xlu0 %v2481_v40  ;;  %2540 = vadd.xlane.f32.xlu1 %v2479_v59 }
 0x444   :  { %2536 = vadd.xlane.f32.xlu2 %v2477_v25 }
 0x446   :  { %v2493_v14 = vpop.xlane.xlu1 %2492 }
 0x447   :  { %3411 = vrcp.f32 %v2493_v14 }
 0x44a   :  { %v4858_v20 = vpop.f32.mrf.mxu1 }
 0x44c   :  { %2542 = vadd.xlane.f32.xlu2 %v2480_v18 }
 0x44d   :  { %v3412_v42 = vpop.eup %3411 }
 0x44e   :  { %v2495_v51 = vpop.xlane.xlu2 %2494 }
 0x44f   :  { %3413 = vrcp.f32 %v2495_v51 }
 0x453   :  { %v4860_v34 = vpop.f32.mrf.mxu1 }
 0x455   :  { %v3414_v33 = vpop.eup %3413 }
 0x456   :  { %v2497_v41 = vpop.xlane.xlu0 %2496 }
 0x457   :  { %3415 = vrcp.f32 %v2497_v41 }
 0x458   :  { %v2661_v24 = vpop.f32.mrf.mxu3 }
 0x459   :  { %v2872_v1 = vmul.f32 %v3410_v54, %v2661_v24 }
 0x45b   :  { %2904 = vst [vmem:[#allocation7 + $0x20] sm:$0xff] %v2872_v1  ;;  %v4862_v17 = vpop.f32.mrf.mxu1 }
 0x45d   :  { %v3416_v62 = vpop.eup %3415 }
 0x45e   :  { %v2499_v6 = vpop.xlane.xlu1 %2498 }
 0x45f   :  { %3417 = vrcp.f32 %v2499_v6 }
 0x460   :  { %v2663_v9 = vpop.f32.mrf.mxu3 }
 0x461   :  { %v2873_v45 = vmul.f32 %v3412_v42, %v2663_v9 }
 0x463   :  { %2905 = vst [vmem:[#allocation7 + $0x28] sm:$0xff] %v2873_v45  ;;  %v4864_v11 = vpop.f32.mrf.mxu1 }
 0x465   :  { %v3418_v63 = vpop.eup %3417 }
 0x467   :  { %v2501_v36 = vpop.xlane.xlu2 %2500 }
 0x468   :  { %v2666_v8 = vpop.f32.mrf.mxu3  ;;  %3419 = vrcp.f32 %v2501_v36 }
 0x469   :  { %v2874_v44 = vmul.f32 %v3414_v33, %v2666_v8 }
 0x46b   :  { %2906 = vst [vmem:[#allocation7 + $0x30] sm:$0xff] %v2874_v44  ;;  %v4866_v3 = vpop.f32.mrf.mxu1 }
 0x46e   :  { %v3420_v38 = vpop.eup %3419 }
 0x46f   :  { %v2503_v4 = vpop.xlane.xlu0 %2502 }
 0x470   :  { %v2668_v48 = vpop.f32.mrf.mxu3  ;;  %3421 = vrcp.f32 %v2503_v4 }
 0x471   :  { %v2875_v0 = vmul.f32 %v3416_v62, %v2668_v48 }
 0x473   :  { %2907 = vst [vmem:[#allocation7 + $0x38] sm:$0xff] %v2875_v0 }
 0x474   :  { %v4868_v32 = vpop.f32.mrf.mxu1 }
 0x476   :  { %v3422_v39 = vpop.eup %3421 }
 0x477   :  { %v2505_v5 = vpop.xlane.xlu1 %2504 }
 0x478   :  { %3423 = vrcp.f32 %v2505_v5 }
 0x479   :  { %v2671_v26 = vpop.f32.mrf.mxu3 }
 0x47a   :  { %v2876_v19 = vmul.f32 %v3418_v63, %v2671_v26 }
 0x47c   :  { %2908 = vst [vmem:[#allocation7 + $0x40] sm:$0xff] %v2876_v19  ;;  %v4870_v46 = vpop.f32.mrf.mxu1 }
 0x47e   :  { %v3424_v2 = vpop.eup %3423 }
 0x47f   :  { %v2507_v7 = vpop.xlane.xlu2 %2506 }
 0x481   :  { %v2673_v47 = vpop.f32.mrf.mxu3 }
 0x482   :  { %v2877_v57 = vmul.f32 %v3420_v38, %v2673_v47 }
 0x484   :  { %2909 = vst [vmem:[#allocation7 + $0x48] sm:$0xff] %v2877_v57  ;;  %v4872_v10 = vpop.f32.mrf.mxu1 }
 0x486   :  { %v2509_v13 = vpop.xlane.xlu0 %2508 }
 0x489   :  { %v2676_v58 = vpop.f32.mrf.mxu3 }
 0x48a   :  { %v2878_v52 = vmul.f32 %v3422_v39, %v2676_v58 }
 0x48c   :  { %v4874_v60 = vpop.f32.mrf.mxu1  ;;  %2910 = vst [vmem:[#allocation7 + $0x50] sm:$0xff] %v2878_v52 }
 0x48e   :  { %v2515_v55 = vpop.xlane.xlu0 %2514  ;;  %v2511_v61 = vpop.xlane.xlu1 %2510 }
 0x48f   :  { %3425 = vrcp.f32 %v2515_v55 }
 0x490   :  { %3427 = vrcp.f32 %v2507_v7 }
 0x491   :  { %v2678_v30 = vpop.f32.mrf.mxu3 }
 0x492   :  { %v2879_v15 = vmul.f32 %v3424_v2, %v2678_v30 }
 0x494   :  { %v4876_v35 = vpop.f32.mrf.mxu1  ;;  %2911 = vst [vmem:[#allocation7 + $0x58] sm:$0xff] %v2879_v15 }
 0x495   :  { %v3426_v21 = vpop.eup %3425 }
 0x496   :  { %v2884_v22 = vmul.f32 %v3426_v21, %v4855_v53  ;;  %v2521_v31 = vpop.xlane.xlu0 %2520  ;;  %v2517_v12 = vpop.xlane.xlu1 %2516 }
 0x497   :  { %v2513_v16 = vpop.xlane.xlu2 %2512  ;;  %3429 = vrcp.f32 %v2521_v31  ;;  %v3428_v43 = vpop.eup %3427 }
 0x498   :  { %2916 = vst [vmem:[#allocation7 + $0x80] sm:$0xff] %v2884_v22  ;;  %3431 = vrcp.f32 %v2517_v12 }
 0x499   :  { %v2681_v27 = vpop.f32.mrf.mxu3  ;;  %3433 = vrcp.f32 %v2509_v13 }
 0x49a   :  { %v2880_v29 = vmul.f32 %v3428_v43, %v2681_v27 }
 0x49c   :  { %v4879_v28 = vpop.f32.mrf.mxu1  ;;  %2912 = vst [vmem:[#allocation7 + $0x60] sm:$0xff] %v2880_v29 }
 0x49d   :  { %v3430_v50 = vpop.eup %3429 }
 0x49e   :  { %v2527_v23 = vpop.xlane.xlu0 %2526  ;;  %v3432_v56 = vpop.eup %3431  ;;  %v2887_v25 = vmul.f32 %v3430_v50, %v4862_v17 }
 0x49f   :  { %v2519_v37 = vpop.xlane.xlu2 %2518  ;;  %v2523_v40 = vpop.xlane.xlu1 %2522  ;;  %v2885_v53 = vmul.f32 %v3432_v56, %v4858_v20 }
 0x4a0   :  { %3435 = vrcp.f32 %v2519_v37  ;;  %v3434_v59 = vpop.eup %3433  ;;  %2919 = vst [vmem:[#allocation7 + $0x98] sm:$0xff] %v2887_v25 }
 0x4a1   :  { %3437 = vrcp.f32 %v2527_v23  ;;  %v2683_v18 = vpop.f32.mrf.mxu3  ;;  %2917 = vst [vmem:[#allocation7 + $0x88] sm:$0xff] %v2885_v53 }
 0x4a2   :  { %3439 = vrcp.f32 %v2523_v40  ;;  %v2881_v49 = vmul.f32 %v3434_v59, %v2683_v18 }
 0x4a3   :  { %3441 = vrcp.f32 %v2511_v61 }
 0x4a4   :  { %v2826_v14 = vpop.f32.mrf.mxu1  ;;  %2913 = vst [vmem:[#allocation7 + $0x68] sm:$0xff] %v2881_v49 }
 0x4a6   :  { %v3436_v54 = vpop.eup %3435  ;;  %v2533_v17 = vpop.xlane.xlu0 %2532 }
 0x4a7   :  { %v3438_v24 = vpop.eup %3437  ;;  %v2886_v1 = vmul.f32 %v3436_v54, %v4860_v34  ;;  %v2525_v51 = vpop.xlane.xlu2 %2524 }
 0x4a8   :  { %v3440_v42 = vpop.eup %3439  ;;  %v2890_v9 = vmul.f32 %v3438_v24, %v4868_v32  ;;  %3443 = vrcp.f32 %v2525_v51  ;;  %v2529_v20 = vpop.xlane.xlu1 %2528 }
 0x4a9   :  { %2918 = vst [vmem:[#allocation7 + $0x90] sm:$0xff] %v2886_v1  ;;  %v2888_v45 = vmul.f32 %v3440_v42, %v4864_v11  ;;  %3445 = vrcp.f32 %v2533_v17  ;;  %v3442_v41 = vpop.eup %3441 }
 0x4aa   :  { %2922 = vst [vmem:[#allocation7 + $0xb0] sm:$0xff] %v2890_v9  ;;  %3447 = vrcp.f32 %v2529_v20  ;;  %v2686_v33 = vpop.f32.mrf.mxu3 }
 0x4ab   :  { %2920 = vst [vmem:[#allocation7 + $0xa0] sm:$0xff] %v2888_v45  ;;  %v2882_v8 = vmul.f32 %v3442_v41, %v2686_v33  ;;  %3449 = vrcp.f32 %v2513_v16 }
 0x4ac   :  { %v2828_v44 = vpop.f32.mrf.mxu1 }
 0x4ad   :  { %2914 = vst [vmem:[#allocation7 + $0x70] sm:$0xff] %v2882_v8 }
 0x4ae   :  { %v3444_v34 = vpop.eup %3443  ;;  %v2539_v0 = vpop.xlane.xlu0 %2538 }
 0x4af   :  { %v3446_v6 = vpop.eup %3445  ;;  %v2889_v62 = vmul.f32 %v3444_v34, %v4866_v3  ;;  %v2531_v48 = vpop.xlane.xlu2 %2530 }
 0x4b0   :  { %v3448_v32 = vpop.eup %3447  ;;  %v2893_v36 = vmul.f32 %v3446_v6, %v4874_v60  ;;  %3451 = vrcp.f32 %v2531_v48  ;;  %v2535_v11 = vpop.xlane.xlu1 %2534 }
 0x4b1   :  { %2921 = vst [vmem:[#allocation7 + $0xa8] sm:$0xff] %v2889_v62  ;;  %v2891_v63 = vmul.f32 %v3448_v32, %v4870_v46  ;;  %3453 = vrcp.f32 %v2539_v0  ;;  %v3450_v26 = vpop.eup %3449 }
 0x4b2   :  { %2925 = vst [vmem:[#allocation7 + $0xc8] sm:$0xff] %v2893_v36  ;;  %3455 = vrcp.f32 %v2535_v11  ;;  %v2688_v19 = vpop.f32.mrf.mxu3 }
 0x4b3   :  { %2923 = vst [vmem:[#allocation7 + $0xb8] sm:$0xff] %v2891_v63  ;;  %v2883_v4 = vmul.f32 %v3450_v26, %v2688_v19 }
 0x4b4   :  { %v2831_v38 = vpop.f32.mrf.mxu1 }
 0x4b5   :  { %2915 = vst [vmem:[#allocation7 + $0x78] sm:$0xff] %v2883_v4 }
 0x4b6   :  { %v3452_v3 = vpop.eup %3451  ;;  %v2545_v13 = vpop.xlane.xlu0 %2544 }
 0x4b7   :  { %v3454_v47 = vpop.eup %3453  ;;  %v2892_v57 = vmul.f32 %v3452_v3, %v4872_v10  ;;  %v2537_v5 = vpop.xlane.xlu2 %2536 }
 0x4b8   :  { %v3456_v39 = vpop.eup %3455  ;;  %v2896_v58 = vmul.f32 %v3454_v47, %v2826_v14  ;;  %3457 = vrcp.f32 %v2537_v5  ;;  %v2541_v52 = vpop.xlane.xlu1 %2540 }
 0x4b9   :  { %2924 = vst [vmem:[#allocation7 + $0xc0] sm:$0xff] %v2892_v57  ;;  %v2894_v46 = vmul.f32 %v3456_v39, %v4876_v35  ;;  %3459 = vrcp.f32 %v2545_v13 }
 0x4ba   :  { %2928 = vst [vmem:[#allocation7 + $0xe0] sm:$0xff] %v2896_v58  ;;  %3461 = vrcp.f32 %v2541_v52 }
 0x4bb   :  { %2926 = vst [vmem:[#allocation7 + $0xd0] sm:$0xff] %v2894_v46 }
 0x4bc   :  { %v2833_v61 = vpop.f32.mrf.mxu1 }
 0x4be   :  { %v3458_v60 = vpop.eup %3457 }
 0x4bf   :  { %v3460_v7 = vpop.eup %3459  ;;  %v2895_v55 = vmul.f32 %v3458_v60, %v4879_v28  ;;  %v2543_v2 = vpop.xlane.xlu2 %2542 }
 0x4c0   :  { %v3462_v10 = vpop.eup %3461  ;;  %v2899_v30 = vmul.f32 %v3460_v7, %v2833_v61  ;;  %3463 = vrcp.f32 %v2543_v2 }
 0x4c1   :  { %2927 = vst [vmem:[#allocation7 + $0xd8] sm:$0xff] %v2895_v55  ;;  %v2897_v15 = vmul.f32 %v3462_v10, %v2828_v44 }
 0x4c2   :  { %2931 = vst [vmem:[#allocation7 + $0xf8] sm:$0xff] %v2899_v30 }
 0x4c3   :  { %2929 = vst [vmem:[#allocation7 + $0xe8] sm:$0xff] %v2897_v15 }
 0x4c6   :  { %v3464_v35 = vpop.eup %3463 }
 0x4c7   :  { %v2898_v21 = vmul.f32 %v3464_v35, %v2831_v38 }
 0x4c9   :  { %2930 = vst [vmem:[#allocation7 + $0xf0] sm:$0xff] %v2898_v21 }
 0x4ca   :  { %2944 = dma.vmem_to_hbm [thread:$0]  %s2937_s1, 4096, %s2939_s25, [#allocation4], %s3550_s26, %s3550_s26, %s3551_s27  }
 0x4cb   :  { %3541 = dma.done.wait [#allocation4], 4096  }
 0x4cc   :  { %3542 = vsyncadd [#allocation4], 4294963200 }
 0x4cd   :  { %2949 = vsyncpa [#allocation3], 1 }
 0x4ce   :  { %2950 = vsyncpa [#allocation6], 1 }
 0x4cf   :  { %2951 = vsyncpa [#allocation4], 1 }

</bundles_post_ra>
